<compile_context>
chip_gen: v7x
topology: tpu7x:2x2x1
jax: 0.10.0
libtpu: 0.0.40
codegen_flags: <defaults>
</compile_context>

<pallas_src>
import functools
import math
from typing import NamedTuple

import jax
import jax.numpy as jnp
from jax import lax
from jax.experimental import pallas as pl
from jax.experimental.pallas import tpu as pltpu


# --------------------------------------------------------------------------
# One fused kernel: 2-layer (bi)LSTM + temporal attention + classifier.
# --------------------------------------------------------------------------

def _fused_forward_kernel(xcnn_ref, xstat_ref, mask_ref, pool_ref,
                          wih0c_ref, wih0s_ref, b0_ref, whh0_ref,
                          wih1_ref, b1_ref, whh1_ref,
                          wqkv_ref, bqkv_ref, wo_ref, bo_ref,
                          w1_ref, b1c_ref, w2_ref, b2c_ref,
                          o_ref,
                          seq0_ref, seq1_ref,
                          *, seq_len, batch, num_heads):
    """Everything in VMEM.  Flat time-major activation layout: row = t*B + b.

    xcnn_ref : (T*B, Fc)   raw cnn features, time-major flattened
    xstat_ref: (T*B, Fs)   raw stat features, time-major flattened
    mask_ref : (T*B, T*B)  additive attention mask (0 same batch, -1e30 else)
    pool_ref : (B, T*B)    temporal-mean pooling matrix (1/T on own rows)
    whh*_ref : (nd, H, 4H) recurrent weights per direction
    wih*/b*  : input-projection weights / (b_ih+b_hh), directions concat on cols
    o_ref    : (B, 128)    lane-dense padded logits
    seq0/1   : (T*B, D)    VMEM scratch holding layer-0 / layer-1 output seq
    Gate order matches PyTorch: i, f, g, o.
    """
    T, B = seq_len, batch
    nd, H, G = whh0_ref.shape                      # G = 4H
    D = nd * H
    hd = D // num_heads
    f32 = jnp.float32

    # ---------------- LSTM layer 0: hoisted input projection ---------------
    # (bias b_ih + b_hh folded in; both directions' gate columns in one matmul)
    xw0 = (jnp.dot(xcnn_ref[...], wih0c_ref[...], preferred_element_type=f32)
           + jnp.dot(xstat_ref[...], wih0s_ref[...], preferred_element_type=f32)
           + b0_ref[...])                                        # (T*B, nd*4H)

    def run_direction(xw, whh, d, out_seq_ref):
        """Serial recurrence for direction d; only h @ W_hh is on the chain."""
        h = jnp.zeros((B, H), f32)
        c = jnp.zeros((B, H), f32)
        for t in range(T):                                       # static indices
            tt = t if d == 0 else T - 1 - t
            gates = (xw[tt * B:(tt + 1) * B, d * G:(d + 1) * G]
                     + jnp.dot(h, whh, preferred_element_type=f32))   # (B, 4H)
            sig = jax.nn.sigmoid(gates)          # one full-width EUP push
            i_g = sig[:, 0 * H:1 * H]
            f_g = sig[:, 1 * H:2 * H]
            o_g = sig[:, 3 * H:4 * H]
            g_g = jnp.tanh(gates[:, 2 * H:3 * H])
            c = f_g * c + i_g * g_g
            h = o_g * jnp.tanh(c)
            # fwd hidden -> cols [0:H], bwd hidden -> cols [H:2H] (PyTorch order)
            out_seq_ref[tt * B:(tt + 1) * B, d * H:(d + 1) * H] = h

    for d in range(nd):
        run_direction(xw0, whh0_ref[d], d, seq0_ref)

    # ---------------- LSTM layer 1 (input = layer-0 output) ----------------
    xw1 = (jnp.dot(seq0_ref[...], wih1_ref[...], preferred_element_type=f32)
           + b1_ref[...])                                        # (T*B, nd*4H)
    for d in range(nd):
        run_direction(xw1, whh1_ref[d], d, seq1_ref)

    # --------- Temporal attention + residual + temporal mean + MLP ---------
    x_seq = seq1_ref[...]                                        # (T*B, D)
    scale = 1.0 / math.sqrt(hd)

    # Fused Q|K|V projection over the whole batch: one (B*T, D) @ (D, 3D).
    qkv = (jnp.dot(x_seq, wqkv_ref[...], preferred_element_type=f32)
           + bqkv_ref[...])                                      # (T*B, 3D)
    wo = wo_ref[...]
    mask = mask_ref[...]                                         # (T*B, T*B)

    # Head outputs folded into the output projection:
    #   attended @ W_o == sum_h (att_h @ W_o[h*hd:(h+1)*hd, :]).
    attended = jnp.zeros((T * B, D), f32)
    for hI in range(num_heads):
        lo = hI * hd
        qh = qkv[:, 0 * D + lo:0 * D + lo + hd]                  # (T*B, hd)
        kh = qkv[:, 1 * D + lo:1 * D + lo + hd]
        vh = qkv[:, 2 * D + lo:2 * D + lo + hd]
        s = lax.dot_general(qh, kh, (((1,), (1,)), ((), ())),
                            preferred_element_type=f32) * scale + mask
        s = s - jnp.max(s, axis=-1, keepdims=True)               # stable softmax
        p = jnp.exp(s)
        p = p * pl.reciprocal(jnp.sum(p, axis=-1, keepdims=True), approx=True)
        ah = jnp.dot(p, vh, preferred_element_type=f32)          # (T*B, hd)
        attended = attended + jnp.dot(ah, wo[lo:lo + hd, :],
                                      preferred_element_type=f32)

    out = attended + bo_ref[...] + x_seq                         # out bias + residual

    # Temporal mean pooling (use_attention=True path) as a tiny constant matmul.
    pooled = jnp.dot(pool_ref[...], out, preferred_element_type=f32)   # (B, D)

    # classifier: Linear -> ReLU -> (Dropout = id) -> Linear (padded to 128 lanes)
    h1 = jnp.maximum(
        jnp.dot(pooled, w1_ref[...], preferred_element_type=f32) + b1c_ref[...],
        0.0)
    logits = (jnp.dot(h1, w2_ref[...], preferred_element_type=f32)
              + b2c_ref[...])                                    # (B, 128)
    o_ref[...] = logits


def fused_forward(xcnn_tm, xstat_tm, attn_mask, pool_mat, p, *,
                  seq_len, batch, num_heads):
    T, B = seq_len, batch
    nd, H, _ = p["whh0"].shape
    D = nd * H
    n_pad = p["w2"].shape[1]

    args = (xcnn_tm, xstat_tm, attn_mask, pool_mat,
            p["wih0c"], p["wih0s"], p["b0"], p["whh0"],
            p["wih1"], p["b1"], p["whh1"],
            p["wqkv"], p["bqkv"], p["wo"], p["bo"],
            p["w1"], p["b1c"], p["w2"], p["b2c"])

    vmem_spec = pl.BlockSpec(memory_space=pltpu.MemorySpace.VMEM)
    kern = functools.partial(_fused_forward_kernel, seq_len=T, batch=B,
                             num_heads=num_heads)
    return pl.pallas_call(
        kern,
        out_shape=jax.ShapeDtypeStruct((B, n_pad), jnp.float32),
        in_specs=[vmem_spec] * len(args),
        out_specs=pl.BlockSpec(memory_space=pltpu.MemorySpace.VMEM),
        scratch_shapes=[pltpu.VMEM((T * B, D), jnp.float32),   # layer-0 output
                        pltpu.VMEM((T * B, D), jnp.float32)],  # layer-1 output
    )(*args)


# --------------------------------------------------------------------------
# Model glue
# --------------------------------------------------------------------------

class Config(NamedTuple):
    lstm_hidden: int
    num_dirs: int        # 2 if bidirectional else 1
    num_heads: int       # TemporalAttention default = 4
    num_classes: int


@functools.partial(jax.jit, static_argnums=0)
def forward(cfg, params, cnn_feats, stat_feats):
    B, T, Fc = cnn_feats.shape
    Fs = stat_feats.shape[2]

    # Time-major flatten of the raw inputs (row = t*B + b).  This is the only
    # wrapper-side data-movement op; all activation concat/transpose now lives
    # inside the single fused kernel.
    xcnn = jnp.transpose(cnn_feats.astype(jnp.float32), (1, 0, 2)).reshape(T * B, Fc)
    xstat = jnp.transpose(stat_feats.astype(jnp.float32), (1, 0, 2)).reshape(T * B, Fs)

    # Constant (shape-only) helpers, folded by XLA:
    #   additive mask so each flat row only attends to its own batch element,
    #   pooling matrix implementing the temporal mean.
    row_b = jnp.arange(T * B, dtype=jnp.int32) % B
    attn_mask = jnp.where(row_b[:, None] == row_b[None, :], 0.0, -1e30
                          ).astype(jnp.float32)                       # (T*B, T*B)
    pool_mat = (jnp.arange(B, dtype=jnp.int32)[:, None] == row_b[None, :]
                ).astype(jnp.float32) / T                             # (B, T*B)

    logits_pad = fused_forward(xcnn, xstat, attn_mask, pool_mat, params,
                               seq_len=T, batch=B, num_heads=cfg.num_heads)
    return logits_pad[:, :cfg.num_classes]


# --------------------------------------------------------------------------
# Deterministic parameters (pre-transposed / pre-padded once)
# --------------------------------------------------------------------------

def make_params(key, cfg, cnn_feature_dim, stat_feature_dim):
    H = cfg.lstm_hidden
    nd = cfg.num_dirs
    D = H * nd                                  # lstm_output_size
    Fc, Fs = cnn_feature_dim, stat_feature_dim
    assert D % cfg.num_heads == 0
    keys = iter(jax.random.split(key, 64))

    def nrm(shape, scale=0.08):
        return scale * jax.random.normal(next(keys), shape, dtype=jnp.float32)

    # LSTM: PyTorch weight_ih (4H, In) / weight_hh (4H, H); gate order i,f,g,o.
    # Per-layer: directions concatenated along gate columns; b = b_ih + b_hh.
    def lstm_layer_params(in_size):
        wih, whh, b = [], [], []
        for _ in range(nd):
            wih.append(nrm((4 * H, in_size)).T)          # (In, 4H)
            whh.append(nrm((4 * H, H)).T)                # (H, 4H)
            b.append(nrm((4 * H,)) + nrm((4 * H,)))
        return (jnp.concatenate(wih, axis=1),            # (In, nd*4H)
                jnp.stack(whh),                          # (nd, H, 4H)
                jnp.concatenate(b).reshape(1, nd * 4 * H))

    wih0, whh0, b0 = lstm_layer_params(Fc + Fs)
    wih0c, wih0s = wih0[:Fc], wih0[Fc:]                  # split cnn/stat rows
    wih1, whh1, b1 = lstm_layer_params(D)

    # TemporalAttention(D): fused Q|K|V + output projection.
    wq, bq = nrm((D, D)), nrm((D,))
    wk, bk = nrm((D, D)), nrm((D,))
    wv, bv = nrm((D, D)), nrm((D,))
    wo, bo = nrm((D, D)), nrm((D,))
    wqkv = jnp.concatenate([wq.T, wk.T, wv.T], axis=1)   # (D, 3D)
    bqkv = jnp.concatenate([bq, bk, bv]).reshape(1, 3 * D)

    # classifier: Linear(D, D//2) -> ReLU -> Dropout -> Linear(D//2, num_classes)
    w1, b1c = nrm((D // 2, D)), nrm((D // 2,))
    w2, b2c = nrm((cfg.num_classes, D // 2)), nrm((cfg.num_classes,))
    n_pad = 128                                          # lane-dense final slab
    w2p = jnp.zeros((D // 2, n_pad), jnp.float32).at[:, :cfg.num_classes].set(w2.T)
    b2p = jnp.zeros((1, n_pad), jnp.float32).at[0, :cfg.num_classes].set(b2c)

    return {"wih0c": wih0c, "wih0s": wih0s, "b0": b0, "whh0": whh0,
            "wih1": wih1, "b1": b1, "whh1": whh1,
            "wqkv": wqkv, "bqkv": bqkv, "wo": wo.T, "bo": bo.reshape(1, D),
            "w1": w1.T, "b1c": b1c.reshape(1, D // 2), "w2": w2p, "b2c": b2p}


# --------------------------------------------------------------------------
# main
# --------------------------------------------------------------------------

if __name__ == "__main__":
    # Small shapes consistent with the module: batch=2, seq=8, lstm_hidden=32,
    # cnn_feature_dim + stat_feature_dim = 24 + 8 = 32, bidirectional LSTM,
    # TemporalAttention(num_heads=4), num_classes=5.
    batch, seq_len = 2, 8
    cnn_feature_dim, stat_feature_dim = 24, 8
    cfg = Config(lstm_hidden=32, num_dirs=2, num_heads=4, num_classes=5)

    key = jax.random.PRNGKey(0)
    kp, kc, ks = jax.random.split(key, 3)
    params = make_params(kp, cfg, cnn_feature_dim, stat_feature_dim)
    cnn_feats = jax.random.normal(kc, (batch, seq_len, cnn_feature_dim),
                                  dtype=jnp.float32)
    stat_feats = jax.random.normal(ks, (batch, seq_len, stat_feature_dim),
                                   dtype=jnp.float32)

    logits = forward(cfg, params, cnn_feats, stat_feats)
    logits = jax.block_until_ready(logits)
    assert logits.shape == (batch, cfg.num_classes)
    assert bool(jnp.all(jnp.isfinite(logits)))
    print("KERNEL_OK")
</pallas_src>

<mosaic_0001>
module attributes {stable_mosaic.version = 11 : i64} {
  func.func @_fused_forward_kernel(%arg0: memref<16x24xf32, #tpu.memory_space<vmem>>, %arg1: memref<16x8xf32, #tpu.memory_space<vmem>>, %arg2: memref<16x16xf32, #tpu.memory_space<vmem>>, %arg3: memref<2x16xf32, #tpu.memory_space<vmem>>, %arg4: memref<24x256xf32, #tpu.memory_space<vmem>>, %arg5: memref<8x256xf32, #tpu.memory_space<vmem>>, %arg6: memref<1x256xf32, #tpu.memory_space<vmem>>, %arg7: memref<2x32x128xf32, #tpu.memory_space<vmem>>, %arg8: memref<64x256xf32, #tpu.memory_space<vmem>>, %arg9: memref<1x256xf32, #tpu.memory_space<vmem>>, %arg10: memref<2x32x128xf32, #tpu.memory_space<vmem>>, %arg11: memref<64x192xf32, #tpu.memory_space<vmem>>, %arg12: memref<1x192xf32, #tpu.memory_space<vmem>>, %arg13: memref<64x64xf32, #tpu.memory_space<vmem>>, %arg14: memref<1x64xf32, #tpu.memory_space<vmem>>, %arg15: memref<64x32xf32, #tpu.memory_space<vmem>>, %arg16: memref<1x32xf32, #tpu.memory_space<vmem>>, %arg17: memref<32x128xf32, #tpu.memory_space<vmem>>, %arg18: memref<1x128xf32, #tpu.memory_space<vmem>>, %arg19: memref<2x128xf32, #tpu.memory_space<vmem>>, %arg20: memref<16x64xf32, #tpu.memory_space<vmem>>, %arg21: memref<16x64xf32, #tpu.memory_space<vmem>>) attributes {dimension_semantics = [], scalar_prefetch = 0 : i64, scratch_operands = 2 : i64, tpu.core_type = #tpu.core_type<tc>} {
    %c0 = arith.constant 0 : index
    %c0_0 = arith.constant 0 : index
    %0 = vector.load %arg0[%c0, %c0_0] : memref<16x24xf32, #tpu.memory_space<vmem>>, vector<16x24xf32>
    %c0_1 = arith.constant 0 : index
    %c0_2 = arith.constant 0 : index
    %1 = vector.load %arg4[%c0_1, %c0_2] : memref<24x256xf32, #tpu.memory_space<vmem>>, vector<24x256xf32>
    %cst = arith.constant dense<0.000000e+00> : vector<16x256xf32>
    %2 = tpu.matmul %0, %1, %cst {dimension_numbers = #tpu.dot_dimension_numbers<[1], [0], [0], [1], [0, 0, 1, 1], [], []>} : vector<16x24xf32>, vector<24x256xf32>, vector<16x256xf32> -> vector<16x256xf32>
    %c0_3 = arith.constant 0 : index
    %c0_4 = arith.constant 0 : index
    %3 = vector.load %arg1[%c0_3, %c0_4] : memref<16x8xf32, #tpu.memory_space<vmem>>, vector<16x8xf32>
    %c0_5 = arith.constant 0 : index
    %c0_6 = arith.constant 0 : index
    %4 = vector.load %arg5[%c0_5, %c0_6] : memref<8x256xf32, #tpu.memory_space<vmem>>, vector<8x256xf32>
    %cst_7 = arith.constant dense<0.000000e+00> : vector<16x256xf32>
    %5 = tpu.matmul %3, %4, %cst_7 {dimension_numbers = #tpu.dot_dimension_numbers<[1], [0], [0], [1], [0, 0, 1, 1], [], []>} : vector<16x8xf32>, vector<8x256xf32>, vector<16x256xf32> -> vector<16x256xf32>
    %6 = arith.addf %2, %5 : vector<16x256xf32>
    %c0_8 = arith.constant 0 : index
    %c0_9 = arith.constant 0 : index
    %7 = vector.load %arg6[%c0_8, %c0_9] : memref<1x256xf32, #tpu.memory_space<vmem>>, vector<1x256xf32>
    %8 = vector.broadcast %7 : vector<1x256xf32> to vector<16x256xf32>
    %9 = arith.addf %6, %8 : vector<16x256xf32>
    %c0_10 = arith.constant 0 : index
    %c0_11 = arith.constant 0 : index
    %c0_12 = arith.constant 0 : index
    %10 = vector.load %arg7[%c0_10, %c0_11, %c0_12] : memref<2x32x128xf32, #tpu.memory_space<vmem>>, vector<1x32x128xf32>
    %11 = vector.shape_cast %10 : vector<1x32x128xf32> to vector<32x128xf32>
    %cst_13 = arith.constant 0.000000e+00 : f32
    %12 = vector.broadcast %cst_13 : f32 to vector<2x32xf32>
    %cst_14 = arith.constant 0.000000e+00 : f32
    %13 = vector.broadcast %cst_14 : f32 to vector<2x32xf32>
    %14 = vector.extract_strided_slice %9 {offsets = [0, 0], sizes = [2, 128], strides = [1, 1]} : vector<16x256xf32> to vector<2x128xf32>
    %cst_15 = arith.constant dense<0.000000e+00> : vector<2x128xf32>
    %15 = tpu.matmul %12, %11, %cst_15 {dimension_numbers = #tpu.dot_dimension_numbers<[1], [0], [0], [1], [0, 0, 1, 1], [], []>} : vector<2x32xf32>, vector<32x128xf32>, vector<2x128xf32> -> vector<2x128xf32>
    %16 = arith.addf %14, %15 : vector<2x128xf32>
    %17 = arith.negf %16 : vector<2x128xf32>
    %18 = math.exp %17 : vector<2x128xf32>
    %cst_16 = arith.constant 1.000000e+00 : f32
    %19 = vector.broadcast %cst_16 : f32 to vector<2x128xf32>
    %20 = arith.addf %19, %18 : vector<2x128xf32>
    %21 = arith.divf %19, %20 : vector<2x128xf32>
    %22 = vector.extract_strided_slice %21 {offsets = [0, 0], sizes = [2, 32], strides = [1, 1]} : vector<2x128xf32> to vector<2x32xf32>
    %23 = vector.extract_strided_slice %21 {offsets = [0, 32], sizes = [2, 32], strides = [1, 1]} : vector<2x128xf32> to vector<2x32xf32>
    %24 = vector.extract_strided_slice %21 {offsets = [0, 96], sizes = [2, 32], strides = [1, 1]} : vector<2x128xf32> to vector<2x32xf32>
    %25 = vector.extract_strided_slice %16 {offsets = [0, 64], sizes = [2, 32], strides = [1, 1]} : vector<2x128xf32> to vector<2x32xf32>
    %26 = math.tanh %25 : vector<2x32xf32>
    %27 = arith.mulf %23, %13 : vector<2x32xf32>
    %28 = arith.mulf %22, %26 : vector<2x32xf32>
    %29 = arith.addf %27, %28 : vector<2x32xf32>
    %30 = math.tanh %29 : vector<2x32xf32>
    %31 = arith.mulf %24, %30 : vector<2x32xf32>
    %c0_17 = arith.constant 0 : index
    %c0_18 = arith.constant 0 : index
    %32 = vector.load %arg20[%c0_17, %c0_18] : memref<16x64xf32, #tpu.memory_space<vmem>>, vector<2x32xf32>
    tpu.vector_store %arg20[%c0_17, %c0_18], %31 {strides = array<i32>} : memref<16x64xf32, #tpu.memory_space<vmem>>, vector<2x32xf32>,
    %33 = vector.extract_strided_slice %9 {offsets = [2, 0], sizes = [2, 128], strides = [1, 1]} : vector<16x256xf32> to vector<2x128xf32>
    %cst_19 = arith.constant dense<0.000000e+00> : vector<2x128xf32>
    %34 = tpu.matmul %31, %11, %cst_19 {dimension_numbers = #tpu.dot_dimension_numbers<[1], [0], [0], [1], [0, 0, 1, 1], [], []>} : vector<2x32xf32>, vector<32x128xf32>, vector<2x128xf32> -> vector<2x128xf32>
    %35 = arith.addf %33, %34 : vector<2x128xf32>
    %36 = arith.negf %35 : vector<2x128xf32>
    %37 = math.exp %36 : vector<2x128xf32>
    %cst_20 = arith.constant 1.000000e+00 : f32
    %38 = vector.broadcast %cst_20 : f32 to vector<2x128xf32>
    %39 = arith.addf %38, %37 : vector<2x128xf32>
    %40 = arith.divf %38, %39 : vector<2x128xf32>
    %41 = vector.extract_strided_slice %40 {offsets = [0, 0], sizes = [2, 32], strides = [1, 1]} : vector<2x128xf32> to vector<2x32xf32>
    %42 = vector.extract_strided_slice %40 {offsets = [0, 32], sizes = [2, 32], strides = [1, 1]} : vector<2x128xf32> to vector<2x32xf32>
    %43 = vector.extract_strided_slice %40 {offsets = [0, 96], sizes = [2, 32], strides = [1, 1]} : vector<2x128xf32> to vector<2x32xf32>
    %44 = vector.extract_strided_slice %35 {offsets = [0, 64], sizes = [2, 32], strides = [1, 1]} : vector<2x128xf32> to vector<2x32xf32>
    %45 = math.tanh %44 : vector<2x32xf32>
    %46 = arith.mulf %42, %29 : vector<2x32xf32>
    %47 = arith.mulf %41, %45 : vector<2x32xf32>
    %48 = arith.addf %46, %47 : vector<2x32xf32>
    %49 = math.tanh %48 : vector<2x32xf32>
    %50 = arith.mulf %43, %49 : vector<2x32xf32>
    %c2 = arith.constant 2 : index
    %c0_21 = arith.constant 0 : index
    %51 = vector.load %arg20[%c2, %c0_21] : memref<16x64xf32, #tpu.memory_space<vmem>>, vector<2x32xf32>
    tpu.vector_store %arg20[%c2, %c0_21], %50 {strides = array<i32>} : memref<16x64xf32, #tpu.memory_space<vmem>>, vector<2x32xf32>,
    %52 = vector.extract_strided_slice %9 {offsets = [4, 0], sizes = [2, 128], strides = [1, 1]} : vector<16x256xf32> to vector<2x128xf32>
    %cst_22 = arith.constant dense<0.000000e+00> : vector<2x128xf32>
    %53 = tpu.matmul %50, %11, %cst_22 {dimension_numbers = #tpu.dot_dimension_numbers<[1], [0], [0], [1], [0, 0, 1, 1], [], []>} : vector<2x32xf32>, vector<32x128xf32>, vector<2x128xf32> -> vector<2x128xf32>
    %54 = arith.addf %52, %53 : vector<2x128xf32>
    %55 = arith.negf %54 : vector<2x128xf32>
    %56 = math.exp %55 : vector<2x128xf32>
    %cst_23 = arith.constant 1.000000e+00 : f32
    %57 = vector.broadcast %cst_23 : f32 to vector<2x128xf32>
    %58 = arith.addf %57, %56 : vector<2x128xf32>
    %59 = arith.divf %57, %58 : vector<2x128xf32>
    %60 = vector.extract_strided_slice %59 {offsets = [0, 0], sizes = [2, 32], strides = [1, 1]} : vector<2x128xf32> to vector<2x32xf32>
    %61 = vector.extract_strided_slice %59 {offsets = [0, 32], sizes = [2, 32], strides = [1, 1]} : vector<2x128xf32> to vector<2x32xf32>
    %62 = vector.extract_strided_slice %59 {offsets = [0, 96], sizes = [2, 32], strides = [1, 1]} : vector<2x128xf32> to vector<2x32xf32>
    %63 = vector.extract_strided_slice %54 {offsets = [0, 64], sizes = [2, 32], strides = [1, 1]} : vector<2x128xf32> to vector<2x32xf32>
    %64 = math.tanh %63 : vector<2x32xf32>
    %65 = arith.mulf %61, %48 : vector<2x32xf32>
    %66 = arith.mulf %60, %64 : vector<2x32xf32>
    %67 = arith.addf %65, %66 : vector<2x32xf32>
    %68 = math.tanh %67 : vector<2x32xf32>
    %69 = arith.mulf %62, %68 : vector<2x32xf32>
    %c4 = arith.constant 4 : index
    %c0_24 = arith.constant 0 : index
    %70 = vector.load %arg20[%c4, %c0_24] : memref<16x64xf32, #tpu.memory_space<vmem>>, vector<2x32xf32>
    tpu.vector_store %arg20[%c4, %c0_24], %69 {strides = array<i32>} : memref<16x64xf32, #tpu.memory_space<vmem>>, vector<2x32xf32>,
    %71 = vector.extract_strided_slice %9 {offsets = [6, 0], sizes = [2, 128], strides = [1, 1]} : vector<16x256xf32> to vector<2x128xf32>
    %cst_25 = arith.constant dense<0.000000e+00> : vector<2x128xf32>
    %72 = tpu.matmul %69, %11, %cst_25 {dimension_numbers = #tpu.dot_dimension_numbers<[1], [0], [0], [1], [0, 0, 1, 1], [], []>} : vector<2x32xf32>, vector<32x128xf32>, vector<2x128xf32> -> vector<2x128xf32>
    %73 = arith.addf %71, %72 : vector<2x128xf32>
    %74 = arith.negf %73 : vector<2x128xf32>
    %75 = math.exp %74 : vector<2x128xf32>
    %cst_26 = arith.constant 1.000000e+00 : f32
    %76 = vector.broadcast %cst_26 : f32 to vector<2x128xf32>
    %77 = arith.addf %76, %75 : vector<2x128xf32>
    %78 = arith.divf %76, %77 : vector<2x128xf32>
    %79 = vector.extract_strided_slice %78 {offsets = [0, 0], sizes = [2, 32], strides = [1, 1]} : vector<2x128xf32> to vector<2x32xf32>
    %80 = vector.extract_strided_slice %78 {offsets = [0, 32], sizes = [2, 32], strides = [1, 1]} : vector<2x128xf32> to vector<2x32xf32>
    %81 = vector.extract_strided_slice %78 {offsets = [0, 96], sizes = [2, 32], strides = [1, 1]} : vector<2x128xf32> to vector<2x32xf32>
    %82 = vector.extract_strided_slice %73 {offsets = [0, 64], sizes = [2, 32], strides = [1, 1]} : vector<2x128xf32> to vector<2x32xf32>
    %83 = math.tanh %82 : vector<2x32xf32>
    %84 = arith.mulf %80, %67 : vector<2x32xf32>
    %85 = arith.mulf %79, %83 : vector<2x32xf32>
    %86 = arith.addf %84, %85 : vector<2x32xf32>
    %87 = math.tanh %86 : vector<2x32xf32>
    %88 = arith.mulf %81, %87 : vector<2x32xf32>
    %c6 = arith.constant 6 : index
    %c0_27 = arith.constant 0 : index
    %89 = vector.load %arg20[%c6, %c0_27] : memref<16x64xf32, #tpu.memory_space<vmem>>, vector<2x32xf32>
    tpu.vector_store %arg20[%c6, %c0_27], %88 {strides = array<i32>} : memref<16x64xf32, #tpu.memory_space<vmem>>, vector<2x32xf32>,
    %90 = vector.extract_strided_slice %9 {offsets = [8, 0], sizes = [2, 128], strides = [1, 1]} : vector<16x256xf32> to vector<2x128xf32>
    %cst_28 = arith.constant dense<0.000000e+00> : vector<2x128xf32>
    %91 = tpu.matmul %88, %11, %cst_28 {dimension_numbers = #tpu.dot_dimension_numbers<[1], [0], [0], [1], [0, 0, 1, 1], [], []>} : vector<2x32xf32>, vector<32x128xf32>, vector<2x128xf32> -> vector<2x128xf32>
    %92 = arith.addf %90, %91 : vector<2x128xf32>
    %93 = arith.negf %92 : vector<2x128xf32>
    %94 = math.exp %93 : vector<2x128xf32>
    %cst_29 = arith.constant 1.000000e+00 : f32
    %95 = vector.broadcast %cst_29 : f32 to vector<2x128xf32>
    %96 = arith.addf %95, %94 : vector<2x128xf32>
    %97 = arith.divf %95, %96 : vector<2x128xf32>
    %98 = vector.extract_strided_slice %97 {offsets = [0, 0], sizes = [2, 32], strides = [1, 1]} : vector<2x128xf32> to vector<2x32xf32>
    %99 = vector.extract_strided_slice %97 {offsets = [0, 32], sizes = [2, 32], strides = [1, 1]} : vector<2x128xf32> to vector<2x32xf32>
    %100 = vector.extract_strided_slice %97 {offsets = [0, 96], sizes = [2, 32], strides = [1, 1]} : vector<2x128xf32> to vector<2x32xf32>
    %101 = vector.extract_strided_slice %92 {offsets = [0, 64], sizes = [2, 32], strides = [1, 1]} : vector<2x128xf32> to vector<2x32xf32>
    %102 = math.tanh %101 : vector<2x32xf32>
    %103 = arith.mulf %99, %86 : vector<2x32xf32>
    %104 = arith.mulf %98, %102 : vector<2x32xf32>
    %105 = arith.addf %103, %104 : vector<2x32xf32>
    %106 = math.tanh %105 : vector<2x32xf32>
    %107 = arith.mulf %100, %106 : vector<2x32xf32>
    %c8 = arith.constant 8 : index
    %c0_30 = arith.constant 0 : index
    %108 = vector.load %arg20[%c8, %c0_30] : memref<16x64xf32, #tpu.memory_space<vmem>>, vector<2x32xf32>
    tpu.vector_store %arg20[%c8, %c0_30], %107 {strides = array<i32>} : memref<16x64xf32, #tpu.memory_space<vmem>>, vector<2x32xf32>,
    %109 = vector.extract_strided_slice %9 {offsets = [10, 0], sizes = [2, 128], strides = [1, 1]} : vector<16x256xf32> to vector<2x128xf32>
    %cst_31 = arith.constant dense<0.000000e+00> : vector<2x128xf32>
    %110 = tpu.matmul %107, %11, %cst_31 {dimension_numbers = #tpu.dot_dimension_numbers<[1], [0], [0], [1], [0, 0, 1, 1], [], []>} : vector<2x32xf32>, vector<32x128xf32>, vector<2x128xf32> -> vector<2x128xf32>
    %111 = arith.addf %109, %110 : vector<2x128xf32>
    %112 = arith.negf %111 : vector<2x128xf32>
    %113 = math.exp %112 : vector<2x128xf32>
    %cst_32 = arith.constant 1.000000e+00 : f32
    %114 = vector.broadcast %cst_32 : f32 to vector<2x128xf32>
    %115 = arith.addf %114, %113 : vector<2x128xf32>
    %116 = arith.divf %114, %115 : vector<2x128xf32>
    %117 = vector.extract_strided_slice %116 {offsets = [0, 0], sizes = [2, 32], strides = [1, 1]} : vector<2x128xf32> to vector<2x32xf32>
    %118 = vector.extract_strided_slice %116 {offsets = [0, 32], sizes = [2, 32], strides = [1, 1]} : vector<2x128xf32> to vector<2x32xf32>
    %119 = vector.extract_strided_slice %116 {offsets = [0, 96], sizes = [2, 32], strides = [1, 1]} : vector<2x128xf32> to vector<2x32xf32>
    %120 = vector.extract_strided_slice %111 {offsets = [0, 64], sizes = [2, 32], strides = [1, 1]} : vector<2x128xf32> to vector<2x32xf32>
    %121 = math.tanh %120 : vector<2x32xf32>
    %122 = arith.mulf %118, %105 : vector<2x32xf32>
    %123 = arith.mulf %117, %121 : vector<2x32xf32>
    %124 = arith.addf %122, %123 : vector<2x32xf32>
    %125 = math.tanh %124 : vector<2x32xf32>
    %126 = arith.mulf %119, %125 : vector<2x32xf32>
    %c10 = arith.constant 10 : index
    %c0_33 = arith.constant 0 : index
    %127 = vector.load %arg20[%c10, %c0_33] : memref<16x64xf32, #tpu.memory_space<vmem>>, vector<2x32xf32>
    tpu.vector_store %arg20[%c10, %c0_33], %126 {strides = array<i32>} : memref<16x64xf32, #tpu.memory_space<vmem>>, vector<2x32xf32>,
    %128 = vector.extract_strided_slice %9 {offsets = [12, 0], sizes = [2, 128], strides = [1, 1]} : vector<16x256xf32> to vector<2x128xf32>
    %cst_34 = arith.constant dense<0.000000e+00> : vector<2x128xf32>
    %129 = tpu.matmul %126, %11, %cst_34 {dimension_numbers = #tpu.dot_dimension_numbers<[1], [0], [0], [1], [0, 0, 1, 1], [], []>} : vector<2x32xf32>, vector<32x128xf32>, vector<2x128xf32> -> vector<2x128xf32>
    %130 = arith.addf %128, %129 : vector<2x128xf32>
    %131 = arith.negf %130 : vector<2x128xf32>
    %132 = math.exp %131 : vector<2x128xf32>
    %cst_35 = arith.constant 1.000000e+00 : f32
    %133 = vector.broadcast %cst_35 : f32 to vector<2x128xf32>
    %134 = arith.addf %133, %132 : vector<2x128xf32>
    %135 = arith.divf %133, %134 : vector<2x128xf32>
    %136 = vector.extract_strided_slice %135 {offsets = [0, 0], sizes = [2, 32], strides = [1, 1]} : vector<2x128xf32> to vector<2x32xf32>
    %137 = vector.extract_strided_slice %135 {offsets = [0, 32], sizes = [2, 32], strides = [1, 1]} : vector<2x128xf32> to vector<2x32xf32>
    %138 = vector.extract_strided_slice %135 {offsets = [0, 96], sizes = [2, 32], strides = [1, 1]} : vector<2x128xf32> to vector<2x32xf32>
    %139 = vector.extract_strided_slice %130 {offsets = [0, 64], sizes = [2, 32], strides = [1, 1]} : vector<2x128xf32> to vector<2x32xf32>
    %140 = math.tanh %139 : vector<2x32xf32>
    %141 = arith.mulf %137, %124 : vector<2x32xf32>
    %142 = arith.mulf %136, %140 : vector<2x32xf32>
    %143 = arith.addf %141, %142 : vector<2x32xf32>
    %144 = math.tanh %143 : vector<2x32xf32>
    %145 = arith.mulf %138, %144 : vector<2x32xf32>
    %c12 = arith.constant 12 : index
    %c0_36 = arith.constant 0 : index
    %146 = vector.load %arg20[%c12, %c0_36] : memref<16x64xf32, #tpu.memory_space<vmem>>, vector<2x32xf32>
    tpu.vector_store %arg20[%c12, %c0_36], %145 {strides = array<i32>} : memref<16x64xf32, #tpu.memory_space<vmem>>, vector<2x32xf32>,
    %147 = vector.extract_strided_slice %9 {offsets = [14, 0], sizes = [2, 128], strides = [1, 1]} : vector<16x256xf32> to vector<2x128xf32>
    %cst_37 = arith.constant dense<0.000000e+00> : vector<2x128xf32>
    %148 = tpu.matmul %145, %11, %cst_37 {dimension_numbers = #tpu.dot_dimension_numbers<[1], [0], [0], [1], [0, 0, 1, 1], [], []>} : vector<2x32xf32>, vector<32x128xf32>, vector<2x128xf32> -> vector<2x128xf32>
    %149 = arith.addf %147, %148 : vector<2x128xf32>
    %150 = arith.negf %149 : vector<2x128xf32>
    %151 = math.exp %150 : vector<2x128xf32>
    %cst_38 = arith.constant 1.000000e+00 : f32
    %152 = vector.broadcast %cst_38 : f32 to vector<2x128xf32>
    %153 = arith.addf %152, %151 : vector<2x128xf32>
    %154 = arith.divf %152, %153 : vector<2x128xf32>
    %155 = vector.extract_strided_slice %154 {offsets = [0, 0], sizes = [2, 32], strides = [1, 1]} : vector<2x128xf32> to vector<2x32xf32>
    %156 = vector.extract_strided_slice %154 {offsets = [0, 32], sizes = [2, 32], strides = [1, 1]} : vector<2x128xf32> to vector<2x32xf32>
    %157 = vector.extract_strided_slice %154 {offsets = [0, 96], sizes = [2, 32], strides = [1, 1]} : vector<2x128xf32> to vector<2x32xf32>
    %158 = vector.extract_strided_slice %149 {offsets = [0, 64], sizes = [2, 32], strides = [1, 1]} : vector<2x128xf32> to vector<2x32xf32>
    %159 = math.tanh %158 : vector<2x32xf32>
    %160 = arith.mulf %156, %143 : vector<2x32xf32>
    %161 = arith.mulf %155, %159 : vector<2x32xf32>
    %162 = arith.addf %160, %161 : vector<2x32xf32>
    %163 = math.tanh %162 : vector<2x32xf32>
    %164 = arith.mulf %157, %163 : vector<2x32xf32>
    %c14 = arith.constant 14 : index
    %c0_39 = arith.constant 0 : index
    %165 = vector.load %arg20[%c14, %c0_39] : memref<16x64xf32, #tpu.memory_space<vmem>>, vector<2x32xf32>
    tpu.vector_store %arg20[%c14, %c0_39], %164 {strides = array<i32>} : memref<16x64xf32, #tpu.memory_space<vmem>>, vector<2x32xf32>,
    %c1 = arith.constant 1 : index
    %c0_40 = arith.constant 0 : index
    %c0_41 = arith.constant 0 : index
    %166 = vector.load %arg7[%c1, %c0_40, %c0_41] : memref<2x32x128xf32, #tpu.memory_space<vmem>>, vector<1x32x128xf32>
    %167 = vector.shape_cast %166 : vector<1x32x128xf32> to vector<32x128xf32>
    %cst_42 = arith.constant 0.000000e+00 : f32
    %168 = vector.broadcast %cst_42 : f32 to vector<2x32xf32>
    %cst_43 = arith.constant 0.000000e+00 : f32
    %169 = vector.broadcast %cst_43 : f32 to vector<2x32xf32>
    %170 = vector.extract_strided_slice %9 {offsets = [14, 128], sizes = [2, 128], strides = [1, 1]} : vector<16x256xf32> to vector<2x128xf32>
    %cst_44 = arith.constant dense<0.000000e+00> : vector<2x128xf32>
    %171 = tpu.matmul %168, %167, %cst_44 {dimension_numbers = #tpu.dot_dimension_numbers<[1], [0], [0], [1], [0, 0, 1, 1], [], []>} : vector<2x32xf32>, vector<32x128xf32>, vector<2x128xf32> -> vector<2x128xf32>
    %172 = arith.addf %170, %171 : vector<2x128xf32>
    %173 = arith.negf %172 : vector<2x128xf32>
    %174 = math.exp %173 : vector<2x128xf32>
    %cst_45 = arith.constant 1.000000e+00 : f32
    %175 = vector.broadcast %cst_45 : f32 to vector<2x128xf32>
    %176 = arith.addf %175, %174 : vector<2x128xf32>
    %177 = arith.divf %175, %176 : vector<2x128xf32>
    %178 = vector.extract_strided_slice %177 {offsets = [0, 0], sizes = [2, 32], strides = [1, 1]} : vector<2x128xf32> to vector<2x32xf32>
    %179 = vector.extract_strided_slice %177 {offsets = [0, 32], sizes = [2, 32], strides = [1, 1]} : vector<2x128xf32> to vector<2x32xf32>
    %180 = vector.extract_strided_slice %177 {offsets = [0, 96], sizes = [2, 32], strides = [1, 1]} : vector<2x128xf32> to vector<2x32xf32>
    %181 = vector.extract_strided_slice %172 {offsets = [0, 64], sizes = [2, 32], strides = [1, 1]} : vector<2x128xf32> to vector<2x32xf32>
    %182 = math.tanh %181 : vector<2x32xf32>
    %183 = arith.mulf %179, %169 : vector<2x32xf32>
    %184 = arith.mulf %178, %182 : vector<2x32xf32>
    %185 = arith.addf %183, %184 : vector<2x32xf32>
    %186 = math.tanh %185 : vector<2x32xf32>
    %187 = arith.mulf %180, %186 : vector<2x32xf32>
    %c14_46 = arith.constant 14 : index
    %c32 = arith.constant 32 : index
    %188 = vector.load %arg20[%c14_46, %c32] : memref<16x64xf32, #tpu.memory_space<vmem>>, vector<2x32xf32>
    tpu.vector_store %arg20[%c14_46, %c32], %187 {strides = array<i32>} : memref<16x64xf32, #tpu.memory_space<vmem>>, vector<2x32xf32>,
    %189 = vector.extract_strided_slice %9 {offsets = [12, 128], sizes = [2, 128], strides = [1, 1]} : vector<16x256xf32> to vector<2x128xf32>
    %cst_47 = arith.constant dense<0.000000e+00> : vector<2x128xf32>
    %190 = tpu.matmul %187, %167, %cst_47 {dimension_numbers = #tpu.dot_dimension_numbers<[1], [0], [0], [1], [0, 0, 1, 1], [], []>} : vector<2x32xf32>, vector<32x128xf32>, vector<2x128xf32> -> vector<2x128xf32>
    %191 = arith.addf %189, %190 : vector<2x128xf32>
    %192 = arith.negf %191 : vector<2x128xf32>
    %193 = math.exp %192 : vector<2x128xf32>
    %cst_48 = arith.constant 1.000000e+00 : f32
    %194 = vector.broadcast %cst_48 : f32 to vector<2x128xf32>
    %195 = arith.addf %194, %193 : vector<2x128xf32>
    %196 = arith.divf %194, %195 : vector<2x128xf32>
    %197 = vector.extract_strided_slice %196 {offsets = [0, 0], sizes = [2, 32], strides = [1, 1]} : vector<2x128xf32> to vector<2x32xf32>
    %198 = vector.extract_strided_slice %196 {offsets = [0, 32], sizes = [2, 32], strides = [1, 1]} : vector<2x128xf32> to vector<2x32xf32>
    %199 = vector.extract_strided_slice %196 {offsets = [0, 96], sizes = [2, 32], strides = [1, 1]} : vector<2x128xf32> to vector<2x32xf32>
    %200 = vector.extract_strided_slice %191 {offsets = [0, 64], sizes = [2, 32], strides = [1, 1]} : vector<2x128xf32> to vector<2x32xf32>
    %201 = math.tanh %200 : vector<2x32xf32>
    %202 = arith.mulf %198, %185 : vector<2x32xf32>
    %203 = arith.mulf %197, %201 : vector<2x32xf32>
    %204 = arith.addf %202, %203 : vector<2x32xf32>
    %205 = math.tanh %204 : vector<2x32xf32>
    %206 = arith.mulf %199, %205 : vector<2x32xf32>
    %c12_49 = arith.constant 12 : index
    %c32_50 = arith.constant 32 : index
    %207 = vector.load %arg20[%c12_49, %c32_50] : memref<16x64xf32, #tpu.memory_space<vmem>>, vector<2x32xf32>
    tpu.vector_store %arg20[%c12_49, %c32_50], %206 {strides = array<i32>} : memref<16x64xf32, #tpu.memory_space<vmem>>, vector<2x32xf32>,
    %208 = vector.extract_strided_slice %9 {offsets = [10, 128], sizes = [2, 128], strides = [1, 1]} : vector<16x256xf32> to vector<2x128xf32>
    %cst_51 = arith.constant dense<0.000000e+00> : vector<2x128xf32>
    %209 = tpu.matmul %206, %167, %cst_51 {dimension_numbers = #tpu.dot_dimension_numbers<[1], [0], [0], [1], [0, 0, 1, 1], [], []>} : vector<2x32xf32>, vector<32x128xf32>, vector<2x128xf32> -> vector<2x128xf32>
    %210 = arith.addf %208, %209 : vector<2x128xf32>
    %211 = arith.negf %210 : vector<2x128xf32>
    %212 = math.exp %211 : vector<2x128xf32>
    %cst_52 = arith.constant 1.000000e+00 : f32
    %213 = vector.broadcast %cst_52 : f32 to vector<2x128xf32>
    %214 = arith.addf %213, %212 : vector<2x128xf32>
    %215 = arith.divf %213, %214 : vector<2x128xf32>
    %216 = vector.extract_strided_slice %215 {offsets = [0, 0], sizes = [2, 32], strides = [1, 1]} : vector<2x128xf32> to vector<2x32xf32>
    %217 = vector.extract_strided_slice %215 {offsets = [0, 32], sizes = [2, 32], strides = [1, 1]} : vector<2x128xf32> to vector<2x32xf32>
    %218 = vector.extract_strided_slice %215 {offsets = [0, 96], sizes = [2, 32], strides = [1, 1]} : vector<2x128xf32> to vector<2x32xf32>
    %219 = vector.extract_strided_slice %210 {offsets = [0, 64], sizes = [2, 32], strides = [1, 1]} : vector<2x128xf32> to vector<2x32xf32>
    %220 = math.tanh %219 : vector<2x32xf32>
    %221 = arith.mulf %217, %204 : vector<2x32xf32>
    %222 = arith.mulf %216, %220 : vector<2x32xf32>
    %223 = arith.addf %221, %222 : vector<2x32xf32>
    %224 = math.tanh %223 : vector<2x32xf32>
    %225 = arith.mulf %218, %224 : vector<2x32xf32>
    %c10_53 = arith.constant 10 : index
    %c32_54 = arith.constant 32 : index
    %226 = vector.load %arg20[%c10_53, %c32_54] : memref<16x64xf32, #tpu.memory_space<vmem>>, vector<2x32xf32>
    tpu.vector_store %arg20[%c10_53, %c32_54], %225 {strides = array<i32>} : memref<16x64xf32, #tpu.memory_space<vmem>>, vector<2x32xf32>,
    %227 = vector.extract_strided_slice %9 {offsets = [8, 128], sizes = [2, 128], strides = [1, 1]} : vector<16x256xf32> to vector<2x128xf32>
    %cst_55 = arith.constant dense<0.000000e+00> : vector<2x128xf32>
    %228 = tpu.matmul %225, %167, %cst_55 {dimension_numbers = #tpu.dot_dimension_numbers<[1], [0], [0], [1], [0, 0, 1, 1], [], []>} : vector<2x32xf32>, vector<32x128xf32>, vector<2x128xf32> -> vector<2x128xf32>
    %229 = arith.addf %227, %228 : vector<2x128xf32>
    %230 = arith.negf %229 : vector<2x128xf32>
    %231 = math.exp %230 : vector<2x128xf32>
    %cst_56 = arith.constant 1.000000e+00 : f32
    %232 = vector.broadcast %cst_56 : f32 to vector<2x128xf32>
    %233 = arith.addf %232, %231 : vector<2x128xf32>
    %234 = arith.divf %232, %233 : vector<2x128xf32>
    %235 = vector.extract_strided_slice %234 {offsets = [0, 0], sizes = [2, 32], strides = [1, 1]} : vector<2x128xf32> to vector<2x32xf32>
    %236 = vector.extract_strided_slice %234 {offsets = [0, 32], sizes = [2, 32], strides = [1, 1]} : vector<2x128xf32> to vector<2x32xf32>
    %237 = vector.extract_strided_slice %234 {offsets = [0, 96], sizes = [2, 32], strides = [1, 1]} : vector<2x128xf32> to vector<2x32xf32>
    %238 = vector.extract_strided_slice %229 {offsets = [0, 64], sizes = [2, 32], strides = [1, 1]} : vector<2x128xf32> to vector<2x32xf32>
    %239 = math.tanh %238 : vector<2x32xf32>
    %240 = arith.mulf %236, %223 : vector<2x32xf32>
    %241 = arith.mulf %235, %239 : vector<2x32xf32>
    %242 = arith.addf %240, %241 : vector<2x32xf32>
    %243 = math.tanh %242 : vector<2x32xf32>
    %244 = arith.mulf %237, %243 : vector<2x32xf32>
    %c8_57 = arith.constant 8 : index
    %c32_58 = arith.constant 32 : index
    %245 = vector.load %arg20[%c8_57, %c32_58] : memref<16x64xf32, #tpu.memory_space<vmem>>, vector<2x32xf32>
    tpu.vector_store %arg20[%c8_57, %c32_58], %244 {strides = array<i32>} : memref<16x64xf32, #tpu.memory_space<vmem>>, vector<2x32xf32>,
    %246 = vector.extract_strided_slice %9 {offsets = [6, 128], sizes = [2, 128], strides = [1, 1]} : vector<16x256xf32> to vector<2x128xf32>
    %cst_59 = arith.constant dense<0.000000e+00> : vector<2x128xf32>
    %247 = tpu.matmul %244, %167, %cst_59 {dimension_numbers = #tpu.dot_dimension_numbers<[1], [0], [0], [1], [0, 0, 1, 1], [], []>} : vector<2x32xf32>, vector<32x128xf32>, vector<2x128xf32> -> vector<2x128xf32>
    %248 = arith.addf %246, %247 : vector<2x128xf32>
    %249 = arith.negf %248 : vector<2x128xf32>
    %250 = math.exp %249 : vector<2x128xf32>
    %cst_60 = arith.constant 1.000000e+00 : f32
    %251 = vector.broadcast %cst_60 : f32 to vector<2x128xf32>
    %252 = arith.addf %251, %250 : vector<2x128xf32>
    %253 = arith.divf %251, %252 : vector<2x128xf32>
    %254 = vector.extract_strided_slice %253 {offsets = [0, 0], sizes = [2, 32], strides = [1, 1]} : vector<2x128xf32> to vector<2x32xf32>
    %255 = vector.extract_strided_slice %253 {offsets = [0, 32], sizes = [2, 32], strides = [1, 1]} : vector<2x128xf32> to vector<2x32xf32>
    %256 = vector.extract_strided_slice %253 {offsets = [0, 96], sizes = [2, 32], strides = [1, 1]} : vector<2x128xf32> to vector<2x32xf32>
    %257 = vector.extract_strided_slice %248 {offsets = [0, 64], sizes = [2, 32], strides = [1, 1]} : vector<2x128xf32> to vector<2x32xf32>
    %258 = math.tanh %257 : vector<2x32xf32>
    %259 = arith.mulf %255, %242 : vector<2x32xf32>
    %260 = arith.mulf %254, %258 : vector<2x32xf32>
    %261 = arith.addf %259, %260 : vector<2x32xf32>
    %262 = math.tanh %261 : vector<2x32xf32>
    %263 = arith.mulf %256, %262 : vector<2x32xf32>
    %c6_61 = arith.constant 6 : index
    %c32_62 = arith.constant 32 : index
    %264 = vector.load %arg20[%c6_61, %c32_62] : memref<16x64xf32, #tpu.memory_space<vmem>>, vector<2x32xf32>
    tpu.vector_store %arg20[%c6_61, %c32_62], %263 {strides = array<i32>} : memref<16x64xf32, #tpu.memory_space<vmem>>, vector<2x32xf32>,
    %265 = vector.extract_strided_slice %9 {offsets = [4, 128], sizes = [2, 128], strides = [1, 1]} : vector<16x256xf32> to vector<2x128xf32>
    %cst_63 = arith.constant dense<0.000000e+00> : vector<2x128xf32>
    %266 = tpu.matmul %263, %167, %cst_63 {dimension_numbers = #tpu.dot_dimension_numbers<[1], [0], [0], [1], [0, 0, 1, 1], [], []>} : vector<2x32xf32>, vector<32x128xf32>, vector<2x128xf32> -> vector<2x128xf32>
    %267 = arith.addf %265, %266 : vector<2x128xf32>
    %268 = arith.negf %267 : vector<2x128xf32>
    %269 = math.exp %268 : vector<2x128xf32>
    %cst_64 = arith.constant 1.000000e+00 : f32
    %270 = vector.broadcast %cst_64 : f32 to vector<2x128xf32>
    %271 = arith.addf %270, %269 : vector<2x128xf32>
    %272 = arith.divf %270, %271 : vector<2x128xf32>
    %273 = vector.extract_strided_slice %272 {offsets = [0, 0], sizes = [2, 32], strides = [1, 1]} : vector<2x128xf32> to vector<2x32xf32>
    %274 = vector.extract_strided_slice %272 {offsets = [0, 32], sizes = [2, 32], strides = [1, 1]} : vector<2x128xf32> to vector<2x32xf32>
    %275 = vector.extract_strided_slice %272 {offsets = [0, 96], sizes = [2, 32], strides = [1, 1]} : vector<2x128xf32> to vector<2x32xf32>
    %276 = vector.extract_strided_slice %267 {offsets = [0, 64], sizes = [2, 32], strides = [1, 1]} : vector<2x128xf32> to vector<2x32xf32>
    %277 = math.tanh %276 : vector<2x32xf32>
    %278 = arith.mulf %274, %261 : vector<2x32xf32>
    %279 = arith.mulf %273, %277 : vector<2x32xf32>
    %280 = arith.addf %278, %279 : vector<2x32xf32>
    %281 = math.tanh %280 : vector<2x32xf32>
    %282 = arith.mulf %275, %281 : vector<2x32xf32>
    %c4_65 = arith.constant 4 : index
    %c32_66 = arith.constant 32 : index
    %283 = vector.load %arg20[%c4_65, %c32_66] : memref<16x64xf32, #tpu.memory_space<vmem>>, vector<2x32xf32>
    tpu.vector_store %arg20[%c4_65, %c32_66], %282 {strides = array<i32>} : memref<16x64xf32, #tpu.memory_space<vmem>>, vector<2x32xf32>,
    %284 = vector.extract_strided_slice %9 {offsets = [2, 128], sizes = [2, 128], strides = [1, 1]} : vector<16x256xf32> to vector<2x128xf32>
    %cst_67 = arith.constant dense<0.000000e+00> : vector<2x128xf32>
    %285 = tpu.matmul %282, %167, %cst_67 {dimension_numbers = #tpu.dot_dimension_numbers<[1], [0], [0], [1], [0, 0, 1, 1], [], []>} : vector<2x32xf32>, vector<32x128xf32>, vector<2x128xf32> -> vector<2x128xf32>
    %286 = arith.addf %284, %285 : vector<2x128xf32>
    %287 = arith.negf %286 : vector<2x128xf32>
    %288 = math.exp %287 : vector<2x128xf32>
    %cst_68 = arith.constant 1.000000e+00 : f32
    %289 = vector.broadcast %cst_68 : f32 to vector<2x128xf32>
    %290 = arith.addf %289, %288 : vector<2x128xf32>
    %291 = arith.divf %289, %290 : vector<2x128xf32>
    %292 = vector.extract_strided_slice %291 {offsets = [0, 0], sizes = [2, 32], strides = [1, 1]} : vector<2x128xf32> to vector<2x32xf32>
    %293 = vector.extract_strided_slice %291 {offsets = [0, 32], sizes = [2, 32], strides = [1, 1]} : vector<2x128xf32> to vector<2x32xf32>
    %294 = vector.extract_strided_slice %291 {offsets = [0, 96], sizes = [2, 32], strides = [1, 1]} : vector<2x128xf32> to vector<2x32xf32>
    %295 = vector.extract_strided_slice %286 {offsets = [0, 64], sizes = [2, 32], strides = [1, 1]} : vector<2x128xf32> to vector<2x32xf32>
    %296 = math.tanh %295 : vector<2x32xf32>
    %297 = arith.mulf %293, %280 : vector<2x32xf32>
    %298 = arith.mulf %292, %296 : vector<2x32xf32>
    %299 = arith.addf %297, %298 : vector<2x32xf32>
    %300 = math.tanh %299 : vector<2x32xf32>
    %301 = arith.mulf %294, %300 : vector<2x32xf32>
    %c2_69 = arith.constant 2 : index
    %c32_70 = arith.constant 32 : index
    %302 = vector.load %arg20[%c2_69, %c32_70] : memref<16x64xf32, #tpu.memory_space<vmem>>, vector<2x32xf32>
    tpu.vector_store %arg20[%c2_69, %c32_70], %301 {strides = array<i32>} : memref<16x64xf32, #tpu.memory_space<vmem>>, vector<2x32xf32>,
    %303 = vector.extract_strided_slice %9 {offsets = [0, 128], sizes = [2, 128], strides = [1, 1]} : vector<16x256xf32> to vector<2x128xf32>
    %cst_71 = arith.constant dense<0.000000e+00> : vector<2x128xf32>
    %304 = tpu.matmul %301, %167, %cst_71 {dimension_numbers = #tpu.dot_dimension_numbers<[1], [0], [0], [1], [0, 0, 1, 1], [], []>} : vector<2x32xf32>, vector<32x128xf32>, vector<2x128xf32> -> vector<2x128xf32>
    %305 = arith.addf %303, %304 : vector<2x128xf32>
    %306 = arith.negf %305 : vector<2x128xf32>
    %307 = math.exp %306 : vector<2x128xf32>
    %cst_72 = arith.constant 1.000000e+00 : f32
    %308 = vector.broadcast %cst_72 : f32 to vector<2x128xf32>
    %309 = arith.addf %308, %307 : vector<2x128xf32>
    %310 = arith.divf %308, %309 : vector<2x128xf32>
    %311 = vector.extract_strided_slice %310 {offsets = [0, 0], sizes = [2, 32], strides = [1, 1]} : vector<2x128xf32> to vector<2x32xf32>
    %312 = vector.extract_strided_slice %310 {offsets = [0, 32], sizes = [2, 32], strides = [1, 1]} : vector<2x128xf32> to vector<2x32xf32>
    %313 = vector.extract_strided_slice %310 {offsets = [0, 96], sizes = [2, 32], strides = [1, 1]} : vector<2x128xf32> to vector<2x32xf32>
    %314 = vector.extract_strided_slice %305 {offsets = [0, 64], sizes = [2, 32], strides = [1, 1]} : vector<2x128xf32> to vector<2x32xf32>
    %315 = math.tanh %314 : vector<2x32xf32>
    %316 = arith.mulf %312, %299 : vector<2x32xf32>
    %317 = arith.mulf %311, %315 : vector<2x32xf32>
    %318 = arith.addf %316, %317 : vector<2x32xf32>
    %319 = math.tanh %318 : vector<2x32xf32>
    %320 = arith.mulf %313, %319 : vector<2x32xf32>
    %c0_73 = arith.constant 0 : index
    %c32_74 = arith.constant 32 : index
    %321 = vector.load %arg20[%c0_73, %c32_74] : memref<16x64xf32, #tpu.memory_space<vmem>>, vector<2x32xf32>
    tpu.vector_store %arg20[%c0_73, %c32_74], %320 {strides = array<i32>} : memref<16x64xf32, #tpu.memory_space<vmem>>, vector<2x32xf32>,
    %c0_75 = arith.constant 0 : index
    %c0_76 = arith.constant 0 : index
    %322 = vector.load %arg20[%c0_75, %c0_76] : memref<16x64xf32, #tpu.memory_space<vmem>>, vector<16x64xf32>
    %c0_77 = arith.constant 0 : index
    %c0_78 = arith.constant 0 : index
    %323 = vector.load %arg8[%c0_77, %c0_78] : memref<64x256xf32, #tpu.memory_space<vmem>>, vector<64x256xf32>
    %cst_79 = arith.constant dense<0.000000e+00> : vector<16x256xf32>
    %324 = tpu.matmul %322, %323, %cst_79 {dimension_numbers = #tpu.dot_dimension_numbers<[1], [0], [0], [1], [0, 0, 1, 1], [], []>} : vector<16x64xf32>, vector<64x256xf32>, vector<16x256xf32> -> vector<16x256xf32>
    %c0_80 = arith.constant 0 : index
    %c0_81 = arith.constant 0 : index
    %325 = vector.load %arg9[%c0_80, %c0_81] : memref<1x256xf32, #tpu.memory_space<vmem>>, vector<1x256xf32>
    %326 = vector.broadcast %325 : vector<1x256xf32> to vector<16x256xf32>
    %327 = arith.addf %324, %326 : vector<16x256xf32>
    %c0_82 = arith.constant 0 : index
    %c0_83 = arith.constant 0 : index
    %c0_84 = arith.constant 0 : index
    %328 = vector.load %arg10[%c0_82, %c0_83, %c0_84] : memref<2x32x128xf32, #tpu.memory_space<vmem>>, vector<1x32x128xf32>
    %329 = vector.shape_cast %328 : vector<1x32x128xf32> to vector<32x128xf32>
    %cst_85 = arith.constant 0.000000e+00 : f32
    %330 = vector.broadcast %cst_85 : f32 to vector<2x32xf32>
    %cst_86 = arith.constant 0.000000e+00 : f32
    %331 = vector.broadcast %cst_86 : f32 to vector<2x32xf32>
    %332 = vector.extract_strided_slice %327 {offsets = [0, 0], sizes = [2, 128], strides = [1, 1]} : vector<16x256xf32> to vector<2x128xf32>
    %cst_87 = arith.constant dense<0.000000e+00> : vector<2x128xf32>
    %333 = tpu.matmul %330, %329, %cst_87 {dimension_numbers = #tpu.dot_dimension_numbers<[1], [0], [0], [1], [0, 0, 1, 1], [], []>} : vector<2x32xf32>, vector<32x128xf32>, vector<2x128xf32> -> vector<2x128xf32>
    %334 = arith.addf %332, %333 : vector<2x128xf32>
    %335 = arith.negf %334 : vector<2x128xf32>
    %336 = math.exp %335 : vector<2x128xf32>
    %cst_88 = arith.constant 1.000000e+00 : f32
    %337 = vector.broadcast %cst_88 : f32 to vector<2x128xf32>
    %338 = arith.addf %337, %336 : vector<2x128xf32>
    %339 = arith.divf %337, %338 : vector<2x128xf32>
    %340 = vector.extract_strided_slice %339 {offsets = [0, 0], sizes = [2, 32], strides = [1, 1]} : vector<2x128xf32> to vector<2x32xf32>
    %341 = vector.extract_strided_slice %339 {offsets = [0, 32], sizes = [2, 32], strides = [1, 1]} : vector<2x128xf32> to vector<2x32xf32>
    %342 = vector.extract_strided_slice %339 {offsets = [0, 96], sizes = [2, 32], strides = [1, 1]} : vector<2x128xf32> to vector<2x32xf32>
    %343 = vector.extract_strided_slice %334 {offsets = [0, 64], sizes = [2, 32], strides = [1, 1]} : vector<2x128xf32> to vector<2x32xf32>
    %344 = math.tanh %343 : vector<2x32xf32>
    %345 = arith.mulf %341, %331 : vector<2x32xf32>
    %346 = arith.mulf %340, %344 : vector<2x32xf32>
    %347 = arith.addf %345, %346 : vector<2x32xf32>
    %348 = math.tanh %347 : vector<2x32xf32>
    %349 = arith.mulf %342, %348 : vector<2x32xf32>
    %c0_89 = arith.constant 0 : index
    %c0_90 = arith.constant 0 : index
    %350 = vector.load %arg21[%c0_89, %c0_90] : memref<16x64xf32, #tpu.memory_space<vmem>>, vector<2x32xf32>
    tpu.vector_store %arg21[%c0_89, %c0_90], %349 {strides = array<i32>} : memref<16x64xf32, #tpu.memory_space<vmem>>, vector<2x32xf32>,
    %351 = vector.extract_strided_slice %327 {offsets = [2, 0], sizes = [2, 128], strides = [1, 1]} : vector<16x256xf32> to vector<2x128xf32>
    %cst_91 = arith.constant dense<0.000000e+00> : vector<2x128xf32>
    %352 = tpu.matmul %349, %329, %cst_91 {dimension_numbers = #tpu.dot_dimension_numbers<[1], [0], [0], [1], [0, 0, 1, 1], [], []>} : vector<2x32xf32>, vector<32x128xf32>, vector<2x128xf32> -> vector<2x128xf32>
    %353 = arith.addf %351, %352 : vector<2x128xf32>
    %354 = arith.negf %353 : vector<2x128xf32>
    %355 = math.exp %354 : vector<2x128xf32>
    %cst_92 = arith.constant 1.000000e+00 : f32
    %356 = vector.broadcast %cst_92 : f32 to vector<2x128xf32>
    %357 = arith.addf %356, %355 : vector<2x128xf32>
    %358 = arith.divf %356, %357 : vector<2x128xf32>
    %359 = vector.extract_strided_slice %358 {offsets = [0, 0], sizes = [2, 32], strides = [1, 1]} : vector<2x128xf32> to vector<2x32xf32>
    %360 = vector.extract_strided_slice %358 {offsets = [0, 32], sizes = [2, 32], strides = [1, 1]} : vector<2x128xf32> to vector<2x32xf32>
    %361 = vector.extract_strided_slice %358 {offsets = [0, 96], sizes = [2, 32], strides = [1, 1]} : vector<2x128xf32> to vector<2x32xf32>
    %362 = vector.extract_strided_slice %353 {offsets = [0, 64], sizes = [2, 32], strides = [1, 1]} : vector<2x128xf32> to vector<2x32xf32>
    %363 = math.tanh %362 : vector<2x32xf32>
    %364 = arith.mulf %360, %347 : vector<2x32xf32>
    %365 = arith.mulf %359, %363 : vector<2x32xf32>
    %366 = arith.addf %364, %365 : vector<2x32xf32>
    %367 = math.tanh %366 : vector<2x32xf32>
    %368 = arith.mulf %361, %367 : vector<2x32xf32>
    %c2_93 = arith.constant 2 : index
    %c0_94 = arith.constant 0 : index
    %369 = vector.load %arg21[%c2_93, %c0_94] : memref<16x64xf32, #tpu.memory_space<vmem>>, vector<2x32xf32>
    tpu.vector_store %arg21[%c2_93, %c0_94], %368 {strides = array<i32>} : memref<16x64xf32, #tpu.memory_space<vmem>>, vector<2x32xf32>,
    %370 = vector.extract_strided_slice %327 {offsets = [4, 0], sizes = [2, 128], strides = [1, 1]} : vector<16x256xf32> to vector<2x128xf32>
    %cst_95 = arith.constant dense<0.000000e+00> : vector<2x128xf32>
    %371 = tpu.matmul %368, %329, %cst_95 {dimension_numbers = #tpu.dot_dimension_numbers<[1], [0], [0], [1], [0, 0, 1, 1], [], []>} : vector<2x32xf32>, vector<32x128xf32>, vector<2x128xf32> -> vector<2x128xf32>
    %372 = arith.addf %370, %371 : vector<2x128xf32>
    %373 = arith.negf %372 : vector<2x128xf32>
    %374 = math.exp %373 : vector<2x128xf32>
    %cst_96 = arith.constant 1.000000e+00 : f32
    %375 = vector.broadcast %cst_96 : f32 to vector<2x128xf32>
    %376 = arith.addf %375, %374 : vector<2x128xf32>
    %377 = arith.divf %375, %376 : vector<2x128xf32>
    %378 = vector.extract_strided_slice %377 {offsets = [0, 0], sizes = [2, 32], strides = [1, 1]} : vector<2x128xf32> to vector<2x32xf32>
    %379 = vector.extract_strided_slice %377 {offsets = [0, 32], sizes = [2, 32], strides = [1, 1]} : vector<2x128xf32> to vector<2x32xf32>
    %380 = vector.extract_strided_slice %377 {offsets = [0, 96], sizes = [2, 32], strides = [1, 1]} : vector<2x128xf32> to vector<2x32xf32>
    %381 = vector.extract_strided_slice %372 {offsets = [0, 64], sizes = [2, 32], strides = [1, 1]} : vector<2x128xf32> to vector<2x32xf32>
    %382 = math.tanh %381 : vector<2x32xf32>
    %383 = arith.mulf %379, %366 : vector<2x32xf32>
    %384 = arith.mulf %378, %382 : vector<2x32xf32>
    %385 = arith.addf %383, %384 : vector<2x32xf32>
    %386 = math.tanh %385 : vector<2x32xf32>
    %387 = arith.mulf %380, %386 : vector<2x32xf32>
    %c4_97 = arith.constant 4 : index
    %c0_98 = arith.constant 0 : index
    %388 = vector.load %arg21[%c4_97, %c0_98] : memref<16x64xf32, #tpu.memory_space<vmem>>, vector<2x32xf32>
    tpu.vector_store %arg21[%c4_97, %c0_98], %387 {strides = array<i32>} : memref<16x64xf32, #tpu.memory_space<vmem>>, vector<2x32xf32>,
    %389 = vector.extract_strided_slice %327 {offsets = [6, 0], sizes = [2, 128], strides = [1, 1]} : vector<16x256xf32> to vector<2x128xf32>
    %cst_99 = arith.constant dense<0.000000e+00> : vector<2x128xf32>
    %390 = tpu.matmul %387, %329, %cst_99 {dimension_numbers = #tpu.dot_dimension_numbers<[1], [0], [0], [1], [0, 0, 1, 1], [], []>} : vector<2x32xf32>, vector<32x128xf32>, vector<2x128xf32> -> vector<2x128xf32>
    %391 = arith.addf %389, %390 : vector<2x128xf32>
    %392 = arith.negf %391 : vector<2x128xf32>
    %393 = math.exp %392 : vector<2x128xf32>
    %cst_100 = arith.constant 1.000000e+00 : f32
    %394 = vector.broadcast %cst_100 : f32 to vector<2x128xf32>
    %395 = arith.addf %394, %393 : vector<2x128xf32>
    %396 = arith.divf %394, %395 : vector<2x128xf32>
    %397 = vector.extract_strided_slice %396 {offsets = [0, 0], sizes = [2, 32], strides = [1, 1]} : vector<2x128xf32> to vector<2x32xf32>
    %398 = vector.extract_strided_slice %396 {offsets = [0, 32], sizes = [2, 32], strides = [1, 1]} : vector<2x128xf32> to vector<2x32xf32>
    %399 = vector.extract_strided_slice %396 {offsets = [0, 96], sizes = [2, 32], strides = [1, 1]} : vector<2x128xf32> to vector<2x32xf32>
    %400 = vector.extract_strided_slice %391 {offsets = [0, 64], sizes = [2, 32], strides = [1, 1]} : vector<2x128xf32> to vector<2x32xf32>
    %401 = math.tanh %400 : vector<2x32xf32>
    %402 = arith.mulf %398, %385 : vector<2x32xf32>
    %403 = arith.mulf %397, %401 : vector<2x32xf32>
    %404 = arith.addf %402, %403 : vector<2x32xf32>
    %405 = math.tanh %404 : vector<2x32xf32>
    %406 = arith.mulf %399, %405 : vector<2x32xf32>
    %c6_101 = arith.constant 6 : index
    %c0_102 = arith.constant 0 : index
    %407 = vector.load %arg21[%c6_101, %c0_102] : memref<16x64xf32, #tpu.memory_space<vmem>>, vector<2x32xf32>
    tpu.vector_store %arg21[%c6_101, %c0_102], %406 {strides = array<i32>} : memref<16x64xf32, #tpu.memory_space<vmem>>, vector<2x32xf32>,
    %408 = vector.extract_strided_slice %327 {offsets = [8, 0], sizes = [2, 128], strides = [1, 1]} : vector<16x256xf32> to vector<2x128xf32>
    %cst_103 = arith.constant dense<0.000000e+00> : vector<2x128xf32>
    %409 = tpu.matmul %406, %329, %cst_103 {dimension_numbers = #tpu.dot_dimension_numbers<[1], [0], [0], [1], [0, 0, 1, 1], [], []>} : vector<2x32xf32>, vector<32x128xf32>, vector<2x128xf32> -> vector<2x128xf32>
    %410 = arith.addf %408, %409 : vector<2x128xf32>
    %411 = arith.negf %410 : vector<2x128xf32>
    %412 = math.exp %411 : vector<2x128xf32>
    %cst_104 = arith.constant 1.000000e+00 : f32
    %413 = vector.broadcast %cst_104 : f32 to vector<2x128xf32>
    %414 = arith.addf %413, %412 : vector<2x128xf32>
    %415 = arith.divf %413, %414 : vector<2x128xf32>
    %416 = vector.extract_strided_slice %415 {offsets = [0, 0], sizes = [2, 32], strides = [1, 1]} : vector<2x128xf32> to vector<2x32xf32>
    %417 = vector.extract_strided_slice %415 {offsets = [0, 32], sizes = [2, 32], strides = [1, 1]} : vector<2x128xf32> to vector<2x32xf32>
    %418 = vector.extract_strided_slice %415 {offsets = [0, 96], sizes = [2, 32], strides = [1, 1]} : vector<2x128xf32> to vector<2x32xf32>
    %419 = vector.extract_strided_slice %410 {offsets = [0, 64], sizes = [2, 32], strides = [1, 1]} : vector<2x128xf32> to vector<2x32xf32>
    %420 = math.tanh %419 : vector<2x32xf32>
    %421 = arith.mulf %417, %404 : vector<2x32xf32>
    %422 = arith.mulf %416, %420 : vector<2x32xf32>
    %423 = arith.addf %421, %422 : vector<2x32xf32>
    %424 = math.tanh %423 : vector<2x32xf32>
    %425 = arith.mulf %418, %424 : vector<2x32xf32>
    %c8_105 = arith.constant 8 : index
    %c0_106 = arith.constant 0 : index
    %426 = vector.load %arg21[%c8_105, %c0_106] : memref<16x64xf32, #tpu.memory_space<vmem>>, vector<2x32xf32>
    tpu.vector_store %arg21[%c8_105, %c0_106], %425 {strides = array<i32>} : memref<16x64xf32, #tpu.memory_space<vmem>>, vector<2x32xf32>,
    %427 = vector.extract_strided_slice %327 {offsets = [10, 0], sizes = [2, 128], strides = [1, 1]} : vector<16x256xf32> to vector<2x128xf32>
    %cst_107 = arith.constant dense<0.000000e+00> : vector<2x128xf32>
    %428 = tpu.matmul %425, %329, %cst_107 {dimension_numbers = #tpu.dot_dimension_numbers<[1], [0], [0], [1], [0, 0, 1, 1], [], []>} : vector<2x32xf32>, vector<32x128xf32>, vector<2x128xf32> -> vector<2x128xf32>
    %429 = arith.addf %427, %428 : vector<2x128xf32>
    %430 = arith.negf %429 : vector<2x128xf32>
    %431 = math.exp %430 : vector<2x128xf32>
    %cst_108 = arith.constant 1.000000e+00 : f32
    %432 = vector.broadcast %cst_108 : f32 to vector<2x128xf32>
    %433 = arith.addf %432, %431 : vector<2x128xf32>
    %434 = arith.divf %432, %433 : vector<2x128xf32>
    %435 = vector.extract_strided_slice %434 {offsets = [0, 0], sizes = [2, 32], strides = [1, 1]} : vector<2x128xf32> to vector<2x32xf32>
    %436 = vector.extract_strided_slice %434 {offsets = [0, 32], sizes = [2, 32], strides = [1, 1]} : vector<2x128xf32> to vector<2x32xf32>
    %437 = vector.extract_strided_slice %434 {offsets = [0, 96], sizes = [2, 32], strides = [1, 1]} : vector<2x128xf32> to vector<2x32xf32>
    %438 = vector.extract_strided_slice %429 {offsets = [0, 64], sizes = [2, 32], strides = [1, 1]} : vector<2x128xf32> to vector<2x32xf32>
    %439 = math.tanh %438 : vector<2x32xf32>
    %440 = arith.mulf %436, %423 : vector<2x32xf32>
    %441 = arith.mulf %435, %439 : vector<2x32xf32>
    %442 = arith.addf %440, %441 : vector<2x32xf32>
    %443 = math.tanh %442 : vector<2x32xf32>
    %444 = arith.mulf %437, %443 : vector<2x32xf32>
    %c10_109 = arith.constant 10 : index
    %c0_110 = arith.constant 0 : index
    %445 = vector.load %arg21[%c10_109, %c0_110] : memref<16x64xf32, #tpu.memory_space<vmem>>, vector<2x32xf32>
    tpu.vector_store %arg21[%c10_109, %c0_110], %444 {strides = array<i32>} : memref<16x64xf32, #tpu.memory_space<vmem>>, vector<2x32xf32>,
    %446 = vector.extract_strided_slice %327 {offsets = [12, 0], sizes = [2, 128], strides = [1, 1]} : vector<16x256xf32> to vector<2x128xf32>
    %cst_111 = arith.constant dense<0.000000e+00> : vector<2x128xf32>
    %447 = tpu.matmul %444, %329, %cst_111 {dimension_numbers = #tpu.dot_dimension_numbers<[1], [0], [0], [1], [0, 0, 1, 1], [], []>} : vector<2x32xf32>, vector<32x128xf32>, vector<2x128xf32> -> vector<2x128xf32>
    %448 = arith.addf %446, %447 : vector<2x128xf32>
    %449 = arith.negf %448 : vector<2x128xf32>
    %450 = math.exp %449 : vector<2x128xf32>
    %cst_112 = arith.constant 1.000000e+00 : f32
    %451 = vector.broadcast %cst_112 : f32 to vector<2x128xf32>
    %452 = arith.addf %451, %450 : vector<2x128xf32>
    %453 = arith.divf %451, %452 : vector<2x128xf32>
    %454 = vector.extract_strided_slice %453 {offsets = [0, 0], sizes = [2, 32], strides = [1, 1]} : vector<2x128xf32> to vector<2x32xf32>
    %455 = vector.extract_strided_slice %453 {offsets = [0, 32], sizes = [2, 32], strides = [1, 1]} : vector<2x128xf32> to vector<2x32xf32>
    %456 = vector.extract_strided_slice %453 {offsets = [0, 96], sizes = [2, 32], strides = [1, 1]} : vector<2x128xf32> to vector<2x32xf32>
    %457 = vector.extract_strided_slice %448 {offsets = [0, 64], sizes = [2, 32], strides = [1, 1]} : vector<2x128xf32> to vector<2x32xf32>
    %458 = math.tanh %457 : vector<2x32xf32>
    %459 = arith.mulf %455, %442 : vector<2x32xf32>
    %460 = arith.mulf %454, %458 : vector<2x32xf32>
    %461 = arith.addf %459, %460 : vector<2x32xf32>
    %462 = math.tanh %461 : vector<2x32xf32>
    %463 = arith.mulf %456, %462 : vector<2x32xf32>
    %c12_113 = arith.constant 12 : index
    %c0_114 = arith.constant 0 : index
    %464 = vector.load %arg21[%c12_113, %c0_114] : memref<16x64xf32, #tpu.memory_space<vmem>>, vector<2x32xf32>
    tpu.vector_store %arg21[%c12_113, %c0_114], %463 {strides = array<i32>} : memref<16x64xf32, #tpu.memory_space<vmem>>, vector<2x32xf32>,
    %465 = vector.extract_strided_slice %327 {offsets = [14, 0], sizes = [2, 128], strides = [1, 1]} : vector<16x256xf32> to vector<2x128xf32>
    %cst_115 = arith.constant dense<0.000000e+00> : vector<2x128xf32>
    %466 = tpu.matmul %463, %329, %cst_115 {dimension_numbers = #tpu.dot_dimension_numbers<[1], [0], [0], [1], [0, 0, 1, 1], [], []>} : vector<2x32xf32>, vector<32x128xf32>, vector<2x128xf32> -> vector<2x128xf32>
    %467 = arith.addf %465, %466 : vector<2x128xf32>
    %468 = arith.negf %467 : vector<2x128xf32>
    %469 = math.exp %468 : vector<2x128xf32>
    %cst_116 = arith.constant 1.000000e+00 : f32
    %470 = vector.broadcast %cst_116 : f32 to vector<2x128xf32>
    %471 = arith.addf %470, %469 : vector<2x128xf32>
    %472 = arith.divf %470, %471 : vector<2x128xf32>
    %473 = vector.extract_strided_slice %472 {offsets = [0, 0], sizes = [2, 32], strides = [1, 1]} : vector<2x128xf32> to vector<2x32xf32>
    %474 = vector.extract_strided_slice %472 {offsets = [0, 32], sizes = [2, 32], strides = [1, 1]} : vector<2x128xf32> to vector<2x32xf32>
    %475 = vector.extract_strided_slice %472 {offsets = [0, 96], sizes = [2, 32], strides = [1, 1]} : vector<2x128xf32> to vector<2x32xf32>
    %476 = vector.extract_strided_slice %467 {offsets = [0, 64], sizes = [2, 32], strides = [1, 1]} : vector<2x128xf32> to vector<2x32xf32>
    %477 = math.tanh %476 : vector<2x32xf32>
    %478 = arith.mulf %474, %461 : vector<2x32xf32>
    %479 = arith.mulf %473, %477 : vector<2x32xf32>
    %480 = arith.addf %478, %479 : vector<2x32xf32>
    %481 = math.tanh %480 : vector<2x32xf32>
    %482 = arith.mulf %475, %481 : vector<2x32xf32>
    %c14_117 = arith.constant 14 : index
    %c0_118 = arith.constant 0 : index
    %483 = vector.load %arg21[%c14_117, %c0_118] : memref<16x64xf32, #tpu.memory_space<vmem>>, vector<2x32xf32>
    tpu.vector_store %arg21[%c14_117, %c0_118], %482 {strides = array<i32>} : memref<16x64xf32, #tpu.memory_space<vmem>>, vector<2x32xf32>,
    %c1_119 = arith.constant 1 : index
    %c0_120 = arith.constant 0 : index
    %c0_121 = arith.constant 0 : index
    %484 = vector.load %arg10[%c1_119, %c0_120, %c0_121] : memref<2x32x128xf32, #tpu.memory_space<vmem>>, vector<1x32x128xf32>
    %485 = vector.shape_cast %484 : vector<1x32x128xf32> to vector<32x128xf32>
    %cst_122 = arith.constant 0.000000e+00 : f32
    %486 = vector.broadcast %cst_122 : f32 to vector<2x32xf32>
    %cst_123 = arith.constant 0.000000e+00 : f32
    %487 = vector.broadcast %cst_123 : f32 to vector<2x32xf32>
    %488 = vector.extract_strided_slice %327 {offsets = [14, 128], sizes = [2, 128], strides = [1, 1]} : vector<16x256xf32> to vector<2x128xf32>
    %cst_124 = arith.constant dense<0.000000e+00> : vector<2x128xf32>
    %489 = tpu.matmul %486, %485, %cst_124 {dimension_numbers = #tpu.dot_dimension_numbers<[1], [0], [0], [1], [0, 0, 1, 1], [], []>} : vector<2x32xf32>, vector<32x128xf32>, vector<2x128xf32> -> vector<2x128xf32>
    %490 = arith.addf %488, %489 : vector<2x128xf32>
    %491 = arith.negf %490 : vector<2x128xf32>
    %492 = math.exp %491 : vector<2x128xf32>
    %cst_125 = arith.constant 1.000000e+00 : f32
    %493 = vector.broadcast %cst_125 : f32 to vector<2x128xf32>
    %494 = arith.addf %493, %492 : vector<2x128xf32>
    %495 = arith.divf %493, %494 : vector<2x128xf32>
    %496 = vector.extract_strided_slice %495 {offsets = [0, 0], sizes = [2, 32], strides = [1, 1]} : vector<2x128xf32> to vector<2x32xf32>
    %497 = vector.extract_strided_slice %495 {offsets = [0, 32], sizes = [2, 32], strides = [1, 1]} : vector<2x128xf32> to vector<2x32xf32>
    %498 = vector.extract_strided_slice %495 {offsets = [0, 96], sizes = [2, 32], strides = [1, 1]} : vector<2x128xf32> to vector<2x32xf32>
    %499 = vector.extract_strided_slice %490 {offsets = [0, 64], sizes = [2, 32], strides = [1, 1]} : vector<2x128xf32> to vector<2x32xf32>
    %500 = math.tanh %499 : vector<2x32xf32>
    %501 = arith.mulf %497, %487 : vector<2x32xf32>
    %502 = arith.mulf %496, %500 : vector<2x32xf32>
    %503 = arith.addf %501, %502 : vector<2x32xf32>
    %504 = math.tanh %503 : vector<2x32xf32>
    %505 = arith.mulf %498, %504 : vector<2x32xf32>
    %c14_126 = arith.constant 14 : index
    %c32_127 = arith.constant 32 : index
    %506 = vector.load %arg21[%c14_126, %c32_127] : memref<16x64xf32, #tpu.memory_space<vmem>>, vector<2x32xf32>
    tpu.vector_store %arg21[%c14_126, %c32_127], %505 {strides = array<i32>} : memref<16x64xf32, #tpu.memory_space<vmem>>, vector<2x32xf32>,
    %507 = vector.extract_strided_slice %327 {offsets = [12, 128], sizes = [2, 128], strides = [1, 1]} : vector<16x256xf32> to vector<2x128xf32>
    %cst_128 = arith.constant dense<0.000000e+00> : vector<2x128xf32>
    %508 = tpu.matmul %505, %485, %cst_128 {dimension_numbers = #tpu.dot_dimension_numbers<[1], [0], [0], [1], [0, 0, 1, 1], [], []>} : vector<2x32xf32>, vector<32x128xf32>, vector<2x128xf32> -> vector<2x128xf32>
    %509 = arith.addf %507, %508 : vector<2x128xf32>
    %510 = arith.negf %509 : vector<2x128xf32>
    %511 = math.exp %510 : vector<2x128xf32>
    %cst_129 = arith.constant 1.000000e+00 : f32
    %512 = vector.broadcast %cst_129 : f32 to vector<2x128xf32>
    %513 = arith.addf %512, %511 : vector<2x128xf32>
    %514 = arith.divf %512, %513 : vector<2x128xf32>
    %515 = vector.extract_strided_slice %514 {offsets = [0, 0], sizes = [2, 32], strides = [1, 1]} : vector<2x128xf32> to vector<2x32xf32>
    %516 = vector.extract_strided_slice %514 {offsets = [0, 32], sizes = [2, 32], strides = [1, 1]} : vector<2x128xf32> to vector<2x32xf32>
    %517 = vector.extract_strided_slice %514 {offsets = [0, 96], sizes = [2, 32], strides = [1, 1]} : vector<2x128xf32> to vector<2x32xf32>
    %518 = vector.extract_strided_slice %509 {offsets = [0, 64], sizes = [2, 32], strides = [1, 1]} : vector<2x128xf32> to vector<2x32xf32>
    %519 = math.tanh %518 : vector<2x32xf32>
    %520 = arith.mulf %516, %503 : vector<2x32xf32>
    %521 = arith.mulf %515, %519 : vector<2x32xf32>
    %522 = arith.addf %520, %521 : vector<2x32xf32>
    %523 = math.tanh %522 : vector<2x32xf32>
    %524 = arith.mulf %517, %523 : vector<2x32xf32>
    %c12_130 = arith.constant 12 : index
    %c32_131 = arith.constant 32 : index
    %525 = vector.load %arg21[%c12_130, %c32_131] : memref<16x64xf32, #tpu.memory_space<vmem>>, vector<2x32xf32>
    tpu.vector_store %arg21[%c12_130, %c32_131], %524 {strides = array<i32>} : memref<16x64xf32, #tpu.memory_space<vmem>>, vector<2x32xf32>,
    %526 = vector.extract_strided_slice %327 {offsets = [10, 128], sizes = [2, 128], strides = [1, 1]} : vector<16x256xf32> to vector<2x128xf32>
    %cst_132 = arith.constant dense<0.000000e+00> : vector<2x128xf32>
    %527 = tpu.matmul %524, %485, %cst_132 {dimension_numbers = #tpu.dot_dimension_numbers<[1], [0], [0], [1], [0, 0, 1, 1], [], []>} : vector<2x32xf32>, vector<32x128xf32>, vector<2x128xf32> -> vector<2x128xf32>
    %528 = arith.addf %526, %527 : vector<2x128xf32>
    %529 = arith.negf %528 : vector<2x128xf32>
    %530 = math.exp %529 : vector<2x128xf32>
    %cst_133 = arith.constant 1.000000e+00 : f32
    %531 = vector.broadcast %cst_133 : f32 to vector<2x128xf32>
    %532 = arith.addf %531, %530 : vector<2x128xf32>
    %533 = arith.divf %531, %532 : vector<2x128xf32>
    %534 = vector.extract_strided_slice %533 {offsets = [0, 0], sizes = [2, 32], strides = [1, 1]} : vector<2x128xf32> to vector<2x32xf32>
    %535 = vector.extract_strided_slice %533 {offsets = [0, 32], sizes = [2, 32], strides = [1, 1]} : vector<2x128xf32> to vector<2x32xf32>
    %536 = vector.extract_strided_slice %533 {offsets = [0, 96], sizes = [2, 32], strides = [1, 1]} : vector<2x128xf32> to vector<2x32xf32>
    %537 = vector.extract_strided_slice %528 {offsets = [0, 64], sizes = [2, 32], strides = [1, 1]} : vector<2x128xf32> to vector<2x32xf32>
    %538 = math.tanh %537 : vector<2x32xf32>
    %539 = arith.mulf %535, %522 : vector<2x32xf32>
    %540 = arith.mulf %534, %538 : vector<2x32xf32>
    %541 = arith.addf %539, %540 : vector<2x32xf32>
    %542 = math.tanh %541 : vector<2x32xf32>
    %543 = arith.mulf %536, %542 : vector<2x32xf32>
    %c10_134 = arith.constant 10 : index
    %c32_135 = arith.constant 32 : index
    %544 = vector.load %arg21[%c10_134, %c32_135] : memref<16x64xf32, #tpu.memory_space<vmem>>, vector<2x32xf32>
    tpu.vector_store %arg21[%c10_134, %c32_135], %543 {strides = array<i32>} : memref<16x64xf32, #tpu.memory_space<vmem>>, vector<2x32xf32>,
    %545 = vector.extract_strided_slice %327 {offsets = [8, 128], sizes = [2, 128], strides = [1, 1]} : vector<16x256xf32> to vector<2x128xf32>
    %cst_136 = arith.constant dense<0.000000e+00> : vector<2x128xf32>
    %546 = tpu.matmul %543, %485, %cst_136 {dimension_numbers = #tpu.dot_dimension_numbers<[1], [0], [0], [1], [0, 0, 1, 1], [], []>} : vector<2x32xf32>, vector<32x128xf32>, vector<2x128xf32> -> vector<2x128xf32>
    %547 = arith.addf %545, %546 : vector<2x128xf32>
    %548 = arith.negf %547 : vector<2x128xf32>
    %549 = math.exp %548 : vector<2x128xf32>
    %cst_137 = arith.constant 1.000000e+00 : f32
    %550 = vector.broadcast %cst_137 : f32 to vector<2x128xf32>
    %551 = arith.addf %550, %549 : vector<2x128xf32>
    %552 = arith.divf %550, %551 : vector<2x128xf32>
    %553 = vector.extract_strided_slice %552 {offsets = [0, 0], sizes = [2, 32], strides = [1, 1]} : vector<2x128xf32> to vector<2x32xf32>
    %554 = vector.extract_strided_slice %552 {offsets = [0, 32], sizes = [2, 32], strides = [1, 1]} : vector<2x128xf32> to vector<2x32xf32>
    %555 = vector.extract_strided_slice %552 {offsets = [0, 96], sizes = [2, 32], strides = [1, 1]} : vector<2x128xf32> to vector<2x32xf32>
    %556 = vector.extract_strided_slice %547 {offsets = [0, 64], sizes = [2, 32], strides = [1, 1]} : vector<2x128xf32> to vector<2x32xf32>
    %557 = math.tanh %556 : vector<2x32xf32>
    %558 = arith.mulf %554, %541 : vector<2x32xf32>
    %559 = arith.mulf %553, %557 : vector<2x32xf32>
    %560 = arith.addf %558, %559 : vector<2x32xf32>
    %561 = math.tanh %560 : vector<2x32xf32>
    %562 = arith.mulf %555, %561 : vector<2x32xf32>
    %c8_138 = arith.constant 8 : index
    %c32_139 = arith.constant 32 : index
    %563 = vector.load %arg21[%c8_138, %c32_139] : memref<16x64xf32, #tpu.memory_space<vmem>>, vector<2x32xf32>
    tpu.vector_store %arg21[%c8_138, %c32_139], %562 {strides = array<i32>} : memref<16x64xf32, #tpu.memory_space<vmem>>, vector<2x32xf32>,
    %564 = vector.extract_strided_slice %327 {offsets = [6, 128], sizes = [2, 128], strides = [1, 1]} : vector<16x256xf32> to vector<2x128xf32>
    %cst_140 = arith.constant dense<0.000000e+00> : vector<2x128xf32>
    %565 = tpu.matmul %562, %485, %cst_140 {dimension_numbers = #tpu.dot_dimension_numbers<[1], [0], [0], [1], [0, 0, 1, 1], [], []>} : vector<2x32xf32>, vector<32x128xf32>, vector<2x128xf32> -> vector<2x128xf32>
    %566 = arith.addf %564, %565 : vector<2x128xf32>
    %567 = arith.negf %566 : vector<2x128xf32>
    %568 = math.exp %567 : vector<2x128xf32>
    %cst_141 = arith.constant 1.000000e+00 : f32
    %569 = vector.broadcast %cst_141 : f32 to vector<2x128xf32>
    %570 = arith.addf %569, %568 : vector<2x128xf32>
    %571 = arith.divf %569, %570 : vector<2x128xf32>
    %572 = vector.extract_strided_slice %571 {offsets = [0, 0], sizes = [2, 32], strides = [1, 1]} : vector<2x128xf32> to vector<2x32xf32>
    %573 = vector.extract_strided_slice %571 {offsets = [0, 32], sizes = [2, 32], strides = [1, 1]} : vector<2x128xf32> to vector<2x32xf32>
    %574 = vector.extract_strided_slice %571 {offsets = [0, 96], sizes = [2, 32], strides = [1, 1]} : vector<2x128xf32> to vector<2x32xf32>
    %575 = vector.extract_strided_slice %566 {offsets = [0, 64], sizes = [2, 32], strides = [1, 1]} : vector<2x128xf32> to vector<2x32xf32>
    %576 = math.tanh %575 : vector<2x32xf32>
    %577 = arith.mulf %573, %560 : vector<2x32xf32>
    %578 = arith.mulf %572, %576 : vector<2x32xf32>
    %579 = arith.addf %577, %578 : vector<2x32xf32>
    %580 = math.tanh %579 : vector<2x32xf32>
    %581 = arith.mulf %574, %580 : vector<2x32xf32>
    %c6_142 = arith.constant 6 : index
    %c32_143 = arith.constant 32 : index
    %582 = vector.load %arg21[%c6_142, %c32_143] : memref<16x64xf32, #tpu.memory_space<vmem>>, vector<2x32xf32>
    tpu.vector_store %arg21[%c6_142, %c32_143], %581 {strides = array<i32>} : memref<16x64xf32, #tpu.memory_space<vmem>>, vector<2x32xf32>,
    %583 = vector.extract_strided_slice %327 {offsets = [4, 128], sizes = [2, 128], strides = [1, 1]} : vector<16x256xf32> to vector<2x128xf32>
    %cst_144 = arith.constant dense<0.000000e+00> : vector<2x128xf32>
    %584 = tpu.matmul %581, %485, %cst_144 {dimension_numbers = #tpu.dot_dimension_numbers<[1], [0], [0], [1], [0, 0, 1, 1], [], []>} : vector<2x32xf32>, vector<32x128xf32>, vector<2x128xf32> -> vector<2x128xf32>
    %585 = arith.addf %583, %584 : vector<2x128xf32>
    %586 = arith.negf %585 : vector<2x128xf32>
    %587 = math.exp %586 : vector<2x128xf32>
    %cst_145 = arith.constant 1.000000e+00 : f32
    %588 = vector.broadcast %cst_145 : f32 to vector<2x128xf32>
    %589 = arith.addf %588, %587 : vector<2x128xf32>
    %590 = arith.divf %588, %589 : vector<2x128xf32>
    %591 = vector.extract_strided_slice %590 {offsets = [0, 0], sizes = [2, 32], strides = [1, 1]} : vector<2x128xf32> to vector<2x32xf32>
    %592 = vector.extract_strided_slice %590 {offsets = [0, 32], sizes = [2, 32], strides = [1, 1]} : vector<2x128xf32> to vector<2x32xf32>
    %593 = vector.extract_strided_slice %590 {offsets = [0, 96], sizes = [2, 32], strides = [1, 1]} : vector<2x128xf32> to vector<2x32xf32>
    %594 = vector.extract_strided_slice %585 {offsets = [0, 64], sizes = [2, 32], strides = [1, 1]} : vector<2x128xf32> to vector<2x32xf32>
    %595 = math.tanh %594 : vector<2x32xf32>
    %596 = arith.mulf %592, %579 : vector<2x32xf32>
    %597 = arith.mulf %591, %595 : vector<2x32xf32>
    %598 = arith.addf %596, %597 : vector<2x32xf32>
    %599 = math.tanh %598 : vector<2x32xf32>
    %600 = arith.mulf %593, %599 : vector<2x32xf32>
    %c4_146 = arith.constant 4 : index
    %c32_147 = arith.constant 32 : index
    %601 = vector.load %arg21[%c4_146, %c32_147] : memref<16x64xf32, #tpu.memory_space<vmem>>, vector<2x32xf32>
    tpu.vector_store %arg21[%c4_146, %c32_147], %600 {strides = array<i32>} : memref<16x64xf32, #tpu.memory_space<vmem>>, vector<2x32xf32>,
    %602 = vector.extract_strided_slice %327 {offsets = [2, 128], sizes = [2, 128], strides = [1, 1]} : vector<16x256xf32> to vector<2x128xf32>
    %cst_148 = arith.constant dense<0.000000e+00> : vector<2x128xf32>
    %603 = tpu.matmul %600, %485, %cst_148 {dimension_numbers = #tpu.dot_dimension_numbers<[1], [0], [0], [1], [0, 0, 1, 1], [], []>} : vector<2x32xf32>, vector<32x128xf32>, vector<2x128xf32> -> vector<2x128xf32>
    %604 = arith.addf %602, %603 : vector<2x128xf32>
    %605 = arith.negf %604 : vector<2x128xf32>
    %606 = math.exp %605 : vector<2x128xf32>
    %cst_149 = arith.constant 1.000000e+00 : f32
    %607 = vector.broadcast %cst_149 : f32 to vector<2x128xf32>
    %608 = arith.addf %607, %606 : vector<2x128xf32>
    %609 = arith.divf %607, %608 : vector<2x128xf32>
    %610 = vector.extract_strided_slice %609 {offsets = [0, 0], sizes = [2, 32], strides = [1, 1]} : vector<2x128xf32> to vector<2x32xf32>
    %611 = vector.extract_strided_slice %609 {offsets = [0, 32], sizes = [2, 32], strides = [1, 1]} : vector<2x128xf32> to vector<2x32xf32>
    %612 = vector.extract_strided_slice %609 {offsets = [0, 96], sizes = [2, 32], strides = [1, 1]} : vector<2x128xf32> to vector<2x32xf32>
    %613 = vector.extract_strided_slice %604 {offsets = [0, 64], sizes = [2, 32], strides = [1, 1]} : vector<2x128xf32> to vector<2x32xf32>
    %614 = math.tanh %613 : vector<2x32xf32>
    %615 = arith.mulf %611, %598 : vector<2x32xf32>
    %616 = arith.mulf %610, %614 : vector<2x32xf32>
    %617 = arith.addf %615, %616 : vector<2x32xf32>
    %618 = math.tanh %617 : vector<2x32xf32>
    %619 = arith.mulf %612, %618 : vector<2x32xf32>
    %c2_150 = arith.constant 2 : index
    %c32_151 = arith.constant 32 : index
    %620 = vector.load %arg21[%c2_150, %c32_151] : memref<16x64xf32, #tpu.memory_space<vmem>>, vector<2x32xf32>
    tpu.vector_store %arg21[%c2_150, %c32_151], %619 {strides = array<i32>} : memref<16x64xf32, #tpu.memory_space<vmem>>, vector<2x32xf32>,
    %621 = vector.extract_strided_slice %327 {offsets = [0, 128], sizes = [2, 128], strides = [1, 1]} : vector<16x256xf32> to vector<2x128xf32>
    %cst_152 = arith.constant dense<0.000000e+00> : vector<2x128xf32>
    %622 = tpu.matmul %619, %485, %cst_152 {dimension_numbers = #tpu.dot_dimension_numbers<[1], [0], [0], [1], [0, 0, 1, 1], [], []>} : vector<2x32xf32>, vector<32x128xf32>, vector<2x128xf32> -> vector<2x128xf32>
    %623 = arith.addf %621, %622 : vector<2x128xf32>
    %624 = arith.negf %623 : vector<2x128xf32>
    %625 = math.exp %624 : vector<2x128xf32>
    %cst_153 = arith.constant 1.000000e+00 : f32
    %626 = vector.broadcast %cst_153 : f32 to vector<2x128xf32>
    %627 = arith.addf %626, %625 : vector<2x128xf32>
    %628 = arith.divf %626, %627 : vector<2x128xf32>
    %629 = vector.extract_strided_slice %628 {offsets = [0, 0], sizes = [2, 32], strides = [1, 1]} : vector<2x128xf32> to vector<2x32xf32>
    %630 = vector.extract_strided_slice %628 {offsets = [0, 32], sizes = [2, 32], strides = [1, 1]} : vector<2x128xf32> to vector<2x32xf32>
    %631 = vector.extract_strided_slice %628 {offsets = [0, 96], sizes = [2, 32], strides = [1, 1]} : vector<2x128xf32> to vector<2x32xf32>
    %632 = vector.extract_strided_slice %623 {offsets = [0, 64], sizes = [2, 32], strides = [1, 1]} : vector<2x128xf32> to vector<2x32xf32>
    %633 = math.tanh %632 : vector<2x32xf32>
    %634 = arith.mulf %630, %617 : vector<2x32xf32>
    %635 = arith.mulf %629, %633 : vector<2x32xf32>
    %636 = arith.addf %634, %635 : vector<2x32xf32>
    %637 = math.tanh %636 : vector<2x32xf32>
    %638 = arith.mulf %631, %637 : vector<2x32xf32>
    %c0_154 = arith.constant 0 : index
    %c32_155 = arith.constant 32 : index
    %639 = vector.load %arg21[%c0_154, %c32_155] : memref<16x64xf32, #tpu.memory_space<vmem>>, vector<2x32xf32>
    tpu.vector_store %arg21[%c0_154, %c32_155], %638 {strides = array<i32>} : memref<16x64xf32, #tpu.memory_space<vmem>>, vector<2x32xf32>,
    %c0_156 = arith.constant 0 : index
    %c0_157 = arith.constant 0 : index
    %640 = vector.load %arg21[%c0_156, %c0_157] : memref<16x64xf32, #tpu.memory_space<vmem>>, vector<16x64xf32>
    %c0_158 = arith.constant 0 : index
    %c0_159 = arith.constant 0 : index
    %641 = vector.load %arg11[%c0_158, %c0_159] : memref<64x192xf32, #tpu.memory_space<vmem>>, vector<64x192xf32>
    %cst_160 = arith.constant dense<0.000000e+00> : vector<16x192xf32>
    %642 = tpu.matmul %640, %641, %cst_160 {dimension_numbers = #tpu.dot_dimension_numbers<[1], [0], [0], [1], [0, 0, 1, 1], [], []>} : vector<16x64xf32>, vector<64x192xf32>, vector<16x192xf32> -> vector<16x192xf32>
    %c0_161 = arith.constant 0 : index
    %c0_162 = arith.constant 0 : index
    %643 = vector.load %arg12[%c0_161, %c0_162] : memref<1x192xf32, #tpu.memory_space<vmem>>, vector<1x192xf32>
    %644 = vector.broadcast %643 : vector<1x192xf32> to vector<16x192xf32>
    %645 = arith.addf %642, %644 : vector<16x192xf32>
    %c0_163 = arith.constant 0 : index
    %c0_164 = arith.constant 0 : index
    %646 = vector.load %arg13[%c0_163, %c0_164] : memref<64x64xf32, #tpu.memory_space<vmem>>, vector<64x64xf32>
    %c0_165 = arith.constant 0 : index
    %c0_166 = arith.constant 0 : index
    %647 = vector.load %arg2[%c0_165, %c0_166] : memref<16x16xf32, #tpu.memory_space<vmem>>, vector<16x16xf32>
    %cst_167 = arith.constant 0.000000e+00 : f32
    %648 = vector.broadcast %cst_167 : f32 to vector<16x64xf32>
    %649 = vector.extract_strided_slice %645 {offsets = [0, 0], sizes = [16, 16], strides = [1, 1]} : vector<16x192xf32> to vector<16x16xf32>
    %650 = vector.extract_strided_slice %645 {offsets = [0, 64], sizes = [16, 16], strides = [1, 1]} : vector<16x192xf32> to vector<16x16xf32>
    %651 = vector.extract_strided_slice %645 {offsets = [0, 128], sizes = [16, 16], strides = [1, 1]} : vector<16x192xf32> to vector<16x16xf32>
    %cst_168 = arith.constant dense<0.000000e+00> : vector<16x16xf32>
    %652 = tpu.matmul %649, %650, %cst_168 {dimension_numbers = #tpu.dot_dimension_numbers<[1], [1], [0], [0], [0, 0, 1, 0], [], []>} : vector<16x16xf32>, vector<16x16xf32>, vector<16x16xf32> -> vector<16x16xf32>
    %cst_169 = arith.constant 2.500000e-01 : f32
    %653 = vector.broadcast %cst_169 : f32 to vector<16x16xf32>
    %654 = arith.mulf %652, %653 : vector<16x16xf32>
    %655 = arith.addf %654, %647 : vector<16x16xf32>
    %cst_170 = arith.constant dense<0xFF800000> : vector<16xf32>
    %656 = vector.multi_reduction <maximumf>, %655, %cst_170 [1] : vector<16x16xf32> to vector<16xf32>
    %657 = vector.shape_cast %656 : vector<16xf32> to vector<16x1xf32>
    %658 = vector.broadcast %657 : vector<16x1xf32> to vector<16x16xf32>
    %659 = arith.subf %655, %658 : vector<16x16xf32>
    %660 = math.exp %659 : vector<16x16xf32>
    %cst_171 = arith.constant dense<0.000000e+00> : vector<16xf32>
    %661 = vector.multi_reduction <add>, %660, %cst_171 [1] : vector<16x16xf32> to vector<16xf32>
    %662 = vector.shape_cast %661 : vector<16xf32> to vector<16x1xf32>
    %663 = tpu.reciprocal %662 {approx = true} : vector<16x1xf32> -> vector<16x1xf32>
    %664 = vector.broadcast %663 : vector<16x1xf32> to vector<16x16xf32>
    %665 = arith.mulf %660, %664 : vector<16x16xf32>
    %cst_172 = arith.constant dense<0.000000e+00> : vector<16x16xf32>
    %666 = tpu.matmul %665, %651, %cst_172 {dimension_numbers = #tpu.dot_dimension_numbers<[1], [0], [0], [1], [0, 0, 1, 1], [], []>} : vector<16x16xf32>, vector<16x16xf32>, vector<16x16xf32> -> vector<16x16xf32>
    %667 = vector.extract_strided_slice %646 {offsets = [0, 0], sizes = [16, 64], strides = [1, 1]} : vector<64x64xf32> to vector<16x64xf32>
    %cst_173 = arith.constant dense<0.000000e+00> : vector<16x64xf32>
    %668 = tpu.matmul %666, %667, %cst_173 {dimension_numbers = #tpu.dot_dimension_numbers<[1], [0], [0], [1], [0, 0, 1, 1], [], []>} : vector<16x16xf32>, vector<16x64xf32>, vector<16x64xf32> -> vector<16x64xf32>
    %669 = arith.addf %648, %668 : vector<16x64xf32>
    %670 = vector.extract_strided_slice %645 {offsets = [0, 16], sizes = [16, 16], strides = [1, 1]} : vector<16x192xf32> to vector<16x16xf32>
    %671 = vector.extract_strided_slice %645 {offsets = [0, 80], sizes = [16, 16], strides = [1, 1]} : vector<16x192xf32> to vector<16x16xf32>
    %672 = vector.extract_strided_slice %645 {offsets = [0, 144], sizes = [16, 16], strides = [1, 1]} : vector<16x192xf32> to vector<16x16xf32>
    %cst_174 = arith.constant dense<0.000000e+00> : vector<16x16xf32>
    %673 = tpu.matmul %670, %671, %cst_174 {dimension_numbers = #tpu.dot_dimension_numbers<[1], [1], [0], [0], [0, 0, 1, 0], [], []>} : vector<16x16xf32>, vector<16x16xf32>, vector<16x16xf32> -> vector<16x16xf32>
    %cst_175 = arith.constant 2.500000e-01 : f32
    %674 = vector.broadcast %cst_175 : f32 to vector<16x16xf32>
    %675 = arith.mulf %673, %674 : vector<16x16xf32>
    %676 = arith.addf %675, %647 : vector<16x16xf32>
    %cst_176 = arith.constant dense<0xFF800000> : vector<16xf32>
    %677 = vector.multi_reduction <maximumf>, %676, %cst_176 [1] : vector<16x16xf32> to vector<16xf32>
    %678 = vector.shape_cast %677 : vector<16xf32> to vector<16x1xf32>
    %679 = vector.broadcast %678 : vector<16x1xf32> to vector<16x16xf32>
    %680 = arith.subf %676, %679 : vector<16x16xf32>
    %681 = math.exp %680 : vector<16x16xf32>
    %cst_177 = arith.constant dense<0.000000e+00> : vector<16xf32>
    %682 = vector.multi_reduction <add>, %681, %cst_177 [1] : vector<16x16xf32> to vector<16xf32>
    %683 = vector.shape_cast %682 : vector<16xf32> to vector<16x1xf32>
    %684 = tpu.reciprocal %683 {approx = true} : vector<16x1xf32> -> vector<16x1xf32>
    %685 = vector.broadcast %684 : vector<16x1xf32> to vector<16x16xf32>
    %686 = arith.mulf %681, %685 : vector<16x16xf32>
    %cst_178 = arith.constant dense<0.000000e+00> : vector<16x16xf32>
    %687 = tpu.matmul %686, %672, %cst_178 {dimension_numbers = #tpu.dot_dimension_numbers<[1], [0], [0], [1], [0, 0, 1, 1], [], []>} : vector<16x16xf32>, vector<16x16xf32>, vector<16x16xf32> -> vector<16x16xf32>
    %688 = vector.extract_strided_slice %646 {offsets = [16, 0], sizes = [16, 64], strides = [1, 1]} : vector<64x64xf32> to vector<16x64xf32>
    %cst_179 = arith.constant dense<0.000000e+00> : vector<16x64xf32>
    %689 = tpu.matmul %687, %688, %cst_179 {dimension_numbers = #tpu.dot_dimension_numbers<[1], [0], [0], [1], [0, 0, 1, 1], [], []>} : vector<16x16xf32>, vector<16x64xf32>, vector<16x64xf32> -> vector<16x64xf32>
    %690 = arith.addf %669, %689 : vector<16x64xf32>
    %691 = vector.extract_strided_slice %645 {offsets = [0, 32], sizes = [16, 16], strides = [1, 1]} : vector<16x192xf32> to vector<16x16xf32>
    %692 = vector.extract_strided_slice %645 {offsets = [0, 96], sizes = [16, 16], strides = [1, 1]} : vector<16x192xf32> to vector<16x16xf32>
    %693 = vector.extract_strided_slice %645 {offsets = [0, 160], sizes = [16, 16], strides = [1, 1]} : vector<16x192xf32> to vector<16x16xf32>
    %cst_180 = arith.constant dense<0.000000e+00> : vector<16x16xf32>
    %694 = tpu.matmul %691, %692, %cst_180 {dimension_numbers = #tpu.dot_dimension_numbers<[1], [1], [0], [0], [0, 0, 1, 0], [], []>} : vector<16x16xf32>, vector<16x16xf32>, vector<16x16xf32> -> vector<16x16xf32>
    %cst_181 = arith.constant 2.500000e-01 : f32
    %695 = vector.broadcast %cst_181 : f32 to vector<16x16xf32>
    %696 = arith.mulf %694, %695 : vector<16x16xf32>
    %697 = arith.addf %696, %647 : vector<16x16xf32>
    %cst_182 = arith.constant dense<0xFF800000> : vector<16xf32>
    %698 = vector.multi_reduction <maximumf>, %697, %cst_182 [1] : vector<16x16xf32> to vector<16xf32>
    %699 = vector.shape_cast %698 : vector<16xf32> to vector<16x1xf32>
    %700 = vector.broadcast %699 : vector<16x1xf32> to vector<16x16xf32>
    %701 = arith.subf %697, %700 : vector<16x16xf32>
    %702 = math.exp %701 : vector<16x16xf32>
    %cst_183 = arith.constant dense<0.000000e+00> : vector<16xf32>
    %703 = vector.multi_reduction <add>, %702, %cst_183 [1] : vector<16x16xf32> to vector<16xf32>
    %704 = vector.shape_cast %703 : vector<16xf32> to vector<16x1xf32>
    %705 = tpu.reciprocal %704 {approx = true} : vector<16x1xf32> -> vector<16x1xf32>
    %706 = vector.broadcast %705 : vector<16x1xf32> to vector<16x16xf32>
    %707 = arith.mulf %702, %706 : vector<16x16xf32>
    %cst_184 = arith.constant dense<0.000000e+00> : vector<16x16xf32>
    %708 = tpu.matmul %707, %693, %cst_184 {dimension_numbers = #tpu.dot_dimension_numbers<[1], [0], [0], [1], [0, 0, 1, 1], [], []>} : vector<16x16xf32>, vector<16x16xf32>, vector<16x16xf32> -> vector<16x16xf32>
    %709 = vector.extract_strided_slice %646 {offsets = [32, 0], sizes = [16, 64], strides = [1, 1]} : vector<64x64xf32> to vector<16x64xf32>
    %cst_185 = arith.constant dense<0.000000e+00> : vector<16x64xf32>
    %710 = tpu.matmul %708, %709, %cst_185 {dimension_numbers = #tpu.dot_dimension_numbers<[1], [0], [0], [1], [0, 0, 1, 1], [], []>} : vector<16x16xf32>, vector<16x64xf32>, vector<16x64xf32> -> vector<16x64xf32>
    %711 = arith.addf %690, %710 : vector<16x64xf32>
    %712 = vector.extract_strided_slice %645 {offsets = [0, 48], sizes = [16, 16], strides = [1, 1]} : vector<16x192xf32> to vector<16x16xf32>
    %713 = vector.extract_strided_slice %645 {offsets = [0, 112], sizes = [16, 16], strides = [1, 1]} : vector<16x192xf32> to vector<16x16xf32>
    %714 = vector.extract_strided_slice %645 {offsets = [0, 176], sizes = [16, 16], strides = [1, 1]} : vector<16x192xf32> to vector<16x16xf32>
    %cst_186 = arith.constant dense<0.000000e+00> : vector<16x16xf32>
    %715 = tpu.matmul %712, %713, %cst_186 {dimension_numbers = #tpu.dot_dimension_numbers<[1], [1], [0], [0], [0, 0, 1, 0], [], []>} : vector<16x16xf32>, vector<16x16xf32>, vector<16x16xf32> -> vector<16x16xf32>
    %cst_187 = arith.constant 2.500000e-01 : f32
    %716 = vector.broadcast %cst_187 : f32 to vector<16x16xf32>
    %717 = arith.mulf %715, %716 : vector<16x16xf32>
    %718 = arith.addf %717, %647 : vector<16x16xf32>
    %cst_188 = arith.constant dense<0xFF800000> : vector<16xf32>
    %719 = vector.multi_reduction <maximumf>, %718, %cst_188 [1] : vector<16x16xf32> to vector<16xf32>
    %720 = vector.shape_cast %719 : vector<16xf32> to vector<16x1xf32>
    %721 = vector.broadcast %720 : vector<16x1xf32> to vector<16x16xf32>
    %722 = arith.subf %718, %721 : vector<16x16xf32>
    %723 = math.exp %722 : vector<16x16xf32>
    %cst_189 = arith.constant dense<0.000000e+00> : vector<16xf32>
    %724 = vector.multi_reduction <add>, %723, %cst_189 [1] : vector<16x16xf32> to vector<16xf32>
    %725 = vector.shape_cast %724 : vector<16xf32> to vector<16x1xf32>
    %726 = tpu.reciprocal %725 {approx = true} : vector<16x1xf32> -> vector<16x1xf32>
    %727 = vector.broadcast %726 : vector<16x1xf32> to vector<16x16xf32>
    %728 = arith.mulf %723, %727 : vector<16x16xf32>
    %cst_190 = arith.constant dense<0.000000e+00> : vector<16x16xf32>
    %729 = tpu.matmul %728, %714, %cst_190 {dimension_numbers = #tpu.dot_dimension_numbers<[1], [0], [0], [1], [0, 0, 1, 1], [], []>} : vector<16x16xf32>, vector<16x16xf32>, vector<16x16xf32> -> vector<16x16xf32>
    %730 = vector.extract_strided_slice %646 {offsets = [48, 0], sizes = [16, 64], strides = [1, 1]} : vector<64x64xf32> to vector<16x64xf32>
    %cst_191 = arith.constant dense<0.000000e+00> : vector<16x64xf32>
    %731 = tpu.matmul %729, %730, %cst_191 {dimension_numbers = #tpu.dot_dimension_numbers<[1], [0], [0], [1], [0, 0, 1, 1], [], []>} : vector<16x16xf32>, vector<16x64xf32>, vector<16x64xf32> -> vector<16x64xf32>
    %732 = arith.addf %711, %731 : vector<16x64xf32>
    %c0_192 = arith.constant 0 : index
    %c0_193 = arith.constant 0 : index
    %733 = vector.load %arg14[%c0_192, %c0_193] : memref<1x64xf32, #tpu.memory_space<vmem>>, vector<1x64xf32>
    %734 = vector.broadcast %733 : vector<1x64xf32> to vector<16x64xf32>
    %735 = arith.addf %732, %734 : vector<16x64xf32>
    %736 = arith.addf %735, %640 : vector<16x64xf32>
    %c0_194 = arith.constant 0 : index
    %c0_195 = arith.constant 0 : index
    %737 = vector.load %arg3[%c0_194, %c0_195] : memref<2x16xf32, #tpu.memory_space<vmem>>, vector<2x16xf32>
    %cst_196 = arith.constant dense<0.000000e+00> : vector<2x64xf32>
    %738 = tpu.matmul %737, %736, %cst_196 {dimension_numbers = #tpu.dot_dimension_numbers<[1], [0], [0], [1], [0, 0, 1, 1], [], []>} : vector<2x16xf32>, vector<16x64xf32>, vector<2x64xf32> -> vector<2x64xf32>
    %c0_197 = arith.constant 0 : index
    %c0_198 = arith.constant 0 : index
    %739 = vector.load %arg15[%c0_197, %c0_198] : memref<64x32xf32, #tpu.memory_space<vmem>>, vector<64x32xf32>
    %cst_199 = arith.constant dense<0.000000e+00> : vector<2x32xf32>
    %740 = tpu.matmul %738, %739, %cst_199 {dimension_numbers = #tpu.dot_dimension_numbers<[1], [0], [0], [1], [0, 0, 1, 1], [], []>} : vector<2x64xf32>, vector<64x32xf32>, vector<2x32xf32> -> vector<2x32xf32>
    %c0_200 = arith.constant 0 : index
    %c0_201 = arith.constant 0 : index
    %741 = vector.load %arg16[%c0_200, %c0_201] : memref<1x32xf32, #tpu.memory_space<vmem>>, vector<1x32xf32>
    %742 = vector.broadcast %741 : vector<1x32xf32> to vector<2x32xf32>
    %743 = arith.addf %740, %742 : vector<2x32xf32>
    %cst_202 = arith.constant 0.000000e+00 : f32
    %744 = vector.broadcast %cst_202 : f32 to vector<2x32xf32>
    %745 = arith.maximumf %743, %744 : vector<2x32xf32>
    %c0_203 = arith.constant 0 : index
    %c0_204 = arith.constant 0 : index
    %746 = vector.load %arg17[%c0_203, %c0_204] : memref<32x128xf32, #tpu.memory_space<vmem>>, vector<32x128xf32>
    %cst_205 = arith.constant dense<0.000000e+00> : vector<2x128xf32>
    %747 = tpu.matmul %745, %746, %cst_205 {dimension_numbers = #tpu.dot_dimension_numbers<[1], [0], [0], [1], [0, 0, 1, 1], [], []>} : vector<2x32xf32>, vector<32x128xf32>, vector<2x128xf32> -> vector<2x128xf32>
    %c0_206 = arith.constant 0 : index
    %c0_207 = arith.constant 0 : index
    %748 = vector.load %arg18[%c0_206, %c0_207] : memref<1x128xf32, #tpu.memory_space<vmem>>, vector<1x128xf32>
    %749 = vector.broadcast %748 : vector<1x128xf32> to vector<2x128xf32>
    %750 = arith.addf %747, %749 : vector<2x128xf32>
    %c0_208 = arith.constant 0 : index
    %c0_209 = arith.constant 0 : index
    %751 = vector.load %arg19[%c0_208, %c0_209] : memref<2x128xf32, #tpu.memory_space<vmem>>, vector<2x128xf32>
    tpu.vector_store %arg19[%c0_208, %c0_209], %750 {strides = array<i32>} : memref<2x128xf32, #tpu.memory_space<vmem>>, vector<2x128xf32>,
    return
  }
}

</mosaic_0001>

<bundles_post_ra>
// kernel: forward.1
= control target key start
LH: loop header
LB: loop body
LE: loop exit
PB: predicated region body
PF: predicated region fallthrough
CT: control target
= control target key end

     0   :  { %s8460_s0 = inlined_call_operand.vmem [shape: f32[16,24], index: 0, kind: input, shape index: {}]   ;;  %s8461_s1 = inlined_call_operand.vmem [shape: f32[16,8], index: 1, kind: input, shape index: {}]   ;;  %s8462_s2 = inlined_call_operand.vmem [shape: f32[16,16], index: 2, kind: input, shape index: {}]   ;;  %s8463_s3 = inlined_call_operand.vmem [shape: f32[2,16], index: 3, kind: input, shape index: {}]   ;;  %s8464_s4 = inlined_call_operand.vmem [shape: f32[24,256], index: 4, kind: input, shape index: {}]   ;;  %s8465_s5 = inlined_call_operand.hbm [shape: f32[8,256], index: 5, kind: input, shape index: {}]   ;;  %s8466_s6 = inlined_call_operand.hbm [shape: f32[1,256], index: 6, kind: input, shape index: {}]   ;;  %s8467_s7 = inlined_call_operand.vmem [shape: f32[2,32,128], index: 7, kind: input, shape index: {}]   ;;  %s8468_s8 = inlined_call_operand.vmem [shape: f32[64,256], index: 8, kind: input, shape index: {}]   ;;  %s8469_s9 = inlined_call_operand.hbm [shape: f32[1,256], index: 9, kind: input, shape index: {}]   ;;  %s8470_s10 = inlined_call_operand.hbm [shape: f32[2,32,128], index: 10, kind: input, shape index: {}]   ;;  %s8471_s11 = inlined_call_operand.hbm [shape: f32[64,192], index: 11, kind: input, shape index: {}]   ;;  %s8472_s12 = inlined_call_operand.hbm [shape: f32[1,192], index: 12, kind: input, shape index: {}]   ;;  %s8473_s13 = inlined_call_operand.hbm [shape: f32[64,64], index: 13, kind: input, shape index: {}]   ;;  %s8474_s14 = inlined_call_operand.vmem [shape: f32[1,64], index: 14, kind: input, shape index: {}]   ;;  %s8475_s15 = inlined_call_operand.vmem [shape: f32[64,32], index: 15, kind: input, shape index: {}]   ;;  %s8476_s16 = inlined_call_operand.hbm [shape: f32[1,32], index: 16, kind: input, shape index: {}]   ;;  %s8477_s17 = inlined_call_operand.hbm [shape: f32[32,128], index: 17, kind: input, shape index: {}]   ;;  %s8478_s18 = inlined_call_operand.hbm [shape: f32[1,128], index: 18, kind: input, shape index: {}]   ;;  %s8479_s19 = inlined_call_operand.hbm [shape: f32[2,128], index: 19, kind: output, shape index: {}]  }
   0x1   :  { %8483 = sst [smem:[#allocation29_spill]] %s8460_s0 }
   0x2   :  { %8484 = sst [smem:[#allocation30_spill]] %s8461_s1 }
   0x3   :  { %8485 = sst [smem:[#allocation31_spill]] %s8462_s2 }
   0x4   :  { %8486 = sst [smem:[#allocation32_spill]] %s8463_s3 }
   0x5   :  { %24 = vsyncpa [#allocation5], 0 }
   0x6   :  { %25 = vsyncpa [#allocation8], 0 }
   0x7   :  { %26 = vsyncpa [#allocation11], 0 }
   0x8   :  { %27 = vsyncpa [#allocation14], 0 }
   0x9   :  { %28 = vsyncpa [#allocation17], 0 }
   0xa   :  { %29 = vsyncpa [#allocation20], 0 }
   0xb   :  { %30 = vsyncpa [#allocation6], 0  ;;  %s7276_s0 = smov [#allocation7]   ;;  %s7277_s20 = smov [#allocation10]  }
   0xc   :  { %s57_s30 = sshll.u32 %s7276_s0, 4  ;;  %s80_s21 = sshll.u32 %s7277_s20, 4  ;;  %s58_s30 = int_to_ptr.vmem [resolvable:$true] %s57_s30  ;;  %s7400_s21 = int_to_ptr.vmem [resolvable:$true] %s80_s21 }
   0xd   :  { %s7020_s2 = scalar_lea.hbm %s8466_s6, 32 }
   0xe   :  { %p7021_p0 = scmp.ne.s32.totalorder %s8466_s6, %s7020_s2  ;;  %p7024_p1 = scmp.lt.u32.totalorder %s7020_s2, %s8466_s6 }
  0x10   :  { %p7026_p2 = pnand %p7024_p1, %p7021_p0 }
  0x12   :  { %7029 = shalt.err (!%p7026_p2)
}
  0x13   :  { %s7030_s26 = scalar_lea.vmem %s58_s30, 32  ;;  %p7035_p4 = scmp.lt.s32.totalorder %s58_s30, %s58_s30 }
  0x14   :  { %p7031_p3 = scmp.ne.s32.totalorder %s58_s30, %s7030_s26  ;;  %p7036_p5 = scmp.lt.s32.totalorder %s7030_s26, %s7030_s26 }
  0x16   :  { %p7037_p6 = por %p7036_p5, %p7035_p4 }
  0x18   :  { %p7038_p7 = pnand %p7037_p6, %p7031_p3 }
  0x1a   :  { %7041 = shalt.err (!%p7038_p7)
}
  0x1b   :  { %60 = dma.hbm_to_vmem [thread:$0]  %s8466_s6, 32, %s58_s30, [#allocation8]  }
  0x1c   :  { %s7042_s20 = scalar_lea.hbm %s8470_s10, 1024 }
  0x1d   :  { %p7043_p8 = scmp.ne.s32.totalorder %s8470_s10, %s7042_s20  ;;  %p7046_p9 = scmp.lt.u32.totalorder %s7042_s20, %s8470_s10 }
  0x1f   :  { %p7048_p10 = pnand %p7046_p9, %p7043_p8 }
  0x21   :  { %7051 = shalt.err (!%p7048_p10)
}
  0x22   :  { %s7052_s24 = scalar_lea.vmem %s7400_s21, 1024  ;;  %p7057_p12 = scmp.lt.s32.totalorder %s7400_s21, %s7400_s21 }
  0x23   :  { %p7053_p11 = scmp.ne.s32.totalorder %s7400_s21, %s7052_s24  ;;  %p7058_p13 = scmp.lt.s32.totalorder %s7052_s24, %s7052_s24 }
  0x25   :  { %p7059_p0 = por %p7058_p13, %p7057_p12 }
  0x27   :  { %p7060_p1 = pnand %p7059_p0, %p7053_p11 }
  0x29   :  { %7063 = shalt.err (!%p7060_p1)
}
  0x2a   :  { %s7278_s6 = smov 128   ;;  %s7279_s30 = smov 8  }
  0x2b   :  { %86 = dma.hbm_to_vmem [thread:$0]  %s8470_s10, 1024, %s7400_s21, [#allocation11], %s7278_s6, %s7278_s6, %s7279_s30  }
  0x2c   :  { %s7280_s26 = smov [#allocation13]   ;;  %s7281_s28 = smov [#allocation16]  }
  0x2d   :  { %s105_s27 = sshll.u32 %s7280_s26, 4  ;;  %s131_s29 = sshll.u32 %s7281_s28, 4  ;;  %s106_s27 = int_to_ptr.vmem [resolvable:$true] %s105_s27  ;;  %s132_s29 = int_to_ptr.vmem [resolvable:$true] %s131_s29 }
  0x2e   :  { %s7064_s1 = scalar_lea.hbm %s8472_s12, 32 }
  0x2f   :  { %p7065_p2 = scmp.ne.s32.totalorder %s8472_s12, %s7064_s1  ;;  %p7068_p3 = scmp.lt.u32.totalorder %s7064_s1, %s8472_s12 }
  0x31   :  { %p7070_p4 = pnand %p7068_p3, %p7065_p2 }
  0x33   :  { %7073 = shalt.err (!%p7070_p4)
}
  0x34   :  { %s7074_s10 = scalar_lea.vmem %s106_s27, 32  ;;  %p7079_p6 = scmp.lt.s32.totalorder %s106_s27, %s106_s27 }
  0x35   :  { %p7075_p5 = scmp.ne.s32.totalorder %s106_s27, %s7074_s10  ;;  %p7080_p7 = scmp.lt.s32.totalorder %s7074_s10, %s7074_s10 }
  0x37   :  { %p7081_p8 = por %p7080_p7, %p7079_p6 }
  0x39   :  { %p7082_p9 = pnand %p7081_p8, %p7075_p5 }
  0x3b   :  { %7085 = shalt.err (!%p7082_p9)
}
  0x3c   :  { %108 = dma.hbm_to_vmem [thread:$0]  %s8472_s12, 32, %s106_s27, [#allocation14]  }
  0x3d   :  { %s7086_s28 = scalar_lea.hbm %s8476_s16, 16 }
  0x3e   :  { %p7087_p10 = scmp.ne.s32.totalorder %s8476_s16, %s7086_s28  ;;  %p7090_p11 = scmp.lt.u32.totalorder %s7086_s28, %s8476_s16 }
  0x40   :  { %p7092_p12 = pnand %p7090_p11, %p7087_p10 }
  0x42   :  { %7095 = shalt.err (!%p7092_p12)
}
  0x43   :  { %s7096_s2 = scalar_lea.vmem %s132_s29, 16  ;;  %s7100_s23 = scalar_lea.vmem %s132_s29, 32 }
  0x44   :  { %p7097_p13 = scmp.ne.s32.totalorder %s132_s29, %s7096_s2  ;;  %p7101_p0 = scmp.lt.s32.totalorder %s132_s29, %s132_s29 }
  0x45   :  { %p7102_p1 = scmp.lt.s32.totalorder %s7100_s23, %s7096_s2 }
  0x47   :  { %p7103_p2 = por %p7102_p1, %p7101_p0 }
  0x49   :  { %p7104_p3 = pnand %p7103_p2, %p7097_p13 }
  0x4b   :  { %7107 = shalt.err (!%p7104_p3)
}
  0x4c   :  { %134 = dma.hbm_to_vmem [thread:$0]  %s8476_s16, 16, %s132_s29, [#allocation17]  }
  0x4d   :  { %s7282_s24 = smov [#allocation4]   ;;  %s7283_s21 = smov [#allocation9]  }
  0x4e   :  { %s47_s10 = sshll.u32 %s7282_s24, 4  ;;  %s71_s25 = sshll.u32 %s7283_s21, 4  ;;  %s48_s10 = int_to_ptr.vmem [resolvable:$true] %s47_s10  ;;  %s72_s25 = int_to_ptr.vmem [resolvable:$true] %s71_s25 }
  0x4f   :  { %s7108_s28 = scalar_lea.hbm %s8465_s5, 256 }
  0x50   :  { %p7109_p4 = scmp.ne.s32.totalorder %s8465_s5, %s7108_s28  ;;  %p7112_p5 = scmp.lt.u32.totalorder %s7108_s28, %s8465_s5 }
  0x52   :  { %p7114_p6 = pnand %p7112_p5, %p7109_p4 }
  0x54   :  { %7117 = shalt.err (!%p7114_p6)
}
  0x55   :  { %s7118_s16 = scalar_lea.vmem %s48_s10, 256  ;;  %p7123_p8 = scmp.lt.s32.totalorder %s48_s10, %s48_s10 }
  0x56   :  { %p7119_p7 = scmp.ne.s32.totalorder %s48_s10, %s7118_s16  ;;  %p7124_p9 = scmp.lt.s32.totalorder %s7118_s16, %s7118_s16 }
  0x58   :  { %p7125_p10 = por %p7124_p9, %p7123_p8 }
  0x5a   :  { %p7126_p11 = pnand %p7125_p10, %p7119_p7 }
  0x5c   :  { %7129 = shalt.err (!%p7126_p11)
}
  0x5d   :  { %50 = dma.hbm_to_vmem [thread:$0]  %s8465_s5, 256, %s48_s10, [#allocation5]  }
  0x5e   :  { %s7130_s27 = scalar_lea.hbm %s8469_s9, 32 }
  0x5f   :  { %p7131_p12 = scmp.ne.s32.totalorder %s8469_s9, %s7130_s27  ;;  %p7134_p13 = scmp.lt.u32.totalorder %s7130_s27, %s8469_s9 }
  0x61   :  { %p7136_p0 = pnand %p7134_p13, %p7131_p12 }
  0x63   :  { %7139 = shalt.err (!%p7136_p0)
}
  0x64   :  { %s7140_s28 = scalar_lea.vmem %s72_s25, 32  ;;  %p7145_p2 = scmp.lt.s32.totalorder %s72_s25, %s72_s25 }
  0x65   :  { %p7141_p1 = scmp.ne.s32.totalorder %s72_s25, %s7140_s28  ;;  %p7146_p3 = scmp.lt.s32.totalorder %s7140_s28, %s7140_s28 }
  0x67   :  { %p7147_p4 = por %p7146_p3, %p7145_p2 }
  0x69   :  { %p7148_p5 = pnand %p7147_p4, %p7141_p1 }
  0x6b   :  { %7151 = shalt.err (!%p7148_p5)
}
  0x6c   :  { %74 = dma.hbm_to_vmem [thread:$0]  %s8469_s9, 32, %s72_s25, [#allocation8]  }
  0x6d   :  { %s7284_s0 = smov [#allocation12]   ;;  %s7152_s16 = scalar_lea.hbm %s8471_s11, 2048 }
  0x6e   :  { %s92_s20 = sshll.u32 %s7284_s0, 4  ;;  %p7153_p6 = scmp.ne.s32.totalorder %s8471_s11, %s7152_s16  ;;  %s93_s20 = int_to_ptr.vmem [resolvable:$true] %s92_s20 }
  0x6f   :  { %p7156_p7 = scmp.lt.u32.totalorder %s7152_s16, %s8471_s11 }
  0x71   :  { %p7158_p8 = pnand %p7156_p7, %p7153_p6 }
  0x73   :  { %7161 = shalt.err (!%p7158_p8)
}
  0x74   :  { %s7162_s27 = scalar_lea.vmem %s93_s20, 2048  ;;  %p7167_p10 = scmp.lt.s32.totalorder %s93_s20, %s93_s20 }
  0x75   :  { %p7163_p9 = scmp.ne.s32.totalorder %s93_s20, %s7162_s27  ;;  %p7168_p11 = scmp.lt.s32.totalorder %s7162_s27, %s7162_s27 }
  0x77   :  { %p7169_p12 = por %p7168_p11, %p7167_p10 }
  0x79   :  { %p7170_p13 = pnand %p7169_p12, %p7163_p9 }
  0x7b   :  { %7173 = shalt.err (!%p7170_p13)
}
  0x7c   :  { %s7285_s9 = smov 256   ;;  %s7286_s25 = smov 16  }
  0x7d   :  { %98 = dma.hbm_to_vmem [thread:$0]  %s8471_s11, 2048, %s93_s20, [#allocation11], %s7285_s9, %s7285_s9, %s7286_s25  }
  0x7e   :  { %s7287_s3 = smov [#allocation15]   ;;  %s7288_s28 = smov [#allocation18]  }
  0x7f   :  { %s114_s26 = sshll.u32 %s7287_s3, 4  ;;  %s140_s5 = sshll.u32 %s7288_s28, 4  ;;  %s115_s26 = int_to_ptr.vmem [resolvable:$true] %s114_s26  ;;  %s141_s5 = int_to_ptr.vmem [resolvable:$true] %s140_s5 }
  0x80   :  { %s7174_s1 = scalar_lea.hbm %s8473_s13, 1024 }
  0x81   :  { %p7175_p0 = scmp.ne.s32.totalorder %s8473_s13, %s7174_s1  ;;  %p7178_p1 = scmp.lt.u32.totalorder %s7174_s1, %s8473_s13 }
  0x83   :  { %p7180_p2 = pnand %p7178_p1, %p7175_p0 }
  0x85   :  { %7183 = shalt.err (!%p7180_p2)
}
  0x86   :  { %s7184_s11 = scalar_lea.vmem %s115_s26, 1024  ;;  %p7189_p4 = scmp.lt.s32.totalorder %s115_s26, %s115_s26 }
  0x87   :  { %p7185_p3 = scmp.ne.s32.totalorder %s115_s26, %s7184_s11  ;;  %p7190_p5 = scmp.lt.s32.totalorder %s7184_s11, %s7184_s11 }
  0x89   :  { %p7191_p6 = por %p7190_p5, %p7189_p4 }
  0x8b   :  { %p7192_p7 = pnand %p7191_p6, %p7185_p3 }
  0x8d   :  { %7195 = shalt.err (!%p7192_p7)
}
  0x8e   :  { %120 = dma.hbm_to_vmem [thread:$0]  %s8473_s13, 1024, %s115_s26, [#allocation14], %s7278_s6, %s7278_s6, %s7279_s30  }
  0x8f   :  { %s7196_s9 = scalar_lea.hbm %s8477_s17, 512 }
  0x90   :  { %p7197_p8 = scmp.ne.s32.totalorder %s8477_s17, %s7196_s9  ;;  %p7200_p9 = scmp.lt.u32.totalorder %s7196_s9, %s8477_s17 }
  0x92   :  { %p7202_p10 = pnand %p7200_p9, %p7197_p8 }
  0x94   :  { %7205 = shalt.err (!%p7202_p10)
}
  0x95   :  { %s7206_s10 = scalar_lea.vmem %s141_s5, 512  ;;  %p7211_p12 = scmp.lt.s32.totalorder %s141_s5, %s141_s5 }
  0x96   :  { %p7207_p11 = scmp.ne.s32.totalorder %s141_s5, %s7206_s10  ;;  %p7212_p13 = scmp.lt.s32.totalorder %s7206_s10, %s7206_s10 }
  0x98   :  { %p7213_p0 = por %p7212_p13, %p7211_p12 }
  0x9a   :  { %p7214_p1 = pnand %p7213_p0, %p7207_p11 }
  0x9c   :  { %7217 = shalt.err (!%p7214_p1)
}
  0x9d   :  { %146 = dma.hbm_to_vmem [thread:$0]  %s8477_s17, 512, %s141_s5, [#allocation17], %s7278_s6, %s7278_s6, %s7279_s30  }
  0x9e   :  { %s7289_s0 = smov [#allocation19]   ;;  %s7218_s29 = scalar_lea.hbm %s8478_s18, 16 }
  0x9f   :  { %s153_s1 = sshll.u32 %s7289_s0, 4  ;;  %p7219_p2 = scmp.ne.s32.totalorder %s8478_s18, %s7218_s29  ;;  %s154_s1 = int_to_ptr.vmem [resolvable:$true] %s153_s1 }
  0xa0   :  { %p7222_p3 = scmp.lt.u32.totalorder %s7218_s29, %s8478_s18 }
  0xa2   :  { %p7224_p4 = pnand %p7222_p3, %p7219_p2 }
  0xa4   :  { %7227 = shalt.err (!%p7224_p4)
}
  0xa5   :  { %s7228_s12 = scalar_lea.vmem %s154_s1, 16  ;;  %s7232_s17 = scalar_lea.vmem %s154_s1, 32 }
  0xa6   :  { %p7229_p5 = scmp.ne.s32.totalorder %s154_s1, %s7228_s12  ;;  %p7233_p6 = scmp.lt.s32.totalorder %s154_s1, %s154_s1 }
  0xa7   :  { %p7234_p7 = scmp.lt.s32.totalorder %s7232_s17, %s7228_s12 }
  0xa9   :  { %p7235_p8 = por %p7234_p7, %p7233_p6 }
  0xab   :  { %p7236_p9 = pnand %p7235_p8, %p7229_p5 }
  0xad   :  { %7239 = shalt.err (!%p7236_p9)
}
  0xae   :  { %156 = dma.hbm_to_vmem [thread:$0]  %s8478_s18, 16, %s154_s1, [#allocation20]  }
  0xaf   :  { %7262 = dma.done.wait [#allocation5], 256  }
  0xb0   :  { %7263 = vsyncadd [#allocation5], 4294967040 }
  0xb1   :  { %7264 = dma.done.wait [#allocation8], 64  }
  0xb2   :  { %7265 = vsyncadd [#allocation8], 4294967232 }
  0xb3   :  { %7266 = dma.done.wait [#allocation11], 3072  }
  0xb4   :  { %7267 = vsyncadd [#allocation11], 4294964224 }
  0xb5   :  { %7268 = dma.done.wait [#allocation14], 1056  }
  0xb6   :  { %7269 = vsyncadd [#allocation14], 4294966240 }
  0xb7   :  { %7270 = dma.done.wait [#allocation17], 528  }
  0xb8   :  { %7271 = vsyncadd [#allocation17], 4294966768 }
  0xb9   :  { %7272 = dma.done.wait [#allocation20], 16  }
  0xba   :  { %7273 = vsyncadd [#allocation20], 4294967280  ;;  %v7290_v0 = vmov 0.0   ;;  %v198_v1 = vld [vmem:[#allocation4 + $0x8] sm:$0xff]  ;;  %v197_v2 = vld [vmem:[#allocation4] sm:$0xff]  ;;  %vm199_vm0 = vcmask 64512   ;;  %v369_v22 = vlaneseq }
  0xbb   :  { %270 = vmatprep.mubr.f32.mxu1 %v7290_v0  ;;  %354 = vmatprep.mubr.f32.mxu0 %v7290_v0  ;;  %v190_v3 = vld [vmem:[%s8464_s4 + $0x8] sm:$0xff]  ;;  %v192_v4 = vld [vmem:[%s8464_s4 + $0x18] sm:$0xff]  ;;  %s8487_s3 = sld [smem:[#allocation30_spill]]  ;;  %v189_v6 = vld [vmem:[%s8464_s4] sm:$0xff]  ;;  %v7291_v12 = vmov 0.0|0.0   ;;  %s8488_s9 = sld [smem:[#allocation29_spill]] }
  0xbc   :  { %206 = vmatprep.subr.mxu1 %v198_v1  ;;  %v6358_v7 = vpack.c.bf16 %v192_v4, %v190_v3  ;;  %v191_v8 = vld [vmem:[%s8464_s4 + $0x10] sm:$0xff]  ;;  %v383_v9 = vld [vmem:[%s8467_s7] sm:$0xff]  ;;  %v384_v10 = vld [vmem:[%s8467_s7 + $0x8] sm:$0xff]  ;;  %vm283_vm1 = vcmask 195584   ;;  %vm7292_vm2 = vmmov 0   ;;  %v370_v23 = vshrl.u32 %v369_v22, 7 }
  0xbd   :  { %207 = vmatpush1.msra.mxu1 %v197_v2  ;;  %v6360_v11 = vpack.c.bf16 %v191_v8, %v189_v6  ;;  %v7562_v13 = vpack.c.bf16 %v384_v10, %v383_v9  ;;  %v194_v14 = vld [vmem:[%s8464_s4 + $0x28] sm:$0xff]  ;;  %v385_v16 = vld [vmem:[%s8467_s7 + $0x10] sm:$0xff]  ;;  %v386_v17 = vld [vmem:[%s8467_s7 + $0x18] sm:$0xff]  ;;  %s7293_s21 = smov 64   ;;  %vm490_vm3 = vcmask 254976   ;;  %vm387_vm4 = vcmask 261120  }
  0xbe   :  { %6362 = vmatprep.subr.bf16.mxu1 %v7291_v12  ;;  %6359 = vmatprep.subr.bf16.mxu0 %v6358_v7  ;;  %v7578_v18 = vpack.c.bf16 %v386_v17, %v385_v16  ;;  %v193_v19 = vld [vmem:[%s8464_s4 + $0x20] sm:$0xff]  ;;  %v7610_v26 = vsub.s32 0, %v370_v23  ;;  %v367_v27 = vld [vmem:[#allocation7] sm:$0x3]  ;;  %v7612_v28 = vsub.s32 1, %v370_v23  ;;  %vm599_vm5 = vcmask 257026  }
  0xbf   :  { %6361 = vmatpush1.bf16.msra.mxu0 %v6360_v11  ;;  %vm823_vm6 = vcmask 261126   ;;  %vm711_vm7 = vcmask 259076   ;;  %vm1482_vm8 = vcmask 521476   ;;  %vm1370_vm9 = vcmask 523526   ;;  %s7296_s6 = smov 112   ;;  %s7297_s30 = smov 96  }
  0xc0   :  { %294 = vmatprep.subr.mxu0 %v194_v14  ;;  %v372_v31 = vrot.slane %v367_v27, %v7610_v26  ;;  %v376_v33 = vrot.slane %v367_v27, %v7612_v28  ;;  %vm1594_vm10 = vcmask 519426   ;;  %vm1703_vm11 = vcmask 517376   ;;  %s8491_s18 = sld [smem:[#allocation31_spill]]  ;;  %s8492_s0 = sld [smem:[#allocation32_spill]] }
  0xc1   :  { %v195_v5 = vld [vmem:[%s8487_s3] sm:$0xff]  ;;  %v196_v15 = vld [vmem:[%s8487_s3 + $0x8] sm:$0xff]  ;;  %s7294_s3 = smov 32   ;;  %vm2175_vm12 = vcmask 523264   ;;  %vm4138_vm13 = vcmask 130048  }
  0xc2   :  { %5550 = vmatmul.mubr.msk.f32.vlgmr.msra.gmra.mrb[0].mxu1 %vm199_vm0, %v195_v5  ;;  %v187_v20 = vld [vmem:[%s8488_s9] sm:$0xff]  ;;  %v188_v21 = vld [vmem:[%s8488_s9 + $0x8] sm:$0xff]  ;;  %vm8310_vm14 = vmpackc.low %vm4138_vm13, %vm4138_vm13  ;;  %s7298_s9 = smov 80  }
  0xc3   :  { %276 = vmatprep.mubr.f32.mxu1 %v7290_v0  ;;  %6364 = vmatpush3.bf16.msra.mxu1 %v7562_v13 }
  0xc4   :  { %6365 = vmatprep.subr.bf16.mxu1 %v7291_v12  ;;  %295 = vmatpush1.msra.mxu0 %v193_v19 }
  0xc5   :  { %5552 = vmatmul.mubr.msk.f32.vlgmr.msra.gmra.mrb[0].mxu0 %vm283_vm1, %v187_v20  ;;  %6374 = vmatprep.subr.bf16.mxu0 %v7291_v12 }
  0xc6   :  { %5551 = vmatmul.mubr.msk.f32.gmra.mrb[2].mxu1 %vm199_vm0, %v196_v15  ;;  %360 = vmatprep.mubr.f32.mxu0 %v7290_v0 }
  0xc7   :  { %5893 = vmatprep.mubr.msk.f32.mxu1 %vm7292_vm2, %v7290_v0  ;;  %6367 = vmatpush3.bf16.msra.mxu1 %v7578_v18 }
  0xc8   :  { %6368 = vmatprep.subr.bf16.mxu1 %v7291_v12  ;;  %6376 = vmatpush3.bf16.msra.mxu0 %v7562_v13 }
  0xc9   :  { %5553 = vmatmul.mubr.msk.f32.gmra.mrb[2].mxu0 %vm283_vm1, %v188_v21  ;;  %6377 = vmatprep.subr.bf16.mxu0 %v7291_v12 }
  0xca   :  { %5894 = vmatmul.mubr.f32.vlgmr.msra.gmra.mrb[4].mxu1 %v7290_v0  ;;  %5915 = vmatprep.mubr.msk.f32.mxu0 %vm7292_vm2, %v7290_v0 }
  0xcb   :  { %6370 = vmatpush3.bf16.msra.mxu1 %v7562_v13  ;;  %5904 = vmatprep.mubr.msk.f32.mxu1 %vm7292_vm2, %v7290_v0 }
  0xcc   :  { %6371 = vmatprep.subr.bf16.mxu1 %v7291_v12  ;;  %6379 = vmatpush3.bf16.msra.mxu0 %v7578_v18 }
  0xcd   :  { %6386 = vmatprep.subr.bf16.mxu0 %v7291_v12 }
  0xcf   :  { %6373 = vmatpush3.bf16.msra.mxu1 %v7578_v18 }
  0xd0   :  { %6380 = vmatprep.subr.bf16.mxu1 %v7291_v12 }
 0x195   :  { %v272_v24 = vpop.f32.mrb[0].mxu1 }
 0x196   :  { %v274_v25 = vpop.f32.mrb[1].mxu1 }
 0x198   :  { %v356_v32 = vpop.f32.mrb[0].mxu0 }
 0x199   :  { %v278_v29 = vpop.f32.mrb[2].mxu1  ;;  %v357_v34 = vadd.f32 %v356_v32, %v272_v24  ;;  %v358_v35 = vpop.f32.mrb[1].mxu0 }
 0x19a   :  { %v280_v30 = vpop.f32.mrb[3].mxu1  ;;  %v359_v36 = vadd.f32 %v358_v35, %v274_v25 }
 0x19b   :  { %v7616_v38 = vadd.f32 %v372_v31, %v357_v34 }
 0x19c   :  { %v7618_v40 = vadd.f32 %v376_v33, %v359_v36  ;;  %v362_v41 = vpop.f32.mrb[2].mxu0 }
 0x19d   :  { %v457_v37 = vpop.f32.mrb[4].mxu1  ;;  %v363_v43 = vadd.f32 %v362_v41, %v278_v29  ;;  %v364_v44 = vpop.f32.mrb[3].mxu0 }
 0x19e   :  { %v5895_v39 = vpop.f32.mrb[5].mxu1  ;;  %v461_v42 = vadd.f32 %v457_v37, %v7616_v38  ;;  %v365_v45 = vadd.f32 %v364_v44, %v280_v30 }
 0x19f   :  { %v7621_v46 = vadd.f32 %v372_v31, %v363_v43 }
 0x1a0   :  { %6732 = vtanh.f32 %v461_v42  ;;  %v7623_v47 = vadd.f32 %v376_v33, %v365_v45  ;;  %v5554_v49 = vmul.f32 -1.442695, %v461_v42 }
 0x1a2   :  { %6734 = vpow2.f32 %v5554_v49 }
 0x1aa   :  { %v6733_v48 = vpop.eup %6732 }
 0x1ab   :  { %471 = vrot.lane.b32.xlu0 %v6733_v48, %s7293_s21 }
 0x1ac   :  { %v6735_v50 = vpop.eup %6734 }
 0x1ad   :  { %v465_v51 = vadd.f32 1.0, %v6735_v50 }
 0x1af   :  { %6736 = vrcp.f32 %v465_v51 }
 0x1b9   :  { %v6737_v52 = vpop.eup %6736 }
 0x1ba   :  { %v469_v55 = vmul.f32 0.0, %v6737_v52 }
 0x21d   :  { %v472_v53 = vpop.permute.xlu0 %471 }
 0x21e   :  { %v474_v54 = vmul.f32 %v6737_v52, %v472_v53 }
 0x220   :  { %476 = vrot.lane.b32.xlu0 %v474_v54, %s7294_s3 }
 0x292   :  { %v477_v56 = vpop.permute.xlu0 %476 }
 0x293   :  { %v479_v57 = vadd.f32 %v477_v56, %v469_v55 }
 0x295   :  { %6738 = vtanh.f32 %v479_v57  ;;  %v576_v10 = vrot.slane %v479_v57, 6 }
 0x29f   :  { %v6739_v58 = vpop.eup %6738 }
 0x2a0   :  { %482 = vrot.lane.b32.xlu1 %v6739_v58, %s7293_s21 }
 0x312   :  { %v483_v59 = vpop.permute.xlu1 %482 }
 0x313   :  { %v485_v60 = vmul.f32 %v6737_v52, %v483_v59 }
 0x315   :  { %487 = vrot.lane.b32.xlu1 %v485_v60, %s7294_s3 }
 0x387   :  { %v488_v61 = vpop.permute.xlu1 %487 }
 0x388   :  { %491 = vst.msk [vmem:[#allocation2] sm:$0x3] %vm490_vm3, %v488_v61  ;;  %5905 = vmatmul.mubr.msk.f32.vlgmr.msra.gmra.mrb[6].mxu1 %vm387_vm4, %v488_v61 }
 0x389   :  { %6382 = vmatpush3.bf16.msra.mxu1 %v7562_v13  ;;  %5926 = vmatprep.mubr.msk.f32.mxu1 %vm7292_vm2, %v7290_v0 }
 0x38a   :  { %6383 = vmatprep.subr.bf16.mxu1 %v7291_v12 }
 0x38d   :  { %6385 = vmatpush3.bf16.msra.mxu1 %v7578_v18 }
 0x38e   :  { %6392 = vmatprep.subr.bf16.mxu1 %v7291_v12 }
 0x45b   :  { %v560_v62 = vpop.f32.mrb[6].mxu1 }
 0x45c   :  { %v565_v63 = vrot.slane %v560_v62, 6  ;;  %v5906_v1 = vpop.f32.mrb[7].mxu1 }
 0x45e   :  { %v567_v2 = vadd.f32 %v565_v63, %v7616_v38 }
 0x460   :  { %6740 = vtanh.f32 %v567_v2  ;;  %v5556_v4 = vmul.f32 -1.442695, %v567_v2 }
 0x462   :  { %6742 = vpow2.f32 %v5556_v4 }
 0x46a   :  { %v6741_v3 = vpop.eup %6740 }
 0x46b   :  { %580 = vrot.lane.b32.xlu0 %v6741_v3, %s7293_s21 }
 0x46c   :  { %v6743_v5 = vpop.eup %6742 }
 0x46d   :  { %v571_v6 = vadd.f32 1.0, %v6743_v5 }
 0x46f   :  { %6744 = vrcp.f32 %v571_v6 }
 0x479   :  { %v6745_v7 = vpop.eup %6744 }
 0x47a   :  { %v578_v11 = vmul.f32 %v6745_v7, %v576_v10 }
 0x4dd   :  { %v581_v8 = vpop.permute.xlu0 %580 }
 0x4de   :  { %v583_v9 = vmul.f32 %v6745_v7, %v581_v8 }
 0x4e0   :  { %585 = vrot.lane.b32.xlu1 %v583_v9, %s7294_s3 }
 0x552   :  { %v586_v14 = vpop.permute.xlu1 %585 }
 0x553   :  { %v588_v15 = vadd.f32 %v586_v14, %v578_v11 }
 0x555   :  { %6746 = vtanh.f32 %v588_v15  ;;  %v688_v35 = vrot.slane %v588_v15, 6 }
 0x55f   :  { %v6747_v16 = vpop.eup %6746 }
 0x560   :  { %591 = vrot.lane.b32.xlu0 %v6747_v16, %s7293_s21 }
 0x5d2   :  { %v592_v17 = vpop.permute.xlu0 %591 }
 0x5d3   :  { %v7641_v19 = vmul.f32 %v6745_v7, %v592_v17 }
 0x5d5   :  { %v601_v20 = vrot.slane %v7641_v19, 2 }
 0x5d7   :  { %602 = vrot.lane.b32.xlu1 %v601_v20, %s7294_s3 }
 0x649   :  { %v603_v21 = vpop.permute.xlu1 %602 }
 0x64a   :  { %5916 = vmatmul.mubr.msk.f32.vlgmr.msra.gmra.mrb[4].mxu0 %vm387_vm4, %v603_v21 }
 0x64b   :  { %6388 = vmatpush3.bf16.msra.mxu0 %v7562_v13  ;;  %5937 = vmatprep.mubr.msk.f32.mxu0 %vm7292_vm2, %v7290_v0 }
 0x64c   :  { %6389 = vmatprep.subr.bf16.mxu0 %v7291_v12 }
 0x64f   :  { %6391 = vmatpush3.bf16.msra.mxu0 %v7578_v18 }
 0x650   :  { %6398 = vmatprep.subr.bf16.mxu0 %v7291_v12 }
 0x71d   :  { %v672_v22 = vpop.f32.mrb[4].mxu0 }
 0x71e   :  { %v677_v23 = vrot.slane %v672_v22, 4  ;;  %v5917_v24 = vpop.f32.mrb[5].mxu0 }
 0x720   :  { %v679_v25 = vadd.f32 %v677_v23, %v7616_v38 }
 0x722   :  { %6748 = vtanh.f32 %v679_v25  ;;  %v5558_v29 = vmul.f32 -1.442695, %v679_v25 }
 0x724   :  { %6750 = vpow2.f32 %v5558_v29 }
 0x72c   :  { %v6749_v27 = vpop.eup %6748 }
 0x72d   :  { %692 = vrot.lane.b32.xlu0 %v6749_v27, %s7293_s21 }
 0x72e   :  { %v6751_v30 = vpop.eup %6750 }
 0x72f   :  { %v683_v31 = vadd.f32 1.0, %v6751_v30 }
 0x731   :  { %6752 = vrcp.f32 %v683_v31 }
 0x73b   :  { %v6753_v32 = vpop.eup %6752 }
 0x73c   :  { %v690_v36 = vmul.f32 %v6753_v32, %v688_v35 }
 0x79f   :  { %v693_v33 = vpop.permute.xlu0 %692 }
 0x7a0   :  { %v695_v34 = vmul.f32 %v6753_v32, %v693_v33 }
 0x7a2   :  { %697 = vrot.lane.b32.xlu1 %v695_v34, %s7294_s3 }
 0x814   :  { %v698_v37 = vpop.permute.xlu1 %697 }
 0x815   :  { %v700_v39 = vadd.f32 %v698_v37, %v690_v36 }
 0x817   :  { %6754 = vtanh.f32 %v700_v39  ;;  %v800_v59 = vrot.slane %v700_v39, 6 }
 0x821   :  { %v6755_v41 = vpop.eup %6754 }
 0x822   :  { %703 = vrot.lane.b32.xlu0 %v6755_v41, %s7293_s21 }
 0x894   :  { %v704_v42 = vpop.permute.xlu0 %703 }
 0x895   :  { %v7656_v43 = vmul.f32 %v6753_v32, %v704_v42 }
 0x897   :  { %v713_v44 = vrot.slane %v7656_v43, 4 }
 0x899   :  { %714 = vrot.lane.b32.xlu1 %v713_v44, %s7294_s3 }
 0x90b   :  { %v715_v45 = vpop.permute.xlu1 %714 }
 0x90c   :  { %5927 = vmatmul.mubr.msk.f32.vlgmr.msra.gmra.mrb[8].mxu1 %vm387_vm4, %v715_v45 }
 0x90d   :  { %6394 = vmatpush3.bf16.msra.mxu1 %v7562_v13  ;;  %5948 = vmatprep.mubr.msk.f32.mxu1 %vm7292_vm2, %v7290_v0 }
 0x90e   :  { %6395 = vmatprep.subr.bf16.mxu1 %v7291_v12 }
 0x911   :  { %6397 = vmatpush3.bf16.msra.mxu1 %v7578_v18 }
 0x912   :  { %6404 = vmatprep.subr.bf16.mxu1 %v7291_v12 }
 0x9df   :  { %v784_v48 = vpop.f32.mrb[8].mxu1 }
 0x9e0   :  { %v789_v49 = vrot.slane %v784_v48, 2  ;;  %v5928_v50 = vpop.f32.mrb[9].mxu1 }
 0x9e1   :  { %v5569_v50 = vld [vmem:[%s8467_s7 + $0x20] sm:$0xff] }
 0x9e2   :  { %v791_v51 = vadd.f32 %v789_v49, %v7616_v38 }
 0x9e4   :  { %6756 = vtanh.f32 %v791_v51  ;;  %v5560_v53 = vmul.f32 -1.442695, %v791_v51  ;;  %v5570_v51 = vld [vmem:[%s8467_s7 + $0x28] sm:$0xff] }
 0x9e6   :  { %6758 = vpow2.f32 %v5560_v53  ;;  %v5571_v53 = vld [vmem:[%s8467_s7 + $0x30] sm:$0xff] }
 0x9ee   :  { %v6757_v52 = vpop.eup %6756 }
 0x9ef   :  { %804 = vrot.lane.b32.xlu0 %v6757_v52, %s7293_s21  ;;  %v7709_v52 = vpack.c.bf16 %v5570_v51, %v5569_v50 }
 0x9f0   :  { %v6759_v54 = vpop.eup %6758 }
 0x9f1   :  { %v795_v55 = vadd.f32 1.0, %v6759_v54  ;;  %v5572_v54 = vld [vmem:[%s8467_s7 + $0x38] sm:$0xff] }
 0x9f3   :  { %6760 = vrcp.f32 %v795_v55 }
 0x9fd   :  { %v6761_v56 = vpop.eup %6760 }
 0x9fe   :  { %v802_v60 = vmul.f32 %v6761_v56, %v800_v59 }
 0xa61   :  { %v805_v57 = vpop.permute.xlu0 %804 }
 0xa62   :  { %v807_v58 = vmul.f32 %v6761_v56, %v805_v57 }
 0xa64   :  { %809 = vrot.lane.b32.xlu1 %v807_v58, %s7294_s3 }
 0xad6   :  { %v810_v61 = vpop.permute.xlu1 %809 }
 0xad7   :  { %v812_v62 = vadd.f32 %v810_v61, %v802_v60 }
 0xad9   :  { %6762 = vtanh.f32 %v812_v62  ;;  %v909_v16 = vrot.slane %v812_v62, 6 }
 0xae3   :  { %v6763_v38 = vpop.eup %6762 }
 0xae4   :  { %815 = vrot.lane.b32.xlu0 %v6763_v38, %s7293_s21 }
 0xb56   :  { %v816_v63 = vpop.permute.xlu0 %815 }
 0xb57   :  { %v7671_v1 = vmul.f32 %v6761_v56, %v816_v63  ;;  %v7719_v56 = vpack.c.bf16 %v5572_v54, %v5571_v53 }
 0xb59   :  { %v825_v2 = vrot.slane %v7671_v1, 6 }
 0xb5b   :  { %826 = vrot.lane.b32.xlu1 %v825_v2, %s7294_s3 }
 0xbcd   :  { %v827_v3 = vpop.permute.xlu1 %826 }
 0xbce   :  { %5938 = vmatmul.mubr.msk.f32.vlgmr.msra.gmra.mrb[6].mxu0 %vm387_vm4, %v827_v3 }
 0xbcf   :  { %6400 = vmatpush3.bf16.msra.mxu0 %v7562_v13  ;;  %5959 = vmatprep.mubr.msk.f32.mxu0 %vm7292_vm2, %v7290_v0 }
 0xbd0   :  { %6401 = vmatprep.subr.bf16.mxu0 %v7291_v12 }
 0xbd3   :  { %6403 = vmatpush3.bf16.msra.mxu0 %v7578_v18 }
 0xbd4   :  { %6410 = vmatprep.subr.bf16.mxu0 %v7291_v12 }
 0xca1   :  { %v896_v4 = vpop.f32.mrb[6].mxu0 }
 0xca2   :  { %v900_v5 = vadd.f32 %v896_v4, %v7621_v46  ;;  %v5939_v6 = vpop.f32.mrb[7].mxu0 }
 0xca4   :  { %6764 = vtanh.f32 %v900_v5  ;;  %v5562_v8 = vmul.f32 -1.442695, %v900_v5 }
 0xca6   :  { %6766 = vpow2.f32 %v5562_v8 }
 0xcae   :  { %v6765_v7 = vpop.eup %6764 }
 0xcaf   :  { %913 = vrot.lane.b32.xlu0 %v6765_v7, %s7293_s21 }
 0xcb0   :  { %v6767_v9 = vpop.eup %6766 }
 0xcb1   :  { %v904_v10 = vadd.f32 1.0, %v6767_v9 }
 0xcb3   :  { %6768 = vrcp.f32 %v904_v10 }
 0xcbd   :  { %v6769_v11 = vpop.eup %6768 }
 0xcbe   :  { %v911_v17 = vmul.f32 %v6769_v11, %v909_v16 }
 0xd21   :  { %v914_v14 = vpop.permute.xlu0 %913 }
 0xd22   :  { %v916_v15 = vmul.f32 %v6769_v11, %v914_v14 }
 0xd24   :  { %918 = vrot.lane.b32.xlu1 %v916_v15, %s7294_s3 }
 0xd96   :  { %v919_v20 = vpop.permute.xlu1 %918 }
 0xd97   :  { %v921_v21 = vadd.f32 %v919_v20, %v911_v17 }
 0xd99   :  { %6770 = vtanh.f32 %v921_v21 }
 0xda3   :  { %v6771_v22 = vpop.eup %6770 }
 0xda4   :  { %924 = vrot.lane.b32.xlu0 %v6771_v22, %s7293_s21 }
 0xe16   :  { %v925_v23 = vpop.permute.xlu0 %924 }
 0xe17   :  { %v927_v24 = vmul.f32 %v6769_v11, %v925_v23 }
 0xe19   :  { %929 = vrot.lane.b32.xlu1 %v927_v24, %s7294_s3 }
 0xe8b   :  { %v930_v25 = vpop.permute.xlu1 %929 }
 0xe8c   :  { %932 = vst.msk [vmem:[#allocation2 + $0x8] sm:$0x3] %vm490_vm3, %v930_v25  ;;  %5949 = vmatmul.mubr.msk.f32.vlgmr.msra.gmra.mrb[10].mxu1 %vm387_vm4, %v930_v25 }
 0xe8d   :  { %6406 = vmatpush3.bf16.msra.mxu1 %v7562_v13  ;;  %5970 = vmatprep.mubr.msk.f32.mxu1 %vm7292_vm2, %v7290_v0 }
 0xe8e   :  { %6407 = vmatprep.subr.bf16.mxu1 %v7291_v12 }
 0xe91   :  { %6409 = vmatpush3.bf16.msra.mxu1 %v7578_v18  ;;  %v1017_v18 = vrot.slane %v921_v21, 6 }
 0xe92   :  { %6416 = vmatprep.subr.bf16.mxu1 %v7291_v12 }
 0xf5f   :  { %v1001_v27 = vpop.f32.mrb[10].mxu1 }
 0xf60   :  { %v1006_v29 = vrot.slane %v1001_v27, 6  ;;  %v5950_v30 = vpop.f32.mrb[11].mxu1 }
 0xf62   :  { %v1008_v31 = vadd.f32 %v1006_v29, %v7621_v46 }
 0xf64   :  { %6772 = vtanh.f32 %v1008_v31  ;;  %v5564_v33 = vmul.f32 -1.442695, %v1008_v31 }
 0xf66   :  { %6774 = vpow2.f32 %v5564_v33 }
 0xf6e   :  { %v6773_v32 = vpop.eup %6772 }
 0xf6f   :  { %1021 = vrot.lane.b32.xlu0 %v6773_v32, %s7293_s21 }
 0xf70   :  { %v6775_v13 = vpop.eup %6774 }
 0xf71   :  { %v1012_v34 = vadd.f32 1.0, %v6775_v13 }
 0xf73   :  { %6776 = vrcp.f32 %v1012_v34 }
 0xf7d   :  { %v6777_v35 = vpop.eup %6776 }
 0xf7e   :  { %v1019_v39 = vmul.f32 %v6777_v35, %v1017_v18 }
 0xfe1   :  { %v1022_v36 = vpop.permute.xlu0 %1021 }
 0xfe2   :  { %v1024_v37 = vmul.f32 %v6777_v35, %v1022_v36 }
 0xfe4   :  { %1026 = vrot.lane.b32.xlu1 %v1024_v37, %s7294_s3 }
0x1056   :  { %v1027_v41 = vpop.permute.xlu1 %1026 }
0x1057   :  { %v1029_v42 = vadd.f32 %v1027_v41, %v1019_v39 }
0x1059   :  { %6778 = vtanh.f32 %v1029_v42  ;;  %v1128_v20 = vrot.slane %v1029_v42, 6 }
0x1063   :  { %v6779_v44 = vpop.eup %6778 }
0x1064   :  { %1032 = vrot.lane.b32.xlu0 %v6779_v44, %s7293_s21 }
0x10d6   :  { %v1033_v45 = vpop.permute.xlu0 %1032 }
0x10d7   :  { %v7699_v48 = vmul.f32 %v6777_v35, %v1033_v45 }
0x10d9   :  { %v1041_v49 = vrot.slane %v7699_v48, 2 }
0x10db   :  { %1042 = vrot.lane.b32.xlu1 %v1041_v49, %s7294_s3 }
0x114d   :  { %v1043_v55 = vpop.permute.xlu1 %1042 }
0x114e   :  { %5960 = vmatmul.mubr.msk.f32.vlgmr.msra.gmra.mrb[8].mxu0 %vm387_vm4, %v1043_v55 }
0x114f   :  { %6412 = vmatpush3.bf16.msra.mxu0 %v7709_v52  ;;  %5981 = vmatprep.mubr.msk.f32.mxu0 %vm7292_vm2, %v7290_v0 }
0x1150   :  { %6413 = vmatprep.subr.bf16.mxu0 %v7291_v12 }
0x1153   :  { %6415 = vmatpush3.bf16.msra.mxu0 %v7719_v56 }
0x1154   :  { %6422 = vmatprep.subr.bf16.mxu0 %v7291_v12 }
0x1156   :  { %5982 = vmatmul.mubr.f32.vlgmr.msra.gmra.mrb[10].mxu0 %v7290_v0 }
0x1157   :  { %6424 = vmatpush3.bf16.msra.mxu0 %v7709_v52  ;;  %6003 = vmatprep.mubr.msk.f32.mxu0 %vm7292_vm2, %v7290_v0 }
0x1158   :  { %6425 = vmatprep.subr.bf16.mxu0 %v7291_v12 }
0x115b   :  { %6427 = vmatpush3.bf16.msra.mxu0 %v7719_v56 }
0x115c   :  { %6434 = vmatprep.subr.bf16.mxu0 %v7291_v12 }
0x1221   :  { %v1112_v57 = vpop.f32.mrb[8].mxu0 }
0x1222   :  { %v1117_v58 = vrot.slane %v1112_v57, 4  ;;  %v5961_v59 = vpop.f32.mrb[9].mxu0 }
0x1224   :  { %v1119_v60 = vadd.f32 %v1117_v58, %v7621_v46 }
0x1226   :  { %6780 = vtanh.f32 %v1119_v60  ;;  %v5566_v4 = vmul.f32 -1.442695, %v1119_v60 }
0x1229   :  { %v1334_v61 = vpop.f32.mrb[10].mxu0 }
0x122a   :  { %v1339_v62 = vrot.slane %v1334_v61, 2  ;;  %v5983_v38 = vpop.f32.mrb[11].mxu0 }
0x122c   :  { %v1341_v63 = vadd.f32 %v1339_v62, %v7623_v47 }
0x122e   :  { %6782 = vtanh.f32 %v1341_v63  ;;  %v5573_v5 = vmul.f32 -1.442695, %v1341_v63 }
0x122f   :  { %6784 = vpow2.f32 %v5566_v4 }
0x1230   :  { %v6781_v2 = vpop.eup %6780  ;;  %6786 = vpow2.f32 %v5573_v5 }
0x1231   :  { %1132 = vrot.lane.b32.xlu0 %v6781_v2, %s7293_s21 }
0x1238   :  { %v6783_v3 = vpop.eup %6782 }
0x1239   :  { %1351 = vrot.lane.b32.xlu1 %v6783_v3, %s7293_s21  ;;  %v6785_v6 = vpop.eup %6784 }
0x123a   :  { %v1123_v7 = vadd.f32 1.0, %v6785_v6  ;;  %v6787_v8 = vpop.eup %6786 }
0x123b   :  { %v1345_v9 = vadd.f32 1.0, %v6787_v8 }
0x123c   :  { %6788 = vrcp.f32 %v1123_v7 }
0x123d   :  { %6790 = vrcp.f32 %v1345_v9 }
0x1246   :  { %v6789_v10 = vpop.eup %6788 }
0x1247   :  { %v6791_v15 = vpop.eup %6790  ;;  %v1130_v21 = vmul.f32 %v6789_v10, %v1128_v20 }
0x1248   :  { %v1349_v24 = vmul.f32 0.0, %v6791_v15 }
0x12a3   :  { %v1133_v11 = vpop.permute.xlu0 %1132 }
0x12a4   :  { %v1135_v14 = vmul.f32 %v6789_v10, %v1133_v11 }
0x12a6   :  { %1137 = vrot.lane.b32.xlu0 %v1135_v14, %s7294_s3 }
0x12ab   :  { %v1352_v16 = vpop.permute.xlu1 %1351 }
0x12ac   :  { %v1354_v17 = vmul.f32 %v6791_v15, %v1352_v16 }
0x12ae   :  { %1356 = vrot.lane.b32.xlu1 %v1354_v17, %s7294_s3 }
0x1318   :  { %v1138_v22 = vpop.permute.xlu0 %1137 }
0x1319   :  { %v7739_v23 = vadd.f32 %v1138_v22, %v1130_v21 }
0x131b   :  { %6792 = vtanh.f32 %v7739_v23 }
0x1320   :  { %v1357_v25 = vpop.permute.xlu1 %1356 }
0x1321   :  { %v1359_v27 = vadd.f32 %v1357_v25, %v1349_v24 }
0x1323   :  { %6794 = vtanh.f32 %v1359_v27  ;;  %v1459_v58 = vrot.slane %v1359_v27, 2 }
0x1325   :  { %v6793_v29 = vpop.eup %6792 }
0x1326   :  { %1143 = vrot.lane.b32.xlu0 %v6793_v29, %s7293_s21 }
0x132d   :  { %v6795_v30 = vpop.eup %6794 }
0x132e   :  { %1362 = vrot.lane.b32.xlu1 %v6795_v30, %s7293_s21 }
0x1398   :  { %v1144_v31 = vpop.permute.xlu0 %1143 }
0x1399   :  { %v7744_v32 = vmul.f32 %v6789_v10, %v1144_v31 }
0x139b   :  { %v1152_v33 = vrot.slane %v7744_v32, 4 }
0x139d   :  { %1153 = vrot.lane.b32.xlu0 %v1152_v33, %s7294_s3 }
0x13a0   :  { %v1363_v13 = vpop.permute.xlu1 %1362 }
0x13a1   :  { %v7748_v34 = vmul.f32 %v6791_v15, %v1363_v13 }
0x13a3   :  { %v1372_v35 = vrot.slane %v7748_v34, 6 }
0x13a5   :  { %1373 = vrot.lane.b32.xlu1 %v1372_v35, %s7294_s3 }
0x140f   :  { %v1154_v36 = vpop.permute.xlu0 %1153 }
0x1410   :  { %5971 = vmatmul.mubr.msk.f32.vlgmr.msra.gmra.mrb[12].mxu1 %vm387_vm4, %v1154_v36 }
0x1411   :  { %6418 = vmatpush3.bf16.msra.mxu1 %v7709_v52  ;;  %5992 = vmatprep.mubr.msk.f32.mxu1 %vm7292_vm2, %v7290_v0 }
0x1412   :  { %6419 = vmatprep.subr.bf16.mxu1 %v7291_v12 }
0x1415   :  { %6421 = vmatpush3.bf16.msra.mxu1 %v7719_v56 }
0x1416   :  { %6428 = vmatprep.subr.bf16.mxu1 %v7291_v12 }
0x1417   :  { %v1374_v37 = vpop.permute.xlu1 %1373 }
0x1418   :  { %5993 = vmatmul.mubr.msk.f32.vlgmr.msra.gmra.mrb[14].mxu1 %vm387_vm4, %v1374_v37 }
0x1419   :  { %6430 = vmatpush3.bf16.msra.mxu1 %v7709_v52  ;;  %6014 = vmatprep.mubr.msk.f32.mxu1 %vm7292_vm2, %v7290_v0 }
0x141a   :  { %6431 = vmatprep.subr.bf16.mxu1 %v7291_v12 }
0x141d   :  { %6433 = vmatpush3.bf16.msra.mxu1 %v7719_v56 }
0x141e   :  { %6440 = vmatprep.subr.bf16.mxu1 %v7291_v12 }
0x14e3   :  { %v7766_v18 = vpop.f32.mrb[12].mxu1 }
0x14e4   :  { %v5972_v39 = vpop.f32.mrb[13].mxu1 }
0x14eb   :  { %v1443_v41 = vpop.f32.mrb[14].mxu1 }
0x14ec   :  { %v1448_v42 = vrot.slane %v1443_v41, 4  ;;  %v5994_v44 = vpop.f32.mrb[15].mxu1 }
0x14ee   :  { %v1450_v45 = vadd.f32 %v1448_v42, %v7623_v47 }
0x14f0   :  { %6796 = vtanh.f32 %v1450_v45  ;;  %v5575_v50 = vmul.f32 -1.442695, %v1450_v45 }
0x14f2   :  { %6798 = vpow2.f32 %v5575_v50 }
0x14fa   :  { %v6797_v49 = vpop.eup %6796 }
0x14fb   :  { %1463 = vrot.lane.b32.xlu0 %v6797_v49, %s7293_s21 }
0x14fc   :  { %v6799_v51 = vpop.eup %6798 }
0x14fd   :  { %v1454_v53 = vadd.f32 1.0, %v6799_v51 }
0x14ff   :  { %6800 = vrcp.f32 %v1454_v53 }
0x1509   :  { %v6801_v54 = vpop.eup %6800 }
0x150a   :  { %v1461_v59 = vmul.f32 %v6801_v54, %v1459_v58 }
0x156d   :  { %v1464_v55 = vpop.permute.xlu0 %1463 }
0x156e   :  { %v1466_v57 = vmul.f32 %v6801_v54, %v1464_v55 }
0x1570   :  { %1468 = vrot.lane.b32.xlu1 %v1466_v57, %s7294_s3 }
0x15e2   :  { %v1469_v60 = vpop.permute.xlu1 %1468 }
0x15e3   :  { %v1471_v61 = vadd.f32 %v1469_v60, %v1461_v59 }
0x15e5   :  { %6802 = vtanh.f32 %v1471_v61  ;;  %v1571_v17 = vrot.slane %v1471_v61, 2 }
0x15ef   :  { %v6803_v62 = vpop.eup %6802 }
0x15f0   :  { %1474 = vrot.lane.b32.xlu0 %v6803_v62, %s7293_s21 }
0x1662   :  { %v1475_v38 = vpop.permute.xlu0 %1474 }
0x1663   :  { %v7772_v63 = vmul.f32 %v6801_v54, %v1475_v38 }
0x1665   :  { %v1484_v2 = vrot.slane %v7772_v63, 4 }
0x1667   :  { %1485 = vrot.lane.b32.xlu1 %v1484_v2, %s7294_s3 }
0x16d9   :  { %v1486_v3 = vpop.permute.xlu1 %1485 }
0x16da   :  { %6004 = vmatmul.mubr.msk.f32.vlgmr.msra.gmra.mrb[12].mxu0 %vm387_vm4, %v1486_v3 }
0x16db   :  { %6436 = vmatpush3.bf16.msra.mxu0 %v7709_v52  ;;  %6025 = vmatprep.mubr.msk.f32.mxu0 %vm7292_vm2, %v7290_v0 }
0x16dc   :  { %6437 = vmatprep.subr.bf16.mxu0 %v7291_v12 }
0x16df   :  { %6439 = vmatpush3.bf16.msra.mxu0 %v7719_v56 }
0x16e0   :  { %6446 = vmatprep.subr.bf16.mxu0 %v7291_v12 }
0x17ad   :  { %v1555_v4 = vpop.f32.mrb[12].mxu0 }
0x17ae   :  { %v1560_v5 = vrot.slane %v1555_v4, 6  ;;  %v6005_v6 = vpop.f32.mrb[13].mxu0 }
0x17b0   :  { %v1562_v7 = vadd.f32 %v1560_v5, %v7623_v47 }
0x17b2   :  { %6804 = vtanh.f32 %v1562_v7  ;;  %v5577_v9 = vmul.f32 -1.442695, %v1562_v7 }
0x17b4   :  { %6806 = vpow2.f32 %v5577_v9 }
0x17bc   :  { %v6805_v8 = vpop.eup %6804 }
0x17bd   :  { %1575 = vrot.lane.b32.xlu0 %v6805_v8, %s7293_s21 }
0x17be   :  { %v6807_v10 = vpop.eup %6806 }
0x17bf   :  { %v1566_v11 = vadd.f32 1.0, %v6807_v10 }
0x17c1   :  { %6808 = vrcp.f32 %v1566_v11 }
0x17cb   :  { %v6809_v14 = vpop.eup %6808 }
0x17cc   :  { %v1573_v20 = vmul.f32 %v6809_v14, %v1571_v17 }
0x182f   :  { %v1576_v15 = vpop.permute.xlu0 %1575 }
0x1830   :  { %v1578_v16 = vmul.f32 %v6809_v14, %v1576_v15 }
0x1832   :  { %1580 = vrot.lane.b32.xlu1 %v1578_v16, %s7294_s3 }
0x18a4   :  { %v1581_v21 = vpop.permute.xlu1 %1580 }
0x18a5   :  { %v1583_v22 = vadd.f32 %v1581_v21, %v1573_v20 }
0x18a7   :  { %6810 = vtanh.f32 %v1583_v22  ;;  %v1680_v45 = vrot.slane %v1583_v22, 2 }
0x18b1   :  { %v6811_v24 = vpop.eup %6810 }
0x18b2   :  { %1586 = vrot.lane.b32.xlu0 %v6811_v24, %s7293_s21 }
0x1924   :  { %v1587_v25 = vpop.permute.xlu0 %1586 }
0x1925   :  { %v7787_v27 = vmul.f32 %v6809_v14, %v1587_v25 }
0x1927   :  { %v1596_v29 = vrot.slane %v7787_v27, 2 }
0x1929   :  { %1597 = vrot.lane.b32.xlu1 %v1596_v29, %s7294_s3 }
0x199b   :  { %v1598_v30 = vpop.permute.xlu1 %1597 }
0x199c   :  { %6015 = vmatmul.mubr.msk.f32.vlgmr.msra.gmra.mrb[16].mxu1 %vm387_vm4, %v1598_v30 }
0x199d   :  { %6442 = vmatpush3.bf16.msra.mxu1 %v7709_v52  ;;  %6036 = vmatprep.mubr.msk.f32.mxu1 %vm7292_vm2, %v7290_v0 }
0x199e   :  { %6443 = vmatprep.subr.bf16.mxu1 %v7291_v12 }
0x19a1   :  { %6445 = vmatpush3.bf16.msra.mxu1 %v7719_v56 }
0x19a2   :  { %6452 = vmatprep.subr.bf16.mxu1 %v7291_v12 }
0x1a6f   :  { %v1667_v31 = vpop.f32.mrb[16].mxu1 }
0x1a70   :  { %v1671_v33 = vadd.f32 %v1667_v31, %v7623_v47  ;;  %v6016_v13 = vpop.f32.mrb[17].mxu1 }
0x1a72   :  { %6812 = vtanh.f32 %v1671_v33  ;;  %v5579_v36 = vmul.f32 -1.442695, %v1671_v33 }
0x1a74   :  { %6814 = vpow2.f32 %v5579_v36 }
0x1a7c   :  { %v6813_v35 = vpop.eup %6812 }
0x1a7d   :  { %1684 = vrot.lane.b32.xlu0 %v6813_v35, %s7293_s21 }
0x1a7e   :  { %v6815_v37 = vpop.eup %6814 }
0x1a7f   :  { %v1675_v39 = vadd.f32 1.0, %v6815_v37 }
0x1a81   :  { %6816 = vrcp.f32 %v1675_v39 }
0x1a8b   :  { %v6817_v41 = vpop.eup %6816 }
0x1a8c   :  { %v1682_v49 = vmul.f32 %v6817_v41, %v1680_v45 }
0x1aef   :  { %v1685_v42 = vpop.permute.xlu0 %1684 }
0x1af0   :  { %v1687_v44 = vmul.f32 %v6817_v41, %v1685_v42 }
0x1af2   :  { %1689 = vrot.lane.b32.xlu1 %v1687_v44, %s7294_s3 }
0x1b64   :  { %v1690_v50 = vpop.permute.xlu1 %1689 }
0x1b65   :  { %v1692_v51 = vadd.f32 %v1690_v50, %v1682_v49 }
0x1b67   :  { %6818 = vtanh.f32 %v1692_v51  ;;  %v1791_v6 = vrot.slane %v1692_v51, 2 }
0x1b71   :  { %v6819_v47 = vpop.eup %6818 }
0x1b72   :  { %1695 = vrot.lane.b32.xlu0 %v6819_v47, %s7293_s21 }
0x1be4   :  { %v1696_v53 = vpop.permute.xlu0 %1695 }
0x1be5   :  { %v7802_v54 = vmul.f32 %v6817_v41, %v1696_v53 }
0x1be7   :  { %1705 = vrot.lane.b32.xlu1 %v7802_v54, %s7294_s3 }
0x1c59   :  { %v1706_v55 = vpop.permute.xlu1 %1705 }
0x1c5a   :  { %6026 = vmatmul.mubr.msk.f32.vlgmr.msra.gmra.mrb[14].mxu0 %vm387_vm4, %v1706_v55 }
0x1c5b   :  { %6448 = vmatpush3.bf16.msra.mxu0 %v7709_v52  ;;  %6047 = vmatprep.mubr.msk.f32.mxu0 %vm7292_vm2, %v7290_v0 }
0x1c5c   :  { %6449 = vmatprep.subr.bf16.mxu0 %v7291_v12 }
0x1c5f   :  { %6451 = vmatpush3.bf16.msra.mxu0 %v7719_v56 }
0x1d2d   :  { %v1775_v57 = vpop.f32.mrb[14].mxu0 }
0x1d2e   :  { %v1780_v58 = vrot.slane %v1775_v57, 2  ;;  %v6027_v59 = vpop.f32.mrb[15].mxu0 }
0x1d30   :  { %v1782_v60 = vadd.f32 %v1780_v58, %v7618_v40 }
0x1d32   :  { %6820 = vtanh.f32 %v1782_v60  ;;  %v5581_v62 = vmul.f32 -1.442695, %v1782_v60 }
0x1d34   :  { %6822 = vpow2.f32 %v5581_v62 }
0x1d3c   :  { %v6821_v61 = vpop.eup %6820 }
0x1d3d   :  { %1795 = vrot.lane.b32.xlu0 %v6821_v61, %s7293_s21 }
0x1d3e   :  { %v6823_v38 = vpop.eup %6822 }
0x1d3f   :  { %v1786_v2 = vadd.f32 1.0, %v6823_v38 }
0x1d41   :  { %6824 = vrcp.f32 %v1786_v2 }
0x1d4b   :  { %v6825_v3 = vpop.eup %6824 }
0x1d4c   :  { %v1793_v7 = vmul.f32 %v6825_v3, %v1791_v6 }
0x1daf   :  { %v1796_v4 = vpop.permute.xlu0 %1795 }
0x1db0   :  { %v1798_v5 = vmul.f32 %v6825_v3, %v1796_v4 }
0x1db2   :  { %1800 = vrot.lane.b32.xlu1 %v1798_v5, %s7294_s3 }
0x1e24   :  { %v1801_v8 = vpop.permute.xlu1 %1800 }
0x1e25   :  { %v1803_v9 = vadd.f32 %v1801_v8, %v1793_v7 }
0x1e27   :  { %6826 = vtanh.f32 %v1803_v9 }
0x1e31   :  { %v6827_v10 = vpop.eup %6826 }
0x1e32   :  { %1806 = vrot.lane.b32.xlu0 %v6827_v10, %s7293_s21 }
0x1ea4   :  { %v1807_v11 = vpop.permute.xlu0 %1806 }
0x1ea5   :  { %v7816_v14 = vmul.f32 %v6825_v3, %v1807_v11 }
0x1ea7   :  { %v1815_v15 = vrot.slane %v7816_v14, 6 }
0x1ea9   :  { %1816 = vrot.lane.b32.xlu1 %v1815_v15, %s7294_s3 }
0x1f1b   :  { %v1817_v16 = vpop.permute.xlu1 %1816 }
0x1f1c   :  { %6037 = vmatmul.mubr.msk.f32.vlgmr.msra.gmra.mrb[18].mxu1 %vm387_vm4, %v1817_v16 }
0x1f1d   :  { %6454 = vmatpush3.bf16.msra.mxu1 %v7709_v52  ;;  %6058 = vmatprep.mubr.msk.f32.mxu1 %vm7292_vm2, %v7290_v0 }
0x1f1e   :  { %6455 = vmatprep.subr.bf16.mxu1 %v7291_v12 }
0x1f21   :  { %6457 = vmatpush3.bf16.msra.mxu1 %v7719_v56  ;;  %v1902_v56 = vrot.slane %v1803_v9, 2 }
0x1f22   :  { %6474 = vmatprep.subr.bf16.mxu1 %v7291_v12 }
0x1fef   :  { %v1886_v17 = vpop.f32.mrb[18].mxu1 }
0x1ff0   :  { %v1891_v20 = vrot.slane %v1886_v17, 4  ;;  %v6038_v21 = vpop.f32.mrb[19].mxu1 }
0x1ff2   :  { %v1893_v22 = vadd.f32 %v1891_v20, %v7618_v40 }
0x1ff4   :  { %6828 = vtanh.f32 %v1893_v22  ;;  %v5583_v25 = vmul.f32 -1.442695, %v1893_v22 }
0x1ff6   :  { %6830 = vpow2.f32 %v5583_v25 }
0x1ffe   :  { %v6829_v24 = vpop.eup %6828 }
0x1fff   :  { %1906 = vrot.lane.b32.xlu0 %v6829_v24, %s7293_s21 }
0x2000   :  { %v6831_v52 = vpop.eup %6830 }
0x2001   :  { %v1897_v29 = vadd.f32 1.0, %v6831_v52 }
0x2003   :  { %6832 = vrcp.f32 %v1897_v29 }
0x200d   :  { %v6833_v30 = vpop.eup %6832 }
0x200e   :  { %v1904_v13 = vmul.f32 %v6833_v30, %v1902_v56 }
0x2071   :  { %v1907_v31 = vpop.permute.xlu0 %1906 }
0x2072   :  { %v1909_v33 = vmul.f32 %v6833_v30, %v1907_v31  ;;  %v2150_v31 = vld [vmem:[%s8468_s8 + $0x18] sm:$0xff] }
0x2074   :  { %1911 = vrot.lane.b32.xlu1 %v1909_v33, %s7294_s3  ;;  %v2147_v33 = vld [vmem:[%s8468_s8] sm:$0xff] }
0x20e6   :  { %v1912_v35 = vpop.permute.xlu1 %1911 }
0x20e7   :  { %v1914_v36 = vadd.f32 %v1912_v35, %v1904_v13  ;;  %v2149_v13 = vld [vmem:[%s8468_s8 + $0x10] sm:$0xff]  ;;  %v2152_v35 = vld [vmem:[%s8468_s8 + $0x28] sm:$0xff] }
0x20e9   :  { %6834 = vtanh.f32 %v1914_v36  ;;  %v2013_v61 = vrot.slane %v1914_v36, 2  ;;  %v2154_v36 = vld [vmem:[%s8468_s8 + $0x38] sm:$0xff] }
0x20f3   :  { %v6835_v37 = vpop.eup %6834 }
0x20f4   :  { %1917 = vrot.lane.b32.xlu0 %v6835_v37, %s7293_s21  ;;  %v6460_v37 = vpack.c.bf16 %v2149_v13, %v2147_v33  ;;  %v1228_v33 = vrot.slane %v7766_v18, 2 }
0x2166   :  { %v1918_v39 = vpop.permute.xlu0 %1917 }
0x2167   :  { %v1920_v41 = vmul.f32 %v6833_v30, %v1918_v39  ;;  %v6462_v39 = vpack.c.bf16 %v2154_v36, %v2152_v35  ;;  %v1230_v36 = vadd.f32 %v1228_v33, %v7621_v46 }
0x2169   :  { %v1926_v42 = vrot.slane %v1920_v41, 4 }
0x216b   :  { %1927 = vrot.lane.b32.xlu1 %v1926_v42, %s7294_s3  ;;  %v2153_v42 = vld [vmem:[%s8468_s8 + $0x30] sm:$0xff] }
0x21dd   :  { %v1928_v44 = vpop.permute.xlu1 %1927 }
0x21de   :  { %6048 = vmatmul.mubr.msk.f32.vlgmr.msra.gmra.mrb[16].mxu0 %vm387_vm4, %v1928_v44 }
0x21df   :  { %2246 = vmatprep.mubr.f32.mxu0 %v7290_v0 }
0x22b1   :  { %v1997_v45 = vpop.f32.mrb[16].mxu0 }
0x22b2   :  { %v2002_v49 = vrot.slane %v1997_v45, 6  ;;  %v6049_v50 = vpop.f32.mrb[17].mxu0  ;;  %v2156_v45 = vld [vmem:[%s8468_s8 + $0x48] sm:$0xff] }
0x22b4   :  { %v2004_v51 = vadd.f32 %v2002_v49, %v7618_v40  ;;  %v2158_v49 = vld [vmem:[%s8468_s8 + $0x58] sm:$0xff] }
0x22b5   :  { %v6466_v50 = vpack.c.bf16 %v2158_v49, %v2156_v45 }
0x22b6   :  { %6836 = vtanh.f32 %v2004_v51  ;;  %v5585_v53 = vmul.f32 -1.442695, %v2004_v51  ;;  %v2157_v51 = vld [vmem:[%s8468_s8 + $0x50] sm:$0xff] }
0x22b8   :  { %6838 = vpow2.f32 %v5585_v53  ;;  %v2260_v53 = vld [vmem:[#allocation10 + $0x8] sm:$0xff] }
0x22c0   :  { %v6837_v47 = vpop.eup %6836 }
0x22c1   :  { %2017 = vrot.lane.b32.xlu0 %v6837_v47, %s7293_s21  ;;  %v2259_v47 = vld [vmem:[#allocation10] sm:$0xff] }
0x22c2   :  { %v6839_v55 = vpop.eup %6838 }
0x22c3   :  { %v2008_v57 = vadd.f32 1.0, %v6839_v55  ;;  %v7898_v55 = vpack.c.bf16 %v2260_v53, %v2259_v47 }
0x22c5   :  { %6840 = vrcp.f32 %v2008_v57  ;;  %v2160_v57 = vld [vmem:[%s8468_s8 + $0x68] sm:$0xff] }
0x22cf   :  { %v6841_v58 = vpop.eup %6840 }
0x22d0   :  { %v2015_v62 = vmul.f32 %v6841_v58, %v2013_v61  ;;  %v2161_v61 = vld [vmem:[%s8468_s8 + $0x70] sm:$0xff] }
0x2333   :  { %v2018_v59 = vpop.permute.xlu0 %2017 }
0x2334   :  { %v2020_v60 = vmul.f32 %v6841_v58, %v2018_v59  ;;  %v2159_v59 = vld [vmem:[%s8468_s8 + $0x60] sm:$0xff] }
0x2336   :  { %2022 = vrot.lane.b32.xlu1 %v2020_v60, %s7294_s3 }
0x23a8   :  { %v2023_v38 = vpop.permute.xlu1 %2022 }
0x23a9   :  { %v2025_v2 = vadd.f32 %v2023_v38, %v2015_v62  ;;  %v2261_v62 = vld [vmem:[#allocation10 + $0x10] sm:$0xff]  ;;  %v2262_v38 = vld [vmem:[#allocation10 + $0x18] sm:$0xff] }
0x23ab   :  { %6842 = vtanh.f32 %v2025_v2 }
0x23b5   :  { %v6843_v3 = vpop.eup %6842 }
0x23b6   :  { %2028 = vrot.lane.b32.xlu0 %v6843_v3, %s7293_s21  ;;  %v7913_v3 = vpack.c.bf16 %v2262_v38, %v2261_v62 }
0x2428   :  { %v2029_v4 = vpop.permute.xlu0 %2028 }
0x2429   :  { %v2031_v5 = vmul.f32 %v6841_v58, %v2029_v4  ;;  %v2162_v58 = vld [vmem:[%s8468_s8 + $0x78] sm:$0xff] }
0x242a   :  { %v6470_v60 = vpack.c.bf16 %v2162_v58, %v2160_v57 }
0x242b   :  { %v2037_v6 = vrot.slane %v2031_v5, 2 }
0x242d   :  { %2038 = vrot.lane.b32.xlu1 %v2037_v6, %s7294_s3 }
0x249f   :  { %v2039_v7 = vpop.permute.xlu1 %2038 }
0x24a0   :  { %6059 = vmatmul.mubr.msk.f32.vlgmr.msra.gmra.mrb[20].mxu1 %vm387_vm4, %v2039_v7 }
0x24a1   :  { %6069 = vmatprep.mubr.msk.f32.mxu1 %vm7292_vm2, %v7290_v0  ;;  %6476 = vmatpush3.bf16.msra.mxu1 %v7898_v55 }
0x24a2   :  { %6477 = vmatprep.subr.bf16.mxu1 %v7291_v12 }
0x24a5   :  { %6479 = vmatpush3.bf16.msra.mxu1 %v7913_v3 }
0x24a6   :  { %6480 = vmatprep.subr.bf16.mxu1 %v7291_v12 }
0x24a8   :  { %6070 = vmatmul.mubr.f32.vlgmr.msra.gmra.mrb[22].mxu1 %v7290_v0 }
0x24a9   :  { %6482 = vmatpush3.bf16.msra.mxu1 %v7898_v55  ;;  %6080 = vmatprep.mubr.msk.f32.mxu1 %vm7292_vm2, %v7290_v0 }
0x24aa   :  { %6483 = vmatprep.subr.bf16.mxu1 %v7291_v12 }
0x24ad   :  { %6485 = vmatpush3.bf16.msra.mxu1 %v7913_v3 }
0x24ae   :  { %6492 = vmatprep.subr.bf16.mxu1 %v7291_v12 }
0x2573   :  { %v2108_v8 = vpop.f32.mrb[20].mxu1 }
0x2574   :  { %v2112_v9 = vadd.f32 %v2108_v8, %v7618_v40  ;;  %v6060_v10 = vpop.f32.mrb[21].mxu1  ;;  %v2121_v40 = vrot.slane %v2025_v2, 2  ;;  %v6472_v2 = vpack.c.bf16 %v2161_v61, %v2159_v59 }
0x2576   :  { %6844 = vtanh.f32 %v2112_v9  ;;  %v5587_v15 = vmul.f32 -1.442695, %v2112_v9 }
0x2578   :  { %6846 = vpow2.f32 %v5587_v15 }
0x257b   :  { %v2329_v15 = vpop.f32.mrb[22].mxu1 }
0x2580   :  { %v6845_v11 = vpop.eup %6844 }
0x2581   :  { %2125 = vrot.lane.b32.xlu0 %v6845_v11, %s7293_s21 }
0x2582   :  { %v6847_v16 = vpop.eup %6846 }
0x2583   :  { %v2116_v17 = vadd.f32 1.0, %v6847_v16  ;;  %v6071_v16 = vpop.f32.mrb[23].mxu1 }
0x2585   :  { %6848 = vrcp.f32 %v2116_v17  ;;  %v7939_v17 = vld [vmem:[#allocation9] sm:$0x3] }
0x258f   :  { %v7844_v20 = vpop.eup %6848 }
0x2590   :  { %v2123_v24 = vmul.f32 %v7844_v20, %v2121_v40 }
0x25f3   :  { %v2126_v21 = vpop.permute.xlu0 %2125 }
0x25f4   :  { %v2128_v22 = vmul.f32 %v7844_v20, %v2126_v21 }
0x25f6   :  { %2130 = vrot.lane.b32.xlu1 %v2128_v22, %s7294_s3 }
0x25fa   :  { %596 = vrot.lane.b32.xlu1 %v7641_v19, %s7294_s3 }
0x25fe   :  { %820 = vrot.lane.b32.xlu1 %v7671_v1, %s7294_s3  ;;  %v2148_v1 = vld [vmem:[%s8468_s8 + $0x8] sm:$0xff] }
0x25ff   :  { %v6458_v56 = vpack.c.bf16 %v2150_v31, %v2148_v1 }
0x2601   :  { %6459 = vmatprep.subr.bf16.mxu0 %v6458_v56 }
0x2602   :  { %1922 = vrot.lane.b32.xlu1 %v1920_v41, %s7293_s21  ;;  %v2151_v41 = vld [vmem:[%s8468_s8 + $0x20] sm:$0xff]  ;;  %6461 = vmatpush1.bf16.msra.mxu0 %v6460_v37 }
0x2603   :  { %v6464_v44 = vpack.c.bf16 %v2153_v42, %v2151_v41  ;;  %6463 = vmatprep.subr.bf16.mxu0 %v6462_v39  ;;  %v5568_v41 = vmul.f32 -1.442695, %v1230_v36 }
0x2606   :  { %6465 = vmatpush1.bf16.msra.mxu0 %v6464_v44 }
0x2607   :  { %6467 = vmatprep.subr.bf16.mxu0 %v6466_v50 }
0x2668   :  { %v2131_v25 = vpop.permute.xlu1 %2130 }
0x2669   :  { %v2133_v52 = vadd.f32 %v2131_v25, %v2123_v24 }
0x266b   :  { %6850 = vtanh.f32 %v2133_v52 }
0x266c   :  { %v597_v29 = vpop.permute.xlu1 %596 }
0x266d   :  { %600 = vst.msk [vmem:[#allocation2] sm:$0xc] %vm599_vm5, %v597_v29 }
0x2670   :  { %v821_v30 = vpop.permute.xlu1 %820 }
0x2671   :  { %824 = vst.msk [vmem:[#allocation2] sm:$0xc0] %vm823_vm6, %v821_v30 }
0x2674   :  { %v1923_v7 = vpop.permute.xlu1 %1922 }
0x2675   :  { %v6851_v19 = vpop.eup %6850 }
0x2676   :  { %2136 = vrot.lane.b32.xlu0 %v6851_v19, %s7293_s21 }
0x267a   :  { %708 = vrot.lane.b32.xlu0 %v7656_v43, %s7294_s3  ;;  %v2155_v43 = vld [vmem:[%s8468_s8 + $0x40] sm:$0xff]  ;;  %s7295_s8 = smov 48  }
0x267e   :  { %1811 = vrot.lane.b32.xlu0 %v7816_v14, %s7293_s21  ;;  %v6468_v14 = vpack.c.bf16 %v2157_v51, %v2155_v43  ;;  %v1239_v51 = vrot.slane %v7739_v23, 6 }
0x2680   :  { %6469 = vmatpush1.bf16.msra.mxu0 %v6468_v14 }
0x2681   :  { %6471 = vmatprep.subr.bf16.mxu0 %v6470_v60 }
0x2682   :  { %2033 = vrot.lane.b32.xlu0 %v2031_v5, %s7293_s21 }
0x2684   :  { %6473 = vmatpush1.bf16.msra.mxu0 %v6472_v2 }
0x2685   :  { %6486 = vmatprep.subr.bf16.mxu0 %v7291_v12 }
0x26e8   :  { %v2137_v4 = vpop.permute.xlu0 %2136 }
0x26e9   :  { %v2139_v5 = vmul.f32 %v7844_v20, %v2137_v4  ;;  %v7943_v20 = vrot.slane %v7939_v17, %v7610_v26 }
0x26eb   :  { %2141 = vrot.lane.b32.xlu1 %v2139_v5, %s7293_s21 }
0x26ec   :  { %v709_v6 = vpop.permute.xlu0 %708 }
0x26ed   :  { %712 = vst.msk [vmem:[#allocation2] sm:$0x30] %vm711_vm7, %v709_v6 }
0x26ee   :  { %1925 = vst.msk [vmem:[#allocation2] sm:$0x30] %vm1482_vm8, %v1923_v7 }
0x26f0   :  { %v1812_v8 = vpop.permute.xlu0 %1811 }
0x26f1   :  { %1814 = vst.msk [vmem:[#allocation2] sm:$0xc0] %vm1370_vm9, %v1812_v8 }
0x26f4   :  { %v2034_v9 = vpop.permute.xlu0 %2033 }
0x26f5   :  { %2036 = vst.msk [vmem:[#allocation2] sm:$0xc] %vm1594_vm10, %v2034_v9 }
0x275d   :  { %v2142_v10 = vpop.permute.xlu1 %2141 }
0x275e   :  { %2144 = vst.msk [vmem:[#allocation2] sm:$0x3] %vm1703_vm11, %v2142_v10 }
0x2765   :  { %v2145_v11 = vld [vmem:[#allocation2] sm:$0xff] }
0x2766   :  { %5588 = vmatmul.mubr.msk.f32.vlgmr.msra.gmra.mrb[18].mxu0 %vm2175_vm12, %v2145_v11 }
0x2767   :  { %2252 = vmatprep.mubr.f32.mxu0 %v7290_v0  ;;  %6488 = vmatpush3.bf16.msra.mxu0 %v7898_v55 }
0x2768   :  { %6489 = vmatprep.subr.bf16.mxu0 %v7291_v12 }
0x276b   :  { %6491 = vmatpush3.bf16.msra.mxu0 %v7913_v3 }
0x276c   :  { %6498 = vmatprep.subr.bf16.mxu0 %v7291_v12 }
0x2839   :  { %v2248_v21 = vpop.f32.mrb[18].mxu0 }
0x283a   :  { %v7946_v22 = vadd.f32 %v2248_v21, %v7943_v20  ;;  %v7948_v40 = vpop.f32.mrb[19].mxu0 }
0x283c   :  { %v2333_v24 = vadd.f32 %v2329_v15, %v7946_v22 }
0x283e   :  { %6852 = vtanh.f32 %v2333_v24  ;;  %v5590_v52 = vmul.f32 -1.442695, %v2333_v24 }
0x2840   :  { %6854 = vpow2.f32 %v5590_v52 }
0x2848   :  { %v6853_v25 = vpop.eup %6852 }
0x2849   :  { %2343 = vrot.lane.b32.xlu0 %v6853_v25, %s7293_s21 }
0x284a   :  { %v6855_v29 = vpop.eup %6854 }
0x284b   :  { %v2337_v30 = vadd.f32 1.0, %v6855_v29 }
0x284d   :  { %6856 = vrcp.f32 %v2337_v30 }
0x2857   :  { %v6857_v19 = vpop.eup %6856 }
0x2858   :  { %v2341_v56 = vmul.f32 0.0, %v6857_v19 }
0x28bb   :  { %v2344_v1 = vpop.permute.xlu0 %2343 }
0x28bc   :  { %v2346_v31 = vmul.f32 %v6857_v19, %v2344_v1 }
0x28be   :  { %2348 = vrot.lane.b32.xlu1 %v2346_v31, %s7294_s3 }
0x2930   :  { %v2349_v13 = vpop.permute.xlu1 %2348 }
0x2931   :  { %v7954_v35 = vadd.f32 %v2349_v13, %v2341_v56 }
0x2933   :  { %6858 = vtanh.f32 %v7954_v35  ;;  %v2447_v10 = vrot.slane %v7954_v35, 6 }
0x2934   :  { %6860 = vtanh.f32 %v1230_v36 }
0x2935   :  { %6862 = vpow2.f32 %v5568_v41 }
0x293d   :  { %v6859_v37 = vpop.eup %6858 }
0x293e   :  { %2354 = vrot.lane.b32.xlu0 %v6859_v37, %s7293_s21  ;;  %v6861_v39 = vpop.eup %6860 }
0x293f   :  { %v6863_v42 = vpop.eup %6862 }
0x2940   :  { %v1234_v44 = vadd.f32 1.0, %v6863_v42 }
0x2942   :  { %1243 = vrot.lane.b32.xlu0 %v6861_v39, %s7293_s21  ;;  %6864 = vrcp.f32 %v1234_v44 }
0x294c   :  { %v6865_v49 = vpop.eup %6864 }
0x294d   :  { %v1241_v14 = vmul.f32 %v6865_v49, %v1239_v51 }
0x29b0   :  { %v2355_v18 = vpop.permute.xlu0 %2354 }
0x29b1   :  { %v2357_v45 = vmul.f32 %v6857_v19, %v2355_v18 }
0x29b3   :  { %2359 = vrot.lane.b32.xlu1 %v2357_v45, %s7294_s3 }
0x29b4   :  { %v1244_v46 = vpop.permute.xlu0 %1243 }
0x29b5   :  { %v1246_v50 = vmul.f32 %v6865_v49, %v1244_v46 }
0x29b7   :  { %1248 = vrot.lane.b32.xlu0 %v1246_v50, %s7294_s3 }
0x2a25   :  { %v2360_v43 = vpop.permute.xlu1 %2359 }
0x2a26   :  { %2362 = vst.msk [vmem:[#allocation3] sm:$0x3] %vm490_vm3, %v2360_v43  ;;  %6081 = vmatmul.mubr.msk.f32.vlgmr.msra.gmra.mrb[24].mxu1 %vm387_vm4, %v2360_v43 }
0x2a27   :  { %6494 = vmatpush3.bf16.msra.mxu1 %v7898_v55  ;;  %6102 = vmatprep.mubr.msk.f32.mxu1 %vm7292_vm2, %v7290_v0 }
0x2a28   :  { %6495 = vmatprep.subr.bf16.mxu1 %v7291_v12 }
0x2a29   :  { %v1249_v47 = vpop.permute.xlu0 %1248 }
0x2a2a   :  { %v1251_v53 = vadd.f32 %v1249_v47, %v1241_v14 }
0x2a2b   :  { %6497 = vmatpush3.bf16.msra.mxu1 %v7913_v3 }
0x2a2c   :  { %6866 = vtanh.f32 %v1251_v53  ;;  %6504 = vmatprep.subr.bf16.mxu1 %v7291_v12 }
0x2a36   :  { %v6867_v23 = vpop.eup %6866 }
0x2a37   :  { %1254 = vrot.lane.b32.xlu0 %v6867_v23, %s7293_s21 }
0x2a3b   :  { %1037 = vrot.lane.b32.xlu0 %v7699_v48, %s7294_s3 }
0x2aa9   :  { %v1255_v57 = vpop.permute.xlu0 %1254 }
0x2aaa   :  { %v1257_v58 = vmul.f32 %v6865_v49, %v1255_v57 }
0x2aac   :  { %1259 = vrot.lane.b32.xlu0 %v1257_v58, %s7294_s3 }
0x2aad   :  { %v1038_v59 = vpop.permute.xlu0 %1037 }
0x2aae   :  { %1040 = vst.msk [vmem:[#allocation2 + $0x8] sm:$0xc] %vm599_vm5, %v1038_v59 }
0x2ab0   :  { %1479 = vrot.lane.b32.xlu0 %v7772_v63, %s7293_s21 }
0x2ab4   :  { %1700 = vrot.lane.b32.xlu0 %v7802_v54, %s7293_s21 }
0x2af9   :  { %v2431_v60 = vpop.f32.mrb[24].mxu1 }
0x2afa   :  { %v2436_v61 = vrot.slane %v2431_v60, 6  ;;  %v6082_v62 = vpop.f32.mrb[25].mxu1 }
0x2afc   :  { %v2438_v38 = vadd.f32 %v2436_v61, %v7946_v22 }
0x2afe   :  { %6868 = vtanh.f32 %v2438_v38  ;;  %v5592_v63 = vmul.f32 -1.442695, %v2438_v38 }
0x2b00   :  { %6870 = vpow2.f32 %v5592_v63 }
0x2b08   :  { %v6869_v48 = vpop.eup %6868 }
0x2b09   :  { %2451 = vrot.lane.b32.xlu1 %v6869_v48, %s7293_s21 }
0x2b0a   :  { %v6871_v6 = vpop.eup %6870 }
0x2b0b   :  { %v2442_v54 = vadd.f32 1.0, %v6871_v6 }
0x2b0d   :  { %6872 = vrcp.f32 %v2442_v54 }
0x2b17   :  { %v6873_v7 = vpop.eup %6872 }
0x2b18   :  { %v2449_v11 = vmul.f32 %v6873_v7, %v2447_v10 }
0x2b1e   :  { %v1260_v2 = vpop.permute.xlu0 %1259 }
0x2b1f   :  { %1262 = vst.msk [vmem:[#allocation2 + $0x8] sm:$0xc0] %vm823_vm6, %v1260_v2 }
0x2b22   :  { %v1480_v4 = vpop.permute.xlu0 %1479 }
0x2b26   :  { %v1701_v5 = vpop.permute.xlu0 %1700 }
0x2b27   :  { %1704 = vst.msk [vmem:[#allocation2 + $0x8] sm:$0x3] %vm1703_vm11, %v1701_v5 }
0x2b7b   :  { %v2452_v8 = vpop.permute.xlu1 %2451 }
0x2b7c   :  { %v2454_v9 = vmul.f32 %v6873_v7, %v2452_v8 }
0x2b7e   :  { %2456 = vrot.lane.b32.xlu1 %v2454_v9, %s7294_s3 }
0x2bf0   :  { %v2457_v15 = vpop.permute.xlu1 %2456 }
0x2bf1   :  { %v2459_v16 = vadd.f32 %v2457_v15, %v2449_v11 }
0x2bf3   :  { %6874 = vtanh.f32 %v2459_v16  ;;  %v2558_v18 = vrot.slane %v2459_v16, 6 }
0x2bfd   :  { %v6875_v21 = vpop.eup %6874 }
0x2bfe   :  { %2462 = vrot.lane.b32.xlu1 %v6875_v21, %s7293_s21 }
0x2c02   :  { %1148 = vrot.lane.b32.xlu1 %v7744_v32, %s7294_s3 }
0x2c06   :  { %1367 = vrot.lane.b32.xlu1 %v7748_v34, %s7293_s21 }
0x2c0a   :  { %1591 = vrot.lane.b32.xlu1 %v7787_v27, %s7293_s21 }
0x2c70   :  { %v2463_v24 = vpop.permute.xlu1 %2462 }
0x2c71   :  { %v7993_v25 = vmul.f32 %v6873_v7, %v2463_v24 }
0x2c73   :  { %v2471_v52 = vrot.slane %v7993_v25, 2 }
0x2c74   :  { %v1149_v29 = vpop.permute.xlu1 %1148 }
0x2c75   :  { %1151 = vst.msk [vmem:[#allocation2 + $0x8] sm:$0x30] %vm711_vm7, %v1149_v29  ;;  %2472 = vrot.lane.b32.xlu1 %v2471_v52, %s7294_s3 }
0x2c76   :  { %1483 = vst.msk [vmem:[#allocation2 + $0x8] sm:$0x30] %vm1482_vm8, %v1480_v4 }
0x2c78   :  { %v1368_v30 = vpop.permute.xlu1 %1367 }
0x2c79   :  { %1371 = vst.msk [vmem:[#allocation2 + $0x8] sm:$0xc0] %vm1370_vm9, %v1368_v30 }
0x2c7c   :  { %v1592_v32 = vpop.permute.xlu1 %1591 }
0x2c7d   :  { %1595 = vst.msk [vmem:[#allocation2 + $0x8] sm:$0xc] %vm1594_vm10, %v1592_v32 }
0x2c84   :  { %v2146_v34 = vld [vmem:[#allocation2 + $0x8] sm:$0xff] }
0x2c85   :  { %5589 = vmatmul.mubr.msk.f32.gmra.mrb[20].mxu0 %vm2175_vm12, %v2146_v34 }
0x2c86   :  { %6091 = vmatprep.mubr.msk.f32.mxu0 %vm7292_vm2, %v7290_v0 }
0x2ce7   :  { %v2473_v27 = vpop.permute.xlu1 %2472 }
0x2ce8   :  { %6092 = vmatmul.mubr.msk.f32.vlgmr.msra.gmra.mrb[22].mxu0 %vm387_vm4, %v2473_v27 }
0x2ce9   :  { %6500 = vmatpush3.bf16.msra.mxu0 %v7898_v55  ;;  %6113 = vmatprep.mubr.msk.f32.mxu0 %vm7292_vm2, %v7290_v0 }
0x2cea   :  { %6501 = vmatprep.subr.bf16.mxu0 %v7291_v12 }
0x2ced   :  { %6503 = vmatpush3.bf16.msra.mxu0 %v7913_v3 }
0x2cee   :  { %6510 = vmatprep.subr.bf16.mxu0 %v7291_v12 }
0x2d58   :  { %v8011_v19 = vpop.f32.mrb[20].mxu0 }
0x2d59   :  { %v8013_v1 = vpop.f32.mrb[21].mxu0  ;;  %v8047_v10 = vadd.f32 %v8011_v19, %v7943_v20 }
0x2dbb   :  { %v2542_v31 = vpop.f32.mrb[22].mxu0 }
0x2dbc   :  { %v2547_v33 = vrot.slane %v2542_v31, 4  ;;  %v6093_v56 = vpop.f32.mrb[23].mxu0 }
0x2dbe   :  { %v2549_v13 = vadd.f32 %v2547_v33, %v7946_v22 }
0x2dc0   :  { %6876 = vtanh.f32 %v2549_v13  ;;  %v5594_v36 = vmul.f32 -1.442695, %v2549_v13 }
0x2dc2   :  { %6878 = vpow2.f32 %v5594_v36 }
0x2dca   :  { %v6877_v35 = vpop.eup %6876 }
0x2dcb   :  { %2562 = vrot.lane.b32.xlu0 %v6877_v35, %s7293_s21 }
0x2dcc   :  { %v6879_v37 = vpop.eup %6878 }
0x2dcd   :  { %v2553_v39 = vadd.f32 1.0, %v6879_v37 }
0x2dcf   :  { %6880 = vrcp.f32 %v2553_v39 }
0x2dd9   :  { %v6881_v41 = vpop.eup %6880 }
0x2dda   :  { %v2560_v45 = vmul.f32 %v6881_v41, %v2558_v18 }
0x2e3d   :  { %v2563_v42 = vpop.permute.xlu0 %2562 }
0x2e3e   :  { %v2565_v44 = vmul.f32 %v6881_v41, %v2563_v42 }
0x2e40   :  { %2567 = vrot.lane.b32.xlu1 %v2565_v44, %s7294_s3 }
0x2eb2   :  { %v2568_v49 = vpop.permute.xlu1 %2567 }
0x2eb3   :  { %v2570_v46 = vadd.f32 %v2568_v49, %v2560_v45 }
0x2eb5   :  { %6882 = vtanh.f32 %v2570_v46  ;;  %v2669_v4 = vrot.slane %v2570_v46, 6 }
0x2ebf   :  { %v6883_v50 = vpop.eup %6882 }
0x2ec0   :  { %2573 = vrot.lane.b32.xlu0 %v6883_v50, %s7293_s21 }
0x2f32   :  { %v2574_v43 = vpop.permute.xlu0 %2573 }
0x2f33   :  { %v8019_v51 = vmul.f32 %v6881_v41, %v2574_v43 }
0x2f35   :  { %v2582_v14 = vrot.slane %v8019_v51, 4 }
0x2f37   :  { %2583 = vrot.lane.b32.xlu1 %v2582_v14, %s7294_s3 }
0x2fa9   :  { %v2584_v47 = vpop.permute.xlu1 %2583 }
0x2faa   :  { %6103 = vmatmul.mubr.msk.f32.vlgmr.msra.gmra.mrb[26].mxu1 %vm387_vm4, %v2584_v47 }
0x2fab   :  { %6506 = vmatpush3.bf16.msra.mxu1 %v7898_v55  ;;  %6124 = vmatprep.mubr.msk.f32.mxu1 %vm7292_vm2, %v7290_v0 }
0x2fac   :  { %6507 = vmatprep.subr.bf16.mxu1 %v7291_v12 }
0x2faf   :  { %6509 = vmatpush3.bf16.msra.mxu1 %v7913_v3 }
0x2fb0   :  { %6516 = vmatprep.subr.bf16.mxu1 %v7291_v12 }
0x307d   :  { %v2653_v53 = vpop.f32.mrb[26].mxu1 }
0x307e   :  { %v2658_v23 = vrot.slane %v2653_v53, 2  ;;  %v6104_v57 = vpop.f32.mrb[27].mxu1 }
0x3080   :  { %v2660_v58 = vadd.f32 %v2658_v23, %v7946_v22 }
0x3082   :  { %6884 = vtanh.f32 %v2660_v58  ;;  %v5596_v60 = vmul.f32 -1.442695, %v2660_v58  ;;  %v3132_v58 = vld [vmem:[#allocation10 + $0x20] sm:$0xff] }
0x3084   :  { %6886 = vpow2.f32 %v5596_v60 }
0x308c   :  { %v6885_v59 = vpop.eup %6884 }
0x308d   :  { %2673 = vrot.lane.b32.xlu0 %v6885_v59, %s7293_s21  ;;  %v3133_v59 = vld [vmem:[#allocation10 + $0x28] sm:$0xff] }
0x308e   :  { %v6887_v61 = vpop.eup %6886  ;;  %v8073_v60 = vpack.c.bf16 %v3133_v59, %v3132_v58 }
0x308f   :  { %v2664_v62 = vadd.f32 1.0, %v6887_v61  ;;  %v3134_v61 = vld [vmem:[#allocation10 + $0x30] sm:$0xff] }
0x3091   :  { %6888 = vrcp.f32 %v2664_v62  ;;  %v3135_v62 = vld [vmem:[#allocation10 + $0x38] sm:$0xff] }
0x309b   :  { %v6889_v38 = vpop.eup %6888 }
0x309c   :  { %v2671_v5 = vmul.f32 %v6889_v38, %v2669_v4 }
0x30ff   :  { %v2674_v48 = vpop.permute.xlu0 %2673 }
0x3100   :  { %v2676_v2 = vmul.f32 %v6889_v38, %v2674_v48  ;;  %v8077_v48 = vpack.c.bf16 %v3135_v62, %v3134_v61 }
0x3102   :  { %2678 = vrot.lane.b32.xlu1 %v2676_v2, %s7294_s3 }
0x3174   :  { %v2679_v63 = vpop.permute.xlu1 %2678 }
0x3175   :  { %v2681_v6 = vadd.f32 %v2679_v63, %v2671_v5 }
0x3177   :  { %6890 = vtanh.f32 %v2681_v6  ;;  %v2777_v20 = vrot.slane %v2681_v6, 6  ;;  %v8094_v6 = vrot.slane %v7939_v17, %v7612_v28 }
0x3181   :  { %v6891_v22 = vpop.eup %6890 }
0x3182   :  { %2684 = vrot.lane.b32.xlu0 %v6891_v22, %s7293_s21 }
0x31f4   :  { %v2685_v54 = vpop.permute.xlu0 %2684 }
0x31f5   :  { %v8034_v7 = vmul.f32 %v6889_v38, %v2685_v54  ;;  %v8098_v54 = vadd.f32 %v8013_v1, %v8094_v6 }
0x31f7   :  { %v2693_v8 = vrot.slane %v8034_v7, 6 }
0x31f9   :  { %2694 = vrot.lane.b32.xlu1 %v2693_v8, %s7294_s3 }
0x326b   :  { %v2695_v9 = vpop.permute.xlu1 %2694 }
0x326c   :  { %6114 = vmatmul.mubr.msk.f32.vlgmr.msra.gmra.mrb[24].mxu0 %vm387_vm4, %v2695_v9 }
0x326d   :  { %6512 = vmatpush3.bf16.msra.mxu0 %v7898_v55  ;;  %6135 = vmatprep.mubr.msk.f32.mxu0 %vm7292_vm2, %v7290_v0 }
0x326e   :  { %6513 = vmatprep.subr.bf16.mxu0 %v7291_v12 }
0x3271   :  { %6515 = vmatpush3.bf16.msra.mxu0 %v7913_v3 }
0x3272   :  { %6522 = vmatprep.subr.bf16.mxu0 %v7291_v12 }
0x333f   :  { %v2764_v11 = vpop.f32.mrb[24].mxu0 }
0x3340   :  { %v2768_v15 = vadd.f32 %v2764_v11, %v8047_v10  ;;  %v6115_v16 = vpop.f32.mrb[25].mxu0 }
0x3342   :  { %6892 = vtanh.f32 %v2768_v15  ;;  %v5598_v24 = vmul.f32 -1.442695, %v2768_v15 }
0x3344   :  { %6894 = vpow2.f32 %v5598_v24 }
0x334c   :  { %v6893_v21 = vpop.eup %6892 }
0x334d   :  { %2781 = vrot.lane.b32.xlu0 %v6893_v21, %s7293_s21 }
0x334e   :  { %v6895_v52 = vpop.eup %6894 }
0x334f   :  { %v2772_v29 = vadd.f32 1.0, %v6895_v52 }
0x3351   :  { %6896 = vrcp.f32 %v2772_v29 }
0x335b   :  { %v6897_v30 = vpop.eup %6896 }
0x335c   :  { %v2779_v27 = vmul.f32 %v6897_v30, %v2777_v20 }
0x33bf   :  { %v2782_v32 = vpop.permute.xlu0 %2781 }
0x33c0   :  { %v2784_v34 = vmul.f32 %v6897_v30, %v2782_v32 }
0x33c2   :  { %2786 = vrot.lane.b32.xlu1 %v2784_v34, %s7294_s3 }
0x3434   :  { %v2787_v19 = vpop.permute.xlu1 %2786 }
0x3435   :  { %v2789_v31 = vadd.f32 %v2787_v19, %v2779_v27 }
0x3437   :  { %6898 = vtanh.f32 %v2789_v31 }
0x3441   :  { %v6899_v33 = vpop.eup %6898 }
0x3442   :  { %2792 = vrot.lane.b32.xlu0 %v6899_v33, %s7293_s21 }
0x34b4   :  { %v2793_v56 = vpop.permute.xlu0 %2792 }
0x34b5   :  { %v2795_v13 = vmul.f32 %v6897_v30, %v2793_v56 }
0x34b7   :  { %2797 = vrot.lane.b32.xlu1 %v2795_v13, %s7294_s3 }
0x3529   :  { %v2798_v35 = vpop.permute.xlu1 %2797 }
0x352a   :  { %2800 = vst.msk [vmem:[#allocation3 + $0x8] sm:$0x3] %vm490_vm3, %v2798_v35  ;;  %6125 = vmatmul.mubr.msk.f32.vlgmr.msra.gmra.mrb[28].mxu1 %vm387_vm4, %v2798_v35 }
0x352b   :  { %6518 = vmatpush3.bf16.msra.mxu1 %v7898_v55  ;;  %6146 = vmatprep.mubr.msk.f32.mxu1 %vm7292_vm2, %v7290_v0 }
0x352c   :  { %6519 = vmatprep.subr.bf16.mxu1 %v7291_v12 }
0x352f   :  { %6521 = vmatpush3.bf16.msra.mxu1 %v7913_v3  ;;  %v2885_v3 = vrot.slane %v2789_v31, 6 }
0x3530   :  { %6528 = vmatprep.subr.bf16.mxu1 %v7291_v12 }
0x35fd   :  { %v2869_v36 = vpop.f32.mrb[28].mxu1 }
0x35fe   :  { %v2874_v37 = vrot.slane %v2869_v36, 6  ;;  %v6126_v39 = vpop.f32.mrb[29].mxu1 }
0x3600   :  { %v2876_v41 = vadd.f32 %v2874_v37, %v8047_v10 }
0x3602   :  { %6900 = vtanh.f32 %v2876_v41  ;;  %v5600_v44 = vmul.f32 -1.442695, %v2876_v41 }
0x3604   :  { %6902 = vpow2.f32 %v5600_v44 }
0x360c   :  { %v6901_v42 = vpop.eup %6900 }
0x360d   :  { %2889 = vrot.lane.b32.xlu0 %v6901_v42, %s7293_s21 }
0x360e   :  { %v6903_v55 = vpop.eup %6902 }
0x360f   :  { %v2880_v18 = vadd.f32 1.0, %v6903_v55 }
0x3611   :  { %6904 = vrcp.f32 %v2880_v18 }
0x361b   :  { %v6905_v45 = vpop.eup %6904 }
0x361c   :  { %v2887_v50 = vmul.f32 %v6905_v45, %v2885_v3 }
0x367f   :  { %v2890_v49 = vpop.permute.xlu0 %2889 }
0x3680   :  { %v2892_v46 = vmul.f32 %v6905_v45, %v2890_v49 }
0x3682   :  { %2894 = vrot.lane.b32.xlu1 %v2892_v46, %s7294_s3 }
0x36f4   :  { %v2895_v43 = vpop.permute.xlu1 %2894 }
0x36f5   :  { %v8065_v14 = vadd.f32 %v2895_v43, %v2887_v50 }
0x36f7   :  { %6906 = vtanh.f32 %v8065_v14  ;;  %v2996_v31 = vrot.slane %v8065_v14, 6 }
0x3701   :  { %v6907_v47 = vpop.eup %6906 }
0x3702   :  { %2900 = vrot.lane.b32.xlu0 %v6907_v47, %s7293_s21 }
0x3774   :  { %v2901_v53 = vpop.permute.xlu0 %2900 }
0x3775   :  { %v8069_v23 = vmul.f32 %v6905_v45, %v2901_v53 }
0x3777   :  { %v2909_v57 = vrot.slane %v8069_v23, 2 }
0x3779   :  { %2910 = vrot.lane.b32.xlu1 %v2909_v57, %s7294_s3 }
0x37eb   :  { %v2911_v38 = vpop.permute.xlu1 %2910 }
0x37ec   :  { %6136 = vmatmul.mubr.msk.f32.vlgmr.msra.gmra.mrb[26].mxu0 %vm387_vm4, %v2911_v38 }
0x37ed   :  { %6524 = vmatpush3.bf16.msra.mxu0 %v8073_v60  ;;  %6157 = vmatprep.mubr.msk.f32.mxu0 %vm7292_vm2, %v7290_v0 }
0x37ee   :  { %6525 = vmatprep.subr.bf16.mxu0 %v7291_v12 }
0x37f1   :  { %6527 = vmatpush3.bf16.msra.mxu0 %v8077_v48 }
0x37f2   :  { %6534 = vmatprep.subr.bf16.mxu0 %v7291_v12 }
0x37f4   :  { %6158 = vmatmul.mubr.f32.vlgmr.msra.gmra.mrb[28].mxu0 %v7290_v0 }
0x37f5   :  { %6536 = vmatpush3.bf16.msra.mxu0 %v8073_v60  ;;  %6179 = vmatprep.mubr.msk.f32.mxu0 %vm7292_vm2, %v7290_v0 }
0x37f6   :  { %6537 = vmatprep.subr.bf16.mxu0 %v7291_v12 }
0x37f9   :  { %6539 = vmatpush3.bf16.msra.mxu0 %v8077_v48 }
0x37fa   :  { %6546 = vmatprep.subr.bf16.mxu0 %v7291_v12 }
0x38bf   :  { %v2980_v2 = vpop.f32.mrb[26].mxu0 }
0x38c0   :  { %v2985_v4 = vrot.slane %v2980_v2, 4  ;;  %v6137_v5 = vpop.f32.mrb[27].mxu0 }
0x38c2   :  { %v2987_v63 = vadd.f32 %v2985_v4, %v8047_v10 }
0x38c4   :  { %6908 = vtanh.f32 %v2987_v63  ;;  %v5602_v21 = vmul.f32 -1.442695, %v2987_v63 }
0x38c7   :  { %v3202_v22 = vpop.f32.mrb[28].mxu0 }
0x38c8   :  { %v3207_v8 = vrot.slane %v3202_v22, 2  ;;  %v6159_v9 = vpop.f32.mrb[29].mxu0 }
0x38ca   :  { %v3209_v11 = vadd.f32 %v3207_v8, %v8098_v54 }
0x38cc   :  { %6910 = vtanh.f32 %v3209_v11  ;;  %v5605_v17 = vmul.f32 -1.442695, %v3209_v11 }
0x38cd   :  { %6912 = vpow2.f32 %v5602_v21 }
0x38ce   :  { %v6909_v15 = vpop.eup %6908  ;;  %6914 = vpow2.f32 %v5605_v17 }
0x38cf   :  { %3000 = vrot.lane.b32.xlu0 %v6909_v15, %s7293_s21 }
0x38d6   :  { %v6911_v16 = vpop.eup %6910 }
0x38d7   :  { %3219 = vrot.lane.b32.xlu1 %v6911_v16, %s7293_s21  ;;  %v6913_v24 = vpop.eup %6912 }
0x38d8   :  { %v2991_v52 = vadd.f32 1.0, %v6913_v24  ;;  %v6915_v1 = vpop.eup %6914 }
0x38d9   :  { %v3213_v29 = vadd.f32 1.0, %v6915_v1 }
0x38da   :  { %6916 = vrcp.f32 %v2991_v52 }
0x38db   :  { %6918 = vrcp.f32 %v3213_v29 }
0x38e4   :  { %v6917_v30 = vpop.eup %6916 }
0x38e5   :  { %v6919_v20 = vpop.eup %6918  ;;  %v2998_v33 = vmul.f32 %v6917_v30, %v2996_v31 }
0x38e6   :  { %v3217_v35 = vmul.f32 0.0, %v6919_v20 }
0x3941   :  { %v3001_v32 = vpop.permute.xlu0 %3000 }
0x3942   :  { %v3003_v34 = vmul.f32 %v6917_v30, %v3001_v32 }
0x3944   :  { %3005 = vrot.lane.b32.xlu0 %v3003_v34, %s7294_s3 }
0x3949   :  { %v3220_v27 = vpop.permute.xlu1 %3219 }
0x394a   :  { %v3222_v19 = vmul.f32 %v6919_v20, %v3220_v27 }
0x394c   :  { %3224 = vrot.lane.b32.xlu1 %v3222_v19, %s7294_s3 }
0x39b6   :  { %v3006_v56 = vpop.permute.xlu0 %3005 }
0x39b7   :  { %v8106_v13 = vadd.f32 %v3006_v56, %v2998_v33 }
0x39b9   :  { %6920 = vtanh.f32 %v8106_v13 }
0x39be   :  { %v3225_v36 = vpop.permute.xlu1 %3224 }
0x39bf   :  { %v3227_v37 = vadd.f32 %v3225_v36, %v3217_v35 }
0x39c1   :  { %6922 = vtanh.f32 %v3227_v37  ;;  %v3326_v5 = vrot.slane %v3227_v37, 2 }
0x39c3   :  { %v6921_v39 = vpop.eup %6920 }
0x39c4   :  { %3011 = vrot.lane.b32.xlu0 %v6921_v39, %s7293_s21 }
0x39cb   :  { %v6923_v41 = vpop.eup %6922 }
0x39cc   :  { %3230 = vrot.lane.b32.xlu1 %v6923_v41, %s7293_s21 }
0x3a36   :  { %v3012_v42 = vpop.permute.xlu0 %3011 }
0x3a37   :  { %v8111_v44 = vmul.f32 %v6917_v30, %v3012_v42 }
0x3a39   :  { %v3020_v55 = vrot.slane %v8111_v44, 4 }
0x3a3b   :  { %3021 = vrot.lane.b32.xlu0 %v3020_v55, %s7294_s3 }
0x3a3e   :  { %v3231_v18 = vpop.permute.xlu1 %3230 }
0x3a3f   :  { %v8115_v45 = vmul.f32 %v6919_v20, %v3231_v18 }
0x3a41   :  { %v3239_v49 = vrot.slane %v8115_v45, 6 }
0x3a43   :  { %3240 = vrot.lane.b32.xlu1 %v3239_v49, %s7294_s3 }
0x3aad   :  { %v3022_v46 = vpop.permute.xlu0 %3021 }
0x3aae   :  { %6147 = vmatmul.mubr.msk.f32.vlgmr.msra.gmra.mrb[30].mxu1 %vm387_vm4, %v3022_v46 }
0x3aaf   :  { %6530 = vmatpush3.bf16.msra.mxu1 %v8073_v60  ;;  %6168 = vmatprep.mubr.msk.f32.mxu1 %vm7292_vm2, %v7290_v0 }
0x3ab0   :  { %6531 = vmatprep.subr.bf16.mxu1 %v7291_v12 }
0x3ab3   :  { %6533 = vmatpush3.bf16.msra.mxu1 %v8077_v48 }
0x3ab4   :  { %6540 = vmatprep.subr.bf16.mxu1 %v7291_v12 }
0x3ab5   :  { %v3241_v3 = vpop.permute.xlu1 %3240 }
0x3ab6   :  { %6169 = vmatmul.mubr.msk.f32.vlgmr.msra.gmra.mrb[32].mxu1 %vm387_vm4, %v3241_v3 }
0x3ab7   :  { %6542 = vmatpush3.bf16.msra.mxu1 %v8073_v60  ;;  %6190 = vmatprep.mubr.msk.f32.mxu1 %vm7292_vm2, %v7290_v0 }
0x3ab8   :  { %6543 = vmatprep.subr.bf16.mxu1 %v7291_v12 }
0x3abb   :  { %6545 = vmatpush3.bf16.msra.mxu1 %v8077_v48 }
0x3abc   :  { %6552 = vmatprep.subr.bf16.mxu1 %v7291_v12 }
0x3b81   :  { %v8133_v50 = vpop.f32.mrb[30].mxu1 }
0x3b82   :  { %v6148_v43 = vpop.f32.mrb[31].mxu1 }
0x3b89   :  { %v3310_v14 = vpop.f32.mrb[32].mxu1 }
0x3b8a   :  { %v3315_v47 = vrot.slane %v3310_v14, 4  ;;  %v6170_v53 = vpop.f32.mrb[33].mxu1 }
0x3b8c   :  { %v3317_v57 = vadd.f32 %v3315_v47, %v8098_v54 }
0x3b8e   :  { %6924 = vtanh.f32 %v3317_v57  ;;  %v5607_v59 = vmul.f32 -1.442695, %v3317_v57 }
0x3b90   :  { %6926 = vpow2.f32 %v5607_v59 }
0x3b98   :  { %v6925_v58 = vpop.eup %6924 }
0x3b99   :  { %3330 = vrot.lane.b32.xlu0 %v6925_v58, %s7293_s21 }
0x3b9a   :  { %v6927_v61 = vpop.eup %6926 }
0x3b9b   :  { %v3321_v62 = vadd.f32 1.0, %v6927_v61 }
0x3b9d   :  { %6928 = vrcp.f32 %v3321_v62 }
0x3ba7   :  { %v6929_v38 = vpop.eup %6928 }
0x3ba8   :  { %v3328_v63 = vmul.f32 %v6929_v38, %v3326_v5 }
0x3c0b   :  { %v3331_v2 = vpop.permute.xlu0 %3330 }
0x3c0c   :  { %v3333_v4 = vmul.f32 %v6929_v38, %v3331_v2 }
0x3c0e   :  { %3335 = vrot.lane.b32.xlu1 %v3333_v4, %s7294_s3 }
0x3c80   :  { %v3336_v22 = vpop.permute.xlu1 %3335 }
0x3c81   :  { %v3338_v8 = vadd.f32 %v3336_v22, %v3328_v63  ;;  %v8181_v63 = vadd.f32 %v7948_v40, %v8094_v6 }
0x3c83   :  { %6930 = vtanh.f32 %v3338_v8  ;;  %v3437_v31 = vrot.slane %v3338_v8, 2 }
0x3c8d   :  { %v6931_v9 = vpop.eup %6930 }
0x3c8e   :  { %3341 = vrot.lane.b32.xlu0 %v6931_v9, %s7293_s21 }
0x3d00   :  { %v3342_v11 = vpop.permute.xlu0 %3341 }
0x3d01   :  { %v8139_v15 = vmul.f32 %v6929_v38, %v3342_v11 }
0x3d03   :  { %v3350_v16 = vrot.slane %v8139_v15, 4 }
0x3d05   :  { %3351 = vrot.lane.b32.xlu1 %v3350_v16, %s7294_s3 }
0x3d77   :  { %v3352_v21 = vpop.permute.xlu1 %3351 }
0x3d78   :  { %6180 = vmatmul.mubr.msk.f32.vlgmr.msra.gmra.mrb[30].mxu0 %vm387_vm4, %v3352_v21 }
0x3d79   :  { %6548 = vmatpush3.bf16.msra.mxu0 %v8073_v60  ;;  %6201 = vmatprep.mubr.msk.f32.mxu0 %vm7292_vm2, %v7290_v0 }
0x3d7a   :  { %6549 = vmatprep.subr.bf16.mxu0 %v7291_v12 }
0x3d7d   :  { %6551 = vmatpush3.bf16.msra.mxu0 %v8077_v48 }
0x3d7e   :  { %6558 = vmatprep.subr.bf16.mxu0 %v7291_v12 }
0x3e4b   :  { %v3421_v17 = vpop.f32.mrb[30].mxu0 }
0x3e4c   :  { %v3426_v24 = vrot.slane %v3421_v17, 6  ;;  %v6181_v52 = vpop.f32.mrb[31].mxu0 }
0x3e4e   :  { %v3428_v1 = vadd.f32 %v3426_v24, %v8098_v54 }
0x3e50   :  { %6932 = vtanh.f32 %v3428_v1  ;;  %v5609_v30 = vmul.f32 -1.442695, %v3428_v1 }
0x3e52   :  { %6934 = vpow2.f32 %v5609_v30 }
0x3e5a   :  { %v6933_v29 = vpop.eup %6932 }
0x3e5b   :  { %3441 = vrot.lane.b32.xlu0 %v6933_v29, %s7293_s21 }
0x3e5c   :  { %v6935_v32 = vpop.eup %6934 }
0x3e5d   :  { %v3432_v34 = vadd.f32 1.0, %v6935_v32 }
0x3e5f   :  { %6936 = vrcp.f32 %v3432_v34 }
0x3e69   :  { %v6937_v20 = vpop.eup %6936 }
0x3e6a   :  { %v3439_v33 = vmul.f32 %v6937_v20, %v3437_v31 }
0x3ecd   :  { %v3442_v27 = vpop.permute.xlu0 %3441 }
0x3ece   :  { %v3444_v19 = vmul.f32 %v6937_v20, %v3442_v27 }
0x3ed0   :  { %3446 = vrot.lane.b32.xlu1 %v3444_v19, %s7294_s3 }
0x3f42   :  { %v3447_v56 = vpop.permute.xlu1 %3446 }
0x3f43   :  { %v3449_v35 = vadd.f32 %v3447_v56, %v3439_v33 }
0x3f45   :  { %6938 = vtanh.f32 %v3449_v35  ;;  %v3545_v58 = vrot.slane %v3449_v35, 2 }
0x3f4f   :  { %v6939_v36 = vpop.eup %6938 }
0x3f50   :  { %3452 = vrot.lane.b32.xlu0 %v6939_v36, %s7293_s21 }
0x3fc2   :  { %v3453_v37 = vpop.permute.xlu0 %3452 }
0x3fc3   :  { %v8154_v39 = vmul.f32 %v6937_v20, %v3453_v37 }
0x3fc5   :  { %v3461_v41 = vrot.slane %v8154_v39, 2 }
0x3fc7   :  { %3462 = vrot.lane.b32.xlu1 %v3461_v41, %s7294_s3 }
0x4039   :  { %v3463_v42 = vpop.permute.xlu1 %3462 }
0x403a   :  { %6191 = vmatmul.mubr.msk.f32.vlgmr.msra.gmra.mrb[34].mxu1 %vm387_vm4, %v3463_v42 }
0x403b   :  { %6554 = vmatpush3.bf16.msra.mxu1 %v8073_v60  ;;  %6212 = vmatprep.mubr.msk.f32.mxu1 %vm7292_vm2, %v7290_v0 }
0x403c   :  { %6555 = vmatprep.subr.bf16.mxu1 %v7291_v12 }
0x403f   :  { %6557 = vmatpush3.bf16.msra.mxu1 %v8077_v48 }
0x4040   :  { %6564 = vmatprep.subr.bf16.mxu1 %v7291_v12 }
0x410d   :  { %v3532_v55 = vpop.f32.mrb[34].mxu1 }
0x410e   :  { %v3536_v18 = vadd.f32 %v3532_v55, %v8098_v54  ;;  %v6192_v49 = vpop.f32.mrb[35].mxu1 }
0x4110   :  { %6940 = vtanh.f32 %v3536_v18  ;;  %v5611_v3 = vmul.f32 -1.442695, %v3536_v18 }
0x4112   :  { %6942 = vpow2.f32 %v5611_v3 }
0x411a   :  { %v6941_v46 = vpop.eup %6940 }
0x411b   :  { %3549 = vrot.lane.b32.xlu0 %v6941_v46, %s7293_s21 }
0x411c   :  { %v6943_v43 = vpop.eup %6942 }
0x411d   :  { %v3540_v14 = vadd.f32 1.0, %v6943_v43 }
0x411f   :  { %6944 = vrcp.f32 %v3540_v14 }
0x4129   :  { %v6945_v47 = vpop.eup %6944 }
0x412a   :  { %v3547_v59 = vmul.f32 %v6945_v47, %v3545_v58 }
0x418d   :  { %v3550_v53 = vpop.permute.xlu0 %3549 }
0x418e   :  { %v3552_v57 = vmul.f32 %v6945_v47, %v3550_v53 }
0x4190   :  { %3554 = vrot.lane.b32.xlu1 %v3552_v57, %s7294_s3 }
0x4202   :  { %v3555_v61 = vpop.permute.xlu1 %3554 }
0x4203   :  { %v3557_v62 = vadd.f32 %v3555_v61, %v3547_v59 }
0x4205   :  { %6946 = vtanh.f32 %v3557_v62  ;;  %v3655_v40 = vrot.slane %v3557_v62, 2 }
0x420f   :  { %v6947_v54 = vpop.eup %6946 }
0x4210   :  { %3560 = vrot.lane.b32.xlu0 %v6947_v54, %s7293_s21 }
0x4282   :  { %v3561_v38 = vpop.permute.xlu0 %3560 }
0x4283   :  { %v8169_v2 = vmul.f32 %v6945_v47, %v3561_v38 }
0x4285   :  { %3569 = vrot.lane.b32.xlu1 %v8169_v2, %s7294_s3 }
0x42f7   :  { %v3570_v4 = vpop.permute.xlu1 %3569 }
0x42f8   :  { %6202 = vmatmul.mubr.msk.f32.vlgmr.msra.gmra.mrb[32].mxu0 %vm387_vm4, %v3570_v4 }
0x42f9   :  { %6560 = vmatpush3.bf16.msra.mxu0 %v8073_v60  ;;  %6223 = vmatprep.mubr.msk.f32.mxu0 %vm7292_vm2, %v7290_v0 }
0x42fa   :  { %6561 = vmatprep.subr.bf16.mxu0 %v7291_v12 }
0x42fd   :  { %6563 = vmatpush3.bf16.msra.mxu0 %v8077_v48 }
0x43cb   :  { %v3639_v5 = vpop.f32.mrb[32].mxu0 }
0x43cc   :  { %v3644_v22 = vrot.slane %v3639_v5, 2  ;;  %v6203_v8 = vpop.f32.mrb[33].mxu0 }
0x43ce   :  { %v3646_v9 = vadd.f32 %v3644_v22, %v8181_v63 }
0x43d0   :  { %6948 = vtanh.f32 %v3646_v9  ;;  %v5613_v16 = vmul.f32 -1.442695, %v3646_v9 }
0x43d2   :  { %6950 = vpow2.f32 %v5613_v16 }
0x43da   :  { %v6949_v11 = vpop.eup %6948 }
0x43db   :  { %3659 = vrot.lane.b32.xlu0 %v6949_v11, %s7293_s21 }
0x43dc   :  { %v6951_v21 = vpop.eup %6950 }
0x43dd   :  { %v3650_v17 = vadd.f32 1.0, %v6951_v21 }
0x43df   :  { %6952 = vrcp.f32 %v3650_v17 }
0x43e9   :  { %v6953_v24 = vpop.eup %6952 }
0x43ea   :  { %v3657_v6 = vmul.f32 %v6953_v24, %v3655_v40 }
0x444d   :  { %v3660_v52 = vpop.permute.xlu0 %3659 }
0x444e   :  { %v3662_v1 = vmul.f32 %v6953_v24, %v3660_v52  ;;  %v3096_v52 = vrot.slane %v8133_v50, 2 }
0x4450   :  { %3664 = vrot.lane.b32.xlu1 %v3662_v1, %s7294_s3  ;;  %v3098_v1 = vadd.f32 %v3096_v52, %v8047_v10 }
0x44c2   :  { %v3665_v29 = vpop.permute.xlu1 %3664 }
0x44c3   :  { %v3667_v30 = vadd.f32 %v3665_v29, %v3657_v6 }
0x44c5   :  { %6954 = vtanh.f32 %v3667_v30 }
0x44cf   :  { %v6955_v32 = vpop.eup %6954 }
0x44d0   :  { %3670 = vrot.lane.b32.xlu0 %v6955_v32, %s7293_s21  ;;  %v5604_v32 = vmul.f32 -1.442695, %v3098_v1 }
0x4542   :  { %v3671_v34 = vpop.permute.xlu0 %3670 }
0x4543   :  { %v8187_v20 = vmul.f32 %v6953_v24, %v3671_v34 }
0x4545   :  { %v3679_v27 = vrot.slane %v8187_v20, 6 }
0x4547   :  { %3680 = vrot.lane.b32.xlu1 %v3679_v27, %s7294_s3 }
0x45b9   :  { %v3681_v19 = vpop.permute.xlu1 %3680 }
0x45ba   :  { %6213 = vmatmul.mubr.msk.f32.vlgmr.msra.gmra.mrb[36].mxu1 %vm387_vm4, %v3681_v19 }
0x45bb   :  { %6566 = vmatpush3.bf16.msra.mxu1 %v8073_v60  ;;  %6234 = vmatprep.mubr.msk.f32.mxu1 %vm7292_vm2, %v7290_v0 }
0x45bc   :  { %6567 = vmatprep.subr.bf16.mxu1 %v7291_v12 }
0x45bf   :  { %6569 = vmatpush3.bf16.msra.mxu1 %v8077_v48  ;;  %v3766_v48 = vrot.slane %v3667_v30, 2 }
0x468d   :  { %v3750_v31 = vpop.f32.mrb[36].mxu1 }
0x468e   :  { %v3755_v33 = vrot.slane %v3750_v31, 4  ;;  %v6214_v56 = vpop.f32.mrb[37].mxu1 }
0x4690   :  { %v3757_v35 = vadd.f32 %v3755_v33, %v8181_v63  ;;  %v3107_v33 = vrot.slane %v8106_v13, 6 }
0x4692   :  { %6956 = vtanh.f32 %v3757_v35  ;;  %v5615_v37 = vmul.f32 -1.442695, %v3757_v35 }
0x4694   :  { %6958 = vpow2.f32 %v5615_v37 }
0x469c   :  { %v6957_v36 = vpop.eup %6956 }
0x469d   :  { %3770 = vrot.lane.b32.xlu0 %v6957_v36, %s7293_s21 }
0x469e   :  { %v6959_v41 = vpop.eup %6958 }
0x469f   :  { %v3761_v60 = vadd.f32 1.0, %v6959_v41 }
0x46a1   :  { %6960 = vrcp.f32 %v3761_v60 }
0x46ab   :  { %v6961_v42 = vpop.eup %6960 }
0x46ac   :  { %v3768_v49 = vmul.f32 %v6961_v42, %v3766_v48 }
0x470f   :  { %v3771_v55 = vpop.permute.xlu0 %3770 }
0x4710   :  { %v3773_v18 = vmul.f32 %v6961_v42, %v3771_v55 }
0x4712   :  { %3775 = vrot.lane.b32.xlu1 %v3773_v18, %s7294_s3 }
0x4784   :  { %v3776_v46 = vpop.permute.xlu1 %3775 }
0x4785   :  { %v3778_v3 = vadd.f32 %v3776_v46, %v3768_v49 }
0x4787   :  { %6962 = vtanh.f32 %v3778_v3  ;;  %v3877_v11 = vrot.slane %v3778_v3, 2 }
0x4791   :  { %v6963_v43 = vpop.eup %6962 }
0x4792   :  { %3781 = vrot.lane.b32.xlu0 %v6963_v43, %s7293_s21 }
0x4804   :  { %v3782_v14 = vpop.permute.xlu0 %3781 }
0x4805   :  { %v8201_v47 = vmul.f32 %v6961_v42, %v3782_v14 }
0x4807   :  { %v3790_v53 = vrot.slane %v8201_v47, 4 }
0x4809   :  { %3791 = vrot.lane.b32.xlu1 %v3790_v53, %s7294_s3 }
0x487b   :  { %v3792_v57 = vpop.permute.xlu1 %3791 }
0x487c   :  { %6224 = vmatmul.mubr.msk.f32.vlgmr.msra.gmra.mrb[34].mxu0 %vm387_vm4, %v3792_v57 }
0x487d   :  { %4109 = vmatprep.mubr.f32.mxu0 %v7290_v0 }
0x494f   :  { %v3861_v58 = vpop.f32.mrb[34].mxu0 }
0x4950   :  { %v3866_v59 = vrot.slane %v3861_v58, 6  ;;  %v6225_v61 = vpop.f32.mrb[35].mxu0 }
0x4952   :  { %v3868_v62 = vadd.f32 %v3866_v59, %v8181_v63 }
0x4954   :  { %6964 = vtanh.f32 %v3868_v62  ;;  %v5617_v38 = vmul.f32 -1.442695, %v3868_v62 }
0x4956   :  { %6966 = vpow2.f32 %v5617_v38  ;;  %v4014_v38 = vld [vmem:[#allocation12 + $0x18] sm:$0xff] }
0x495e   :  { %v6965_v54 = vpop.eup %6964 }
0x495f   :  { %3881 = vrot.lane.b32.xlu0 %v6965_v54, %s7293_s21  ;;  %v4012_v54 = vld [vmem:[#allocation12 + $0x8] sm:$0xff] }
0x4960   :  { %v6967_v4 = vpop.eup %6966 }
0x4961   :  { %v3872_v5 = vadd.f32 1.0, %v6967_v4  ;;  %v4011_v4 = vld [vmem:[#allocation12] sm:$0xff] }
0x4963   :  { %6968 = vrcp.f32 %v3872_v5  ;;  %v6570_v5 = vpack.c.bf16 %v4014_v38, %v4012_v54 }
0x4965   :  { %6571 = vmatprep.subr.bf16.mxu0 %v6570_v5 }
0x496d   :  { %v6969_v22 = vpop.eup %6968 }
0x496e   :  { %v3879_v16 = vmul.f32 %v6969_v22, %v3877_v11 }
0x49d1   :  { %v3882_v8 = vpop.permute.xlu0 %3881 }
0x49d2   :  { %v3884_v9 = vmul.f32 %v6969_v22, %v3882_v8  ;;  %v4016_v8 = vld [vmem:[#allocation12 + $0x28] sm:$0xff] }
0x49d4   :  { %3886 = vrot.lane.b32.xlu1 %v3884_v9, %s7294_s3  ;;  %v4018_v9 = vld [vmem:[#allocation12 + $0x38] sm:$0xff] }
0x4a46   :  { %v3887_v21 = vpop.permute.xlu1 %3886 }
0x4a47   :  { %v8210_v17 = vadd.f32 %v3887_v21, %v3879_v16  ;;  %v6574_v16 = vpack.c.bf16 %v4018_v9, %v4016_v8  ;;  %v4015_v21 = vld [vmem:[#allocation12 + $0x20] sm:$0xff] }
0x4a49   :  { %6970 = vtanh.f32 %v8210_v17  ;;  %v3985_v57 = vrot.slane %v8210_v17, 2  ;;  %v4017_v17 = vld [vmem:[#allocation12 + $0x30] sm:$0xff] }
0x4a4a   :  { %6972 = vtanh.f32 %v3098_v1  ;;  %v4019_v1 = vld [vmem:[#allocation12 + $0x40] sm:$0xff] }
0x4a4b   :  { %6974 = vpow2.f32 %v5604_v32 }
0x4a53   :  { %v6971_v24 = vpop.eup %6970 }
0x4a54   :  { %3892 = vrot.lane.b32.xlu0 %v6971_v24, %s7293_s21  ;;  %v6973_v30 = vpop.eup %6972  ;;  %v6576_v24 = vpack.c.bf16 %v4017_v17, %v4015_v21 }
0x4a55   :  { %v6975_v34 = vpop.eup %6974 }
0x4a56   :  { %v3102_v27 = vadd.f32 1.0, %v6975_v34  ;;  %v4025_v34 = vld [vmem:[#allocation12 + $0x70] sm:$0xff] }
0x4a58   :  { %6976 = vrcp.f32 %v3102_v27 }
0x4a62   :  { %v6977_v50 = vpop.eup %6976 }
0x4a63   :  { %v3109_v56 = vmul.f32 %v6977_v50, %v3107_v33 }
0x4ac6   :  { %v3893_v40 = vpop.permute.xlu0 %3892 }
0x4ac7   :  { %v3895_v6 = vmul.f32 %v6969_v22, %v3893_v40  ;;  %v4013_v22 = vld [vmem:[#allocation12 + $0x10] sm:$0xff] }
0x4ac8   :  { %v6572_v11 = vpack.c.bf16 %v4013_v22, %v4011_v4  ;;  %v4021_v40 = vld [vmem:[#allocation12 + $0x50] sm:$0xff] }
0x4ac9   :  { %v3901_v29 = vrot.slane %v3895_v6, 2  ;;  %v8335_v22 = vld [vmem:[%s8491_s18 + $0x8] sm:$0xff] }
0x4aca   :  { %6573 = vmatpush1.bf16.msra.mxu0 %v6572_v11 }
0x4acb   :  { %3902 = vrot.lane.b32.xlu1 %v3901_v29, %s7294_s3  ;;  %6575 = vmatprep.subr.bf16.mxu0 %v6574_v16  ;;  %v4024_v29 = vld [vmem:[#allocation12 + $0x68] sm:$0xff] }
0x4acc   :  { %v8340_v16 = vld [vmem:[%s8491_s18] sm:$0xff] }
0x4ace   :  { %6577 = vmatpush1.bf16.msra.mxu0 %v6576_v24 }
0x4acf   :  { %3111 = vrot.lane.b32.xlu1 %v6973_v30, %s7293_s21  ;;  %v4026_v30 = vld [vmem:[#allocation12 + $0x78] sm:$0xff] }
0x4ad0   :  { %v6582_v32 = vpack.c.bf16 %v4026_v30, %v4024_v29 }
0x4b3d   :  { %v3903_v19 = vpop.permute.xlu1 %3902 }
0x4b3e   :  { %6235 = vmatmul.mubr.msk.f32.vlgmr.msra.gmra.mrb[38].mxu1 %vm387_vm4, %v3903_v19 }
0x4b41   :  { %v3112_v31 = vpop.permute.xlu1 %3111 }
0x4b42   :  { %v3114_v10 = vmul.f32 %v6977_v50, %v3112_v31 }
0x4b44   :  { %3116 = vrot.lane.b32.xlu1 %v3114_v10, %s7294_s3 }
0x4bb6   :  { %v3117_v35 = vpop.permute.xlu1 %3116 }
0x4bb7   :  { %v3119_v36 = vadd.f32 %v3117_v35, %v3109_v56 }
0x4bb9   :  { %6978 = vtanh.f32 %v3119_v36 }
0x4bc3   :  { %v6979_v37 = vpop.eup %6978 }
0x4bc4   :  { %3122 = vrot.lane.b32.xlu1 %v6979_v37, %s7293_s21  ;;  %v4027_v37 = vld [vmem:[#allocation13] sm:$0x3] }
0x4bc8   :  { %2578 = vrot.lane.b32.xlu1 %v8019_v51, %s7294_s3 }
0x4bcc   :  { %3675 = vrot.lane.b32.xlu1 %v8187_v20, %s7293_s21 }
0x4bd0   :  { %3897 = vrot.lane.b32.xlu1 %v3895_v6, %s7293_s21  ;;  %v6580_v6 = vpack.c.bf16 %v4021_v40, %v4019_v1 }
0x4bd4   :  { %2905 = vrot.lane.b32.xlu1 %v8069_v23, %s7294_s3 }
0x4c11   :  { %v3972_v41 = vpop.f32.mrb[38].mxu1 }
0x4c12   :  { %v3976_v13 = vadd.f32 %v3972_v41, %v8181_v63  ;;  %v6236_v60 = vpop.f32.mrb[39].mxu1  ;;  %v4032_v41 = vrot.slane %v4027_v37, %v7610_v26 }
0x4c14   :  { %6980 = vtanh.f32 %v3976_v13  ;;  %v5619_v48 = vmul.f32 -1.442695, %v3976_v13 }
0x4c16   :  { %6982 = vpow2.f32 %v5619_v48 }
0x4c1e   :  { %v6981_v42 = vpop.eup %6980 }
0x4c1f   :  { %3989 = vrot.lane.b32.xlu0 %v6981_v42, %s7293_s21 }
0x4c20   :  { %v6983_v49 = vpop.eup %6982 }
0x4c21   :  { %v3980_v46 = vadd.f32 1.0, %v6983_v49 }
0x4c23   :  { %6984 = vrcp.f32 %v3980_v46 }
0x4c2d   :  { %v6985_v3 = vpop.eup %6984 }
0x4c2e   :  { %v3987_v58 = vmul.f32 %v6985_v3, %v3985_v57 }
0x4c36   :  { %v3123_v55 = vpop.permute.xlu1 %3122 }
0x4c37   :  { %v3125_v18 = vmul.f32 %v6977_v50, %v3123_v55  ;;  %v4036_v55 = vrot.slane %v4027_v37, %v7612_v28 }
0x4c39   :  { %3127 = vrot.lane.b32.xlu1 %v3125_v18, %s7294_s3 }
0x4c3a   :  { %v2579_v51 = vpop.permute.xlu1 %2578 }
0x4c3b   :  { %2581 = vst.msk [vmem:[#allocation3] sm:$0x30] %vm711_vm7, %v2579_v51 }
0x4c3d   :  { %3346 = vrot.lane.b32.xlu1 %v8139_v15, %s7293_s21 }
0x4c3e   :  { %v8235_v20 = vpop.permute.xlu1 %3675 }
0x4c41   :  { %3565 = vrot.lane.b32.xlu1 %v8169_v2, %s7293_s21 }
0x4c42   :  { %v8239_v23 = vpop.permute.xlu1 %3897 }
0x4c46   :  { %v2906_v63 = vpop.permute.xlu1 %2905 }
0x4c47   :  { %2908 = vst.msk [vmem:[#allocation3 + $0x8] sm:$0xc] %vm599_vm5, %v2906_v63 }
0x4c91   :  { %v3990_v43 = vpop.permute.xlu0 %3989 }
0x4c92   :  { %v3992_v14 = vmul.f32 %v6985_v3, %v3990_v43 }
0x4c94   :  { %3994 = vrot.lane.b32.xlu0 %v3992_v14, %s7294_s3 }
0x4cab   :  { %v3128_v15 = vpop.permute.xlu1 %3127 }
0x4cac   :  { %3130 = vst.msk [vmem:[#allocation3 + $0x8] sm:$0xc0] %vm823_vm6, %v3128_v15 }
0x4caf   :  { %v3347_v53 = vpop.permute.xlu1 %3346 }
0x4cb3   :  { %v3566_v2 = vpop.permute.xlu1 %3565 }
0x4cb4   :  { %3568 = vst.msk [vmem:[#allocation3 + $0x8] sm:$0x3] %vm1703_vm11, %v3566_v2 }
0x4d06   :  { %v3995_v59 = vpop.permute.xlu0 %3994 }
0x4d07   :  { %v3997_v61 = vadd.f32 %v3995_v59, %v3987_v58 }
0x4d09   :  { %6986 = vtanh.f32 %v3997_v61 }
0x4d13   :  { %v6987_v62 = vpop.eup %6986 }
0x4d14   :  { %4000 = vrot.lane.b32.xlu0 %v6987_v62, %s7293_s21 }
0x4d18   :  { %2467 = vrot.lane.b32.xlu0 %v7993_v25, %s7294_s3  ;;  %v4020_v25 = vld [vmem:[#allocation12 + $0x48] sm:$0xff] }
0x4d1c   :  { %2689 = vrot.lane.b32.xlu0 %v8034_v7, %s7294_s3  ;;  %v4022_v7 = vld [vmem:[#allocation12 + $0x58] sm:$0xff] }
0x4d1d   :  { %v6578_v52 = vpack.c.bf16 %v4022_v7, %v4020_v25 }
0x4d1f   :  { %6579 = vmatprep.subr.bf16.mxu0 %v6578_v52 }
0x4d20   :  { %3786 = vrot.lane.b32.xlu0 %v8201_v47, %s7293_s21  ;;  %6581 = vmatpush1.bf16.msra.mxu0 %v6580_v6  ;;  %v4023_v47 = vld [vmem:[#allocation12 + $0x60] sm:$0xff] }
0x4d21   :  { %v6584_v27 = vpack.c.bf16 %v4025_v34, %v4023_v47  ;;  %6583 = vmatprep.subr.bf16.mxu0 %v6582_v32 }
0x4d24   :  { %3016 = vrot.lane.b32.xlu0 %v8111_v44, %s7294_s3  ;;  %6585 = vmatpush1.bf16.msra.mxu0 %v6584_v27 }
0x4d28   :  { %3235 = vrot.lane.b32.xlu0 %v8115_v45, %s7293_s21 }
0x4d86   :  { %v4001_v44 = vpop.permute.xlu0 %4000 }
0x4d87   :  { %v4003_v19 = vmul.f32 %v6985_v3, %v4001_v44 }
0x4d89   :  { %4005 = vrot.lane.b32.xlu0 %v4003_v19, %s7293_s21 }
0x4d8a   :  { %v2468_v45 = vpop.permute.xlu0 %2467 }
0x4d8b   :  { %2470 = vst.msk [vmem:[#allocation3] sm:$0xc] %vm599_vm5, %v2468_v45 }
0x4d8c   :  { %3900 = vst.msk [vmem:[#allocation3] sm:$0xc] %vm1594_vm10, %v8239_v23 }
0x4d8d   :  { %3457 = vrot.lane.b32.xlu0 %v8154_v39, %s7293_s21 }
0x4d8e   :  { %v2690_v50 = vpop.permute.xlu0 %2689 }
0x4d8f   :  { %2692 = vst.msk [vmem:[#allocation3] sm:$0xc0] %vm823_vm6, %v2690_v50 }
0x4d90   :  { %3678 = vst.msk [vmem:[#allocation3] sm:$0xc0] %vm1370_vm9, %v8235_v20 }
0x4d92   :  { %v3787_v31 = vpop.permute.xlu0 %3786 }
0x4d93   :  { %3789 = vst.msk [vmem:[#allocation3] sm:$0x30] %vm1482_vm8, %v3787_v31 }
0x4d96   :  { %v3017_v10 = vpop.permute.xlu0 %3016 }
0x4d97   :  { %3019 = vst.msk [vmem:[#allocation3 + $0x8] sm:$0x30] %vm711_vm7, %v3017_v10 }
0x4d98   :  { %3349 = vst.msk [vmem:[#allocation3 + $0x8] sm:$0x30] %vm1482_vm8, %v3347_v53 }
0x4d9a   :  { %v3236_v33 = vpop.permute.xlu0 %3235 }
0x4d9b   :  { %3238 = vst.msk [vmem:[#allocation3 + $0x8] sm:$0xc0] %vm1370_vm9, %v3236_v33 }
0x4dfb   :  { %v4006_v56 = vpop.permute.xlu0 %4005 }
0x4dfc   :  { %4008 = vst.msk [vmem:[#allocation3] sm:$0x3] %vm1703_vm11, %v4006_v56 }
0x4dff   :  { %v3458_v39 = vpop.permute.xlu0 %3457 }
0x4e00   :  { %3460 = vst.msk [vmem:[#allocation3 + $0x8] sm:$0xc] %vm1594_vm10, %v3458_v39 }
0x4e03   :  { %v8272_v35 = vld [vmem:[#allocation3] sm:$0xff] }
0x4e04   :  { %5620 = vmatmul.mubr.msk.f32.vlgmr.msra.gmra.mrb[36].mxu0 %vm2175_vm12, %v8272_v35 }
0x4e05   :  { %4115 = vmatprep.mubr.f32.mxu0 %v7290_v0 }
0x4e07   :  { %v8277_v36 = vld [vmem:[#allocation3 + $0x8] sm:$0xff] }
0x4e08   :  { %5621 = vmatmul.mubr.msk.f32.gmra.mrb[38].mxu0 %vm2175_vm12, %v8277_v36 }
0x4ed7   :  { %v4111_v13 = vpop.f32.mrb[36].mxu0 }
0x4ed8   :  { %v8282_v60 = vadd.f32 %v4111_v13, %v4032_v41  ;;  %v4113_v42 = vpop.f32.mrb[37].mxu0 }
0x4ed9   :  { %v4114_v23 = vadd.f32 %v4113_v42, %v4036_v55 }
0x4eda   :  { %6241 = vmatprep.mubr.msk.f32.mxu1 %vm4138_vm13, %v8282_v60 }
0x4edb   :  { %v4117_v18 = vpop.f32.mrb[38].mxu0 }
0x4edc   :  { %v8287_v51 = vadd.f32 %v4117_v18, %v4032_v41  ;;  %v4119_v20 = vpop.f32.mrb[39].mxu0 }
0x4edd   :  { %v4120_v63 = vadd.f32 %v4119_v20, %v4036_v55 }
0x4ede   :  { %v8291_v48 = vpack.i.bf16 %v8287_v51, %v8282_v60 }
0x4edf   :  { %v6592_v26 = vpack.c.bf16 %v4120_v63, %v4114_v23  ;;  %v8293_v49 = vpack.i.bf16 %v4120_v63, %v4114_v23 }
0x4ee0   :  { %6703 = vrot.lane.b32.xlu1 %v8291_v48, %s7295_s8  ;;  %6698 = vrot.lane.b32.xlu0 %v8291_v48, %s7293_s21 }
0x4ee4   :  { %4331 = vrot.lane.b32.xlu1 %v8287_v51, %s7296_s6  ;;  %4329 = vrot.lane.b32.xlu0 %v8282_v60, %s7296_s6 }
0x4ee8   :  { %4697 = vrot.lane.b32.xlu1 %v8282_v60, %s7297_s30  ;;  %6708 = vrot.lane.b32.xlu0 %v8291_v48, %s7294_s3 }
0x4eec   :  { %4699 = vrot.lane.b32.xlu0 %v8287_v51, %s7297_s30 }
0x4f52   :  { %v6704_v28 = vpop.permute.xlu1 %6703  ;;  %v6699_v46 = vpop.permute.xlu0 %6698 }
0x4f53   :  { %v6706_v3 = vunpack.i.h.bf16 %v6704_v28  ;;  %v6705_v43 = vunpack.i.l.bf16 %v6704_v28  ;;  %v6701_v14 = vunpack.i.h.bf16 %v6699_v46  ;;  %v6700_v15 = vunpack.i.l.bf16 %v6699_v46 }
0x4f55   :  { %v6596_v2 = vpack.c.bf16 %v6706_v3, %v6705_v43  ;;  %v6586_v57 = vpack.c.bf16 %v6701_v14, %v6700_v15 }
0x4f56   :  { %v4330_v58 = vpop.permute.xlu0 %4329  ;;  %v4332_v59 = vpop.permute.xlu1 %4331 }
0x4f57   :  { %6588 = vmatprep.subr.msk.bf16.mxu1 %vm8310_vm14, %v6586_v57  ;;  %6598 = vmatprep.subr.msk.bf16.mxu0 %vm8310_vm14, %v6596_v2 }
0x4f58   :  { %6255 = vmatprep.mubr.msk.f32.mxu0 %vm4138_vm13, %v4330_v58  ;;  %6591 = vmatpush3.bf16.xpose.msk.msra.mxu1 %vm8310_vm14, %v6586_v57 }
0x4f59   :  { %6601 = vmatpush3.bf16.xpose.msk.msra.mxu0 %vm8310_vm14, %v6596_v2  ;;  %6593 = vmatprep.subr.bf16.mxu1 %v6592_v26 }
0x4f5a   :  { %v6709_v61 = vpop.permute.xlu0 %6708  ;;  %v4698_v4 = vpop.permute.xlu1 %4697 }
0x4f5b   :  { %v6711_v62 = vunpack.i.h.bf16 %v6709_v61  ;;  %v6710_v54 = vunpack.i.l.bf16 %v6709_v61 }
0x4f5d   :  { %v6614_v38 = vpack.c.bf16 %v6711_v62, %v6710_v54 }
0x4f5e   :  { %v4700_v5 = vpop.permute.xlu0 %4699 }
0x4f5f   :  { %6242 = vmatmul.mubr.msk.f32.vlgmr.msra.gmra.mrb[40].mxu1 %vm4138_vm13, %v8287_v51  ;;  %6616 = vmatprep.subr.msk.bf16.mxu0 %vm8310_vm14, %v6614_v38 }
0x4f60   :  { %6256 = vmatmul.mubr.msk.f32.vlgmr.msra.gmra.mrb[40].mxu0 %vm4138_vm13, %v4332_v59  ;;  %6595 = vmatpush3.bf16.msra.mxu1 %v6592_v26 }
0x4f61   :  { %6619 = vmatpush3.bf16.xpose.msk.msra.mxu0 %vm8310_vm14, %v6614_v38  ;;  %6283 = vmatprep.mubr.msk.f32.mxu0 %vm4138_vm13, %v4698_v4 }
0x4f68   :  { %6284 = vmatmul.mubr.msk.f32.vlgmr.msra.gmra.mrb[42].mxu0 %vm4138_vm13, %v4700_v5 }
0x5032   :  { %v6243_v8 = vpop.f32.mrb[40].mxu1 }
0x5033   :  { %v4223_v9 = vmul.f32 0.25, %v6243_v8  ;;  %v6257_v11 = vpop.f32.mrb[40].mxu0  ;;  %v4213_v21 = vpop.f32.mrb[41].mxu1 }
0x5034   :  { %v4421_v17 = vmul.f32 0.25, %v6257_v11  ;;  %v4222_v24 = vmul.f32 0.25, %v4213_v21  ;;  %v4411_v25 = vpop.f32.mrb[41].mxu0 }
0x5035   :  { %v4225_v7 = vadd.f32 %v4223_v9, %v8335_v22  ;;  %v4420_v52 = vmul.f32 0.25, %v4411_v25 }
0x5036   :  { %v4224_v1 = vadd.f32 %v4222_v24, %v8340_v16  ;;  %v4423_v29 = vadd.f32 %v4421_v17, %v8335_v22 }
0x5037   :  { %v4422_v40 = vadd.f32 %v4420_v52, %v8340_v16  ;;  %v4229_v6 = vsel %vm4138_vm13, %v4225_v7, -inf }
0x5038   :  { %4230 = vmax.xlane.f32.xlu0 %v4229_v6  ;;  %v4226_v30 = vsel %vm4138_vm13, %v4224_v1, -inf  ;;  %v4427_v27 = vsel %vm4138_vm13, %v4423_v29, -inf }
0x5039   :  { %4227 = vmax.xlane.f32.xlu1 %v4226_v30  ;;  %v4424_v47 = vsel %vm4138_vm13, %v4422_v40, -inf }
0x503b   :  { %v6285_v32 = vpop.f32.mrb[42].mxu0 }
0x503c   :  { %v4779_v34 = vpop.f32.mrb[43].mxu0  ;;  %4425 = vmax.xlane.f32.xlu0 %v4424_v47  ;;  %v4789_v46 = vmul.f32 0.25, %v6285_v32 }
0x503d   :  { %4428 = vmax.xlane.f32.xlu1 %v4427_v27  ;;  %v4788_v3 = vmul.f32 0.25, %v4779_v34 }
0x503e   :  { %v4791_v43 = vadd.f32 %v4789_v46, %v8335_v22 }
0x503f   :  { %v4790_v14 = vadd.f32 %v4788_v3, %v8340_v16 }
0x5040   :  { %v4795_v15 = vsel %vm4138_vm13, %v4791_v43, -inf }
0x50c5   :  { %v4231_v44 = vpop.xlane.xlu0 %4230 }
0x50c6   :  { %v4233_v19 = vsub.f32 %v4225_v7, %v4231_v44  ;;  %v4228_v45 = vpop.xlane.xlu1 %4227 }
0x50c7   :  { %v4232_v50 = vsub.f32 %v4224_v1, %v4228_v45  ;;  %v4125_v45 = vld [vmem:[#allocation15 + $0x18] sm:$0xff] }
0x50c8   :  { %v4236_v31 = vmul.f32 1.442695, %v4233_v19  ;;  %v4124_v19 = vld [vmem:[#allocation15 + $0x10] sm:$0xff] }
0x50c9   :  { %v4234_v10 = vmul.f32 1.442695, %v4232_v50  ;;  %v4426_v33 = vpop.xlane.xlu0 %4425  ;;  %v6606_v50 = vpack.c.bf16 %v4125_v45, %v4124_v19 }
0x50ca   :  { %6988 = vpow2.f32 %v4236_v31  ;;  %v4430_v56 = vsub.f32 %v4422_v40, %v4426_v33  ;;  %v4429_v39 = vpop.xlane.xlu1 %4428  ;;  %v4122_v31 = vld [vmem:[#allocation15] sm:$0xff] }
0x50cb   :  { %6990 = vpow2.f32 %v4234_v10  ;;  %v4431_v37 = vsub.f32 %v4423_v29, %v4429_v39  ;;  %v4123_v10 = vld [vmem:[#allocation15 + $0x8] sm:$0xff] }
0x50cc   :  { %v4432_v41 = vmul.f32 1.442695, %v4430_v56  ;;  %v6610_v33 = vpack.c.bf16 %v4123_v10, %v4122_v31 }
0x50cd   :  { %v4434_v13 = vmul.f32 1.442695, %v4431_v37 }
0x50ce   :  { %6992 = vpow2.f32 %v4432_v41 }
0x50cf   :  { %6994 = vpow2.f32 %v4434_v13 }
0x50d4   :  { %v6989_v42 = vpop.eup %6988 }
0x50d5   :  { %v6991_v55 = vpop.eup %6990  ;;  %v4241_v18 = vsel %vm4138_vm13, %v6989_v42, 0.0 }
0x50d6   :  { %4242 = vadd.xlane.f32.xlu1 %v4241_v18  ;;  %v4238_v20 = vsel %vm4138_vm13, %v6991_v55, 0.0 }
0x50d7   :  { %4239 = vadd.xlane.f32.xlu0 %v4238_v20 }
0x50d8   :  { %v6993_v23 = vpop.eup %6992 }
0x50d9   :  { %v6995_v63 = vpop.eup %6994  ;;  %v4436_v26 = vsel %vm4138_vm13, %v6993_v23, 0.0 }
0x50da   :  { %v4439_v28 = vsel %vm4138_vm13, %v6995_v63, 0.0 }
0x50db   :  { %4437 = vadd.xlane.f32.xlu0 %v4436_v26  ;;  %4440 = vadd.xlane.f32.xlu1 %v4439_v28 }
0x50ec   :  { %6718 = vrot.lane.b32.xlu1 %v8291_v48, %s7286_s25  ;;  %v4792_v48 = vsel %vm4138_vm13, %v4790_v14, -inf }
0x50f0   :  { %4984 = vrot.lane.b32.xlu1 %v8282_v60, %s7298_s9 }
0x50f1   :  { %6713 = vrot.lane.b32.xlu0 %v8293_v49, %s7296_s6 }
0x50f5   :  { %4986 = vrot.lane.b32.xlu0 %v8287_v51, %s7298_s9 }
0x5114   :  { %4796 = vmax.xlane.f32.xlu0 %v4795_v15  ;;  %4793 = vmax.xlane.f32.xlu1 %v4792_v48 }
0x5163   :  { %v4243_v2 = vpop.xlane.xlu1 %4242 }
0x5164   :  { %6996 = vrcp.f32 %v4243_v2  ;;  %v4240_v60 = vpop.xlane.xlu0 %4239 }
0x5165   :  { %6998 = vrcp.f32 %v4240_v60 }
0x5168   :  { %v4438_v57 = vpop.xlane.xlu0 %4437  ;;  %v4441_v58 = vpop.xlane.xlu1 %4440 }
0x5169   :  { %7000 = vrcp.f32 %v4438_v57 }
0x516a   :  { %7002 = vrcp.f32 %v4441_v58  ;;  %v4126_v58 = vld [vmem:[#allocation15 + $0x20] sm:$0xff] }
0x516c   :  { %v6714_v51 = vpop.permute.xlu0 %6713  ;;  %v6719_v59 = vpop.permute.xlu1 %6718 }
0x516d   :  { %v6716_v61 = vunpack.i.h.bf16 %v6714_v51  ;;  %v6715_v62 = vunpack.i.l.bf16 %v6714_v51  ;;  %v6721_v54 = vunpack.i.h.bf16 %v6719_v59  ;;  %v6720_v38 = vunpack.i.l.bf16 %v6719_v59 }
0x516e   :  { %v6997_v4 = vpop.eup %6996 }
0x516f   :  { %v6999_v5 = vpop.eup %6998  ;;  %v6602_v8 = vpack.c.bf16 %v6716_v61, %v6715_v62  ;;  %v6628_v9 = vpack.c.bf16 %v6721_v54, %v6720_v38  ;;  %v4247_v17 = vmul.f32 %v6997_v4, %v6989_v42 }
0x5170   :  { %v4985_v11 = vpop.permute.xlu1 %4984  ;;  %v4246_v21 = vmul.f32 %v6999_v5, %v6991_v55  ;;  %v4987_v1 = vpop.permute.xlu0 %4986 }
0x5171   :  { %6603 = vmatprep.subr.bf16.mxu1 %v6602_v8  ;;  %6630 = vmatprep.subr.msk.bf16.mxu0 %vm8310_vm14, %v6628_v9 }
0x5172   :  { %6304 = vmatprep.mubr.msk.f32.mxu0 %vm4138_vm13, %v4985_v11  ;;  %6248 = vmatprep.mubr.msk.f32.mxu1 %vm4138_vm13, %v4246_v21 }
0x5173   :  { %v7001_v24 = vpop.eup %7000  ;;  %6633 = vmatpush3.bf16.xpose.msk.msra.mxu0 %vm8310_vm14, %v6628_v9  ;;  %6249 = vmatmul.mubr.msk.f32.vlgmr.msra.gmra.mrb[42].mxu1 %vm4138_vm13, %v4247_v17 }
0x5174   :  { %v7003_v25 = vpop.eup %7002  ;;  %6605 = vmatpush3.bf16.msra.mxu1 %v6602_v8  ;;  %v4444_v7 = vmul.f32 %v7001_v24, %v6993_v23  ;;  %6642 = vmatprep.subr.bf16.mxu0 %v7291_v12 }
0x5175   :  { %v4445_v52 = vmul.f32 %v7003_v25, %v6995_v63  ;;  %6607 = vmatprep.subr.bf16.mxu1 %v6606_v50 }
0x5176   :  { %6262 = vmatprep.mubr.msk.f32.mxu1 %vm4138_vm13, %v4444_v7  ;;  %v4128_v7 = vld [vmem:[#allocation15 + $0x30] sm:$0xff] }
0x5177   :  { %6263 = vmatmul.mubr.msk.f32.vlgmr.msra.gmra.mrb[44].mxu1 %vm4138_vm13, %v4445_v52  ;;  %v4129_v52 = vld [vmem:[#allocation15 + $0x38] sm:$0xff] }
0x5178   :  { %6609 = vmatpush3.bf16.msra.mxu1 %v6606_v50 }
0x5179   :  { %6611 = vmatprep.subr.bf16.mxu1 %v6610_v33 }
0x517a   :  { %6305 = vmatmul.mubr.msk.f32.vlgmr.msra.gmra.mrb[44].mxu0 %vm4138_vm13, %v4987_v1 }
0x517b   :  { %6325 = vmatprep.mubr.msk.f32.mxu0 %vm7292_vm2, %v7290_v0 }
0x51a1   :  { %v4797_v53 = vpop.xlane.xlu0 %4796  ;;  %v4794_v40 = vpop.xlane.xlu1 %4793 }
0x51a2   :  { %v4799_v6 = vsub.f32 %v4791_v43, %v4797_v53  ;;  %v4798_v29 = vsub.f32 %v4790_v14, %v4794_v40 }
0x51a4   :  { %v4802_v30 = vmul.f32 1.442695, %v4799_v6  ;;  %v4800_v32 = vmul.f32 1.442695, %v4798_v29  ;;  %v6638_v6 = vpack.c.bf16 %v4129_v52, %v4128_v7 }
0x51a6   :  { %7004 = vpow2.f32 %v4802_v30 }
0x51a7   :  { %7006 = vpow2.f32 %v4800_v32 }
0x51b0   :  { %v7005_v47 = vpop.eup %7004 }
0x51b1   :  { %v7007_v34 = vpop.eup %7006  ;;  %v4807_v27 = vsel %vm4138_vm13, %v7005_v47, 0.0 }
0x51b2   :  { %4808 = vadd.xlane.f32.xlu1 %v4807_v27  ;;  %v4804_v44 = vsel %vm4138_vm13, %v7007_v34, 0.0  ;;  %v5654_v27 = vld [vmem:[%s8474_s14] ss:$0 sm:$0xff] }
0x51b3   :  { %4805 = vadd.xlane.f32.xlu0 %v4804_v44 }
0x51c9   :  { %6723 = vrot.lane.b32.xlu0 %v8293_v49, %s7297_s30 }
0x523f   :  { %v4809_v41 = vpop.xlane.xlu1 %4808 }
0x5240   :  { %v4806_v56 = vpop.xlane.xlu0 %4805 }
0x5241   :  { %7008 = vrcp.f32 %v4806_v56  ;;  %v5357_v56 = vld [vmem:[%s8475_s15 + $0x8] sm:$0xff] }
0x5242   :  { %7010 = vrcp.f32 %v4809_v41 }
0x5244   :  { %v6724_v39 = vpop.permute.xlu0 %6723 }
0x5245   :  { %v6726_v42 = vunpack.i.h.bf16 %v6724_v39  ;;  %v6725_v55 = vunpack.i.l.bf16 %v6724_v39 }
0x5246   :  { %v6250_v37 = vpop.f32.mrb[42].mxu1 }
0x5247   :  { %v4320_v13 = vpop.f32.mrb[43].mxu1  ;;  %v6620_v23 = vpack.c.bf16 %v6726_v42, %v6725_v55  ;;  %v5360_v42 = vld [vmem:[%s8475_s15 + $0x20] sm:$0xff]  ;;  %v5361_v55 = vld [vmem:[%s8475_s15 + $0x28] sm:$0xff] }
0x524a   :  { %v6264_v18 = vpop.f32.mrb[44].mxu1 }
0x524b   :  { %v4526_v20 = vpop.f32.mrb[45].mxu1  ;;  %v7009_v3 = vpop.eup %7008 }
0x524c   :  { %6269 = vmatprep.mubr.msk.f32.mxu1 %vm4138_vm13, %v4526_v20  ;;  %v7011_v48 = vpop.eup %7010  ;;  %v4812_v2 = vmul.f32 %v7009_v3, %v7007_v34  ;;  %v5362_v20 = vld [vmem:[%s8475_s15 + $0x30] sm:$0xff] }
0x524d   :  { %v6306_v63 = vpop.f32.mrb[44].mxu0  ;;  %6270 = vmatmul.mubr.msk.f32.vlgmr.msra.gmra.mrb[46].mxu1 %vm4138_vm13, %v6264_v18  ;;  %v4813_v60 = vmul.f32 %v7011_v48, %v7005_v47  ;;  %v6652_v18 = vpack.c.bf16 %v5361_v55, %v5360_v42  ;;  %v5656_v48 = vld [vmem:[#allocation16] ss:$0 sm:$0xff] }
0x524e   :  { %6613 = vmatpush3.bf16.msra.mxu1 %v6610_v33  ;;  %v5066_v26 = vpop.f32.mrb[45].mxu0  ;;  %6276 = vmatprep.mubr.msk.f32.mxu1 %vm4138_vm13, %v4320_v13  ;;  %v5076_v28 = vmul.f32 0.25, %v6306_v63  ;;  %v5356_v33 = vld [vmem:[%s8475_s15] sm:$0xff]  ;;  %v5445_v63 = vld [vmem:[#allocation18] sm:$0xff] }
0x524f   :  { %v5075_v46 = vmul.f32 0.25, %v5066_v26  ;;  %6621 = vmatprep.subr.bf16.mxu1 %v6620_v23  ;;  %v6646_v41 = vpack.c.bf16 %v5357_v56, %v5356_v33  ;;  %v5446_v26 = vld [vmem:[#allocation18 + $0x8] sm:$0xff] }
0x5250   :  { %v5078_v14 = vadd.f32 %v5076_v28, %v8335_v22  ;;  %v6658_v28 = vpack.c.bf16 %v5446_v26, %v5445_v63 }
0x5251   :  { %v5077_v43 = vadd.f32 %v5075_v46, %v8340_v16  ;;  %v4127_v16 = vld [vmem:[#allocation15 + $0x28] sm:$0xff] }
0x5252   :  { %v5082_v57 = vsel %vm4138_vm13, %v5078_v14, -inf  ;;  %v6624_v51 = vpack.c.bf16 %v4127_v16, %v4126_v58  ;;  %v5658_v16 = vld [vmem:[#allocation19] ss:$0 sm:$0xff] }
0x5253   :  { %v5079_v15 = vsel %vm4138_vm13, %v5077_v43, -inf }
0x5254   :  { %5080 = vmax.xlane.f32.xlu1 %v5079_v15 }
0x5255   :  { %6277 = vmatmul.mubr.msk.f32.vlgmr.msra.gmra.mrb[46].mxu1 %vm4138_vm13, %v6250_v37  ;;  %v5282_v37 = vld [vmem:[%s8492_s0] sm:$0x3] }
0x5256   :  { %6623 = vmatpush3.bf16.msra.mxu1 %v6620_v23  ;;  %6290 = vmatprep.mubr.msk.f32.mxu1 %vm4138_vm13, %v4812_v2 }
0x5257   :  { %6625 = vmatprep.subr.bf16.mxu1 %v6624_v51 }
0x5258   :  { %5083 = vmax.xlane.f32.xlu1 %v5082_v57 }
0x5259   :  { %6291 = vmatmul.mubr.msk.f32.vlgmr.msra.gmra.mrb[48].mxu1 %vm4138_vm13, %v4813_v60 }
0x525a   :  { %6627 = vmatpush3.bf16.msra.mxu1 %v6624_v51 }
0x52e1   :  { %v5081_v22 = vpop.xlane.xlu1 %5080 }
0x52e2   :  { %v5085_v59 = vsub.f32 %v5077_v43, %v5081_v22  ;;  %v5447_v43 = vld [vmem:[#allocation18 + $0x10] sm:$0xff] }
0x52e4   :  { %v5087_v54 = vmul.f32 1.442695, %v5085_v59 }
0x52e5   :  { %v5084_v61 = vpop.xlane.xlu1 %5083 }
0x52e6   :  { %v5086_v62 = vsub.f32 %v5078_v14, %v5084_v61  ;;  %v5448_v14 = vld [vmem:[#allocation18 + $0x18] sm:$0xff] }
0x52e7   :  { %v6661_v15 = vpack.c.bf16 %v5448_v14, %v5447_v43 }
0x52e8   :  { %v5089_v38 = vmul.f32 1.442695, %v5086_v62 }
0x52ea   :  { %7012 = vpow2.f32 %v5089_v38 }
0x52eb   :  { %7014 = vpow2.f32 %v5087_v54 }
0x52f4   :  { %v7013_v4 = vpop.eup %7012 }
0x52f5   :  { %v5094_v5 = vsel %vm4138_vm13, %v7013_v4, 0.0  ;;  %v7015_v8 = vpop.eup %7014 }
0x52f6   :  { %5095 = vadd.xlane.f32.xlu1 %v5094_v5  ;;  %v5091_v9 = vsel %vm4138_vm13, %v7015_v8, 0.0 }
0x52fa   :  { %5092 = vadd.xlane.f32.xlu1 %v5091_v9 }
0x530b   :  { %6728 = vrot.lane.b32.xlu1 %v8293_v49, %s7298_s9 }
0x532c   :  { %v6292_v11 = vpop.f32.mrb[48].mxu1 }
0x532d   :  { %v4892_v21 = vpop.f32.mrb[49].mxu1 }
0x532e   :  { %6297 = vmatprep.mubr.msk.f32.mxu1 %vm4138_vm13, %v4892_v21 }
0x532f   :  { %6298 = vmatmul.mubr.msk.f32.vlgmr.msra.gmra.mrb[46].mxu1 %vm4138_vm13, %v6292_v11 }
0x5383   :  { %v5096_v17 = vpop.xlane.xlu1 %5095 }
0x5384   :  { %7016 = vrcp.f32 %v5096_v17 }
0x5387   :  { %v5093_v24 = vpop.xlane.xlu1 %5092 }
0x5388   :  { %7018 = vrcp.f32 %v5093_v24 }
0x538b   :  { %v6729_v25 = vpop.permute.xlu1 %6728 }
0x538c   :  { %v6731_v1 = vunpack.i.h.bf16 %v6729_v25  ;;  %v6730_v53 = vunpack.i.l.bf16 %v6729_v25 }
0x538e   :  { %v6634_v40 = vpack.c.bf16 %v6731_v1, %v6730_v53  ;;  %v7017_v29 = vpop.eup %7016 }
0x538f   :  { %v5100_v32 = vmul.f32 %v7017_v29, %v7013_v4 }
0x5390   :  { %6635 = vmatprep.subr.bf16.mxu1 %v6634_v40 }
0x5391   :  { %6637 = vmatpush3.bf16.msra.mxu1 %v6634_v40 }
0x5392   :  { %v7019_v49 = vpop.eup %7018  ;;  %6639 = vmatprep.subr.bf16.mxu1 %v6638_v6 }
0x5393   :  { %v5099_v30 = vmul.f32 %v7019_v49, %v7015_v8 }
0x5395   :  { %6311 = vmatprep.mubr.msk.f32.mxu1 %vm4138_vm13, %v5099_v30 }
0x5396   :  { %6312 = vmatmul.mubr.msk.f32.vlgmr.msra.gmra.mrb[50].mxu1 %vm4138_vm13, %v5100_v32 }
0x5397   :  { %6641 = vmatpush3.bf16.msra.mxu1 %v6638_v6 }
0x5398   :  { %6657 = vmatprep.subr.bf16.mxu1 %v7291_v12 }
0x5469   :  { %v6313_v47 = vpop.f32.mrb[50].mxu1 }
0x546a   :  { %v5179_v34 = vpop.f32.mrb[51].mxu1 }
0x546b   :  { %6318 = vmatprep.mubr.msk.f32.mxu1 %vm4138_vm13, %v5179_v34 }
0x546c   :  { %6319 = vmatmul.mubr.msk.f32.vlgmr.msra.gmra.mrb[46].mxu1 %vm4138_vm13, %v6313_v47 }
0x546d   :  { %6355 = vmatprep.mubr.msk.f32.mxu1 %vm7292_vm2, %v7290_v0  ;;  %6659 = vmatpush3.bf16.msra.mxu1 %v6658_v28 }
0x546e   :  { %6660 = vmatprep.subr.bf16.mxu1 %v7291_v12 }
0x5471   :  { %6662 = vmatpush3.bf16.msra.mxu1 %v6661_v15 }
0x553f   :  { %v6320_v44 = vpop.f32.mrb[46].mxu1 }
0x5540   :  { %v5279_v19 = vadd.f32 %v6320_v44, %v5654_v27  ;;  %v5260_v45 = vpop.f32.mrb[47].mxu1 }
0x5541   :  { %v5278_v50 = vadd.f32 %v5654_v27, %v5260_v45 }
0x5542   :  { %v5281_v31 = vadd.f32 %v5279_v19, %v8277_v36  ;;  %v5359_v36 = vld [vmem:[%s8475_s15 + $0x18] sm:$0xff] }
0x5543   :  { %v5280_v10 = vadd.f32 %v5278_v50, %v8272_v35  ;;  %v5358_v35 = vld [vmem:[%s8475_s15 + $0x10] sm:$0xff] }
0x5544   :  { %v6649_v13 = vpack.c.bf16 %v5359_v36, %v5358_v35 }
0x5545   :  { %v6643_v39 = vpack.c.bf16 %v5281_v31, %v5280_v10 }
0x5547   :  { %6644 = vmatpush3.bf16.msra.mxu0 %v6643_v39 }
0x5548   :  { %6645 = vmatprep.subr.bf16.mxu0 %v7291_v12 }
0x554a   :  { %6326 = vmatmul.mubr.msk.f32.vlgmr.msra.gmra.mrb[46].mxu0 %vm4138_vm13, %v5282_v37 }
0x554b   :  { %6647 = vmatpush3.bf16.msra.mxu0 %v6646_v41  ;;  %6344 = vmatprep.mubr.msk.f32.mxu0 %vm7292_vm2, %v7290_v0  ;;  %v5363_v0 = vld [vmem:[%s8475_s15 + $0x38] sm:$0xff]  ;;  %s7299_s15 = smov [#allocation21]  }
0x554c   :  { %6648 = vmatprep.subr.bf16.mxu0 %v7291_v12  ;;  %v6655_v23 = vpack.c.bf16 %v5363_v0, %v5362_v20  ;;  %s5536_s6 = sshll.u32 %s7299_s15, 4  ;;  %s5537_s6 = int_to_ptr.vmem [resolvable:$true] %s5536_s6 }
0x554d   :  { %s7240_s30 = scalar_lea.vmem %s5537_s6, 32  ;;  %p7245_p11 = scmp.lt.s32.totalorder %s5537_s6, %s5537_s6 }
0x554e   :  { %p7241_p10 = scmp.ne.s32.totalorder %s5537_s6, %s7240_s30  ;;  %p7246_p12 = scmp.lt.s32.totalorder %s7240_s30, %s7240_s30 }
0x554f   :  { %6650 = vmatpush3.bf16.msra.mxu0 %v6649_v13 }
0x5550   :  { %6651 = vmatprep.subr.bf16.mxu0 %v7291_v12  ;;  %p7247_p13 = por %p7246_p12, %p7245_p11 }
0x5552   :  { %p7248_p0 = pnand %p7247_p13, %p7241_p10 }
0x5553   :  { %6653 = vmatpush3.bf16.msra.mxu0 %v6652_v18 }
0x5554   :  { %6654 = vmatprep.subr.bf16.mxu0 %v7291_v12 }
0x5557   :  { %6656 = vmatpush3.bf16.msra.mxu0 %v6655_v23 }
0x561d   :  { %v5352_v46 = vpop.f32.mrb[46].mxu0 }
0x561e   :  { %v6327_v3 = vpop.f32.mrb[47].mxu0  ;;  %6345 = vmatmul.mubr.msk.f32.vlgmr.msra.gmra.mrb[48].mxu0 %vm2175_vm12, %v5352_v46 }
0x56f1   :  { %v5440_v2 = vpop.f32.mrb[48].mxu0 }
0x56f2   :  { %v5441_v60 = vadd.f32 %v5656_v48, %v5440_v2  ;;  %v6346_v57 = vpop.f32.mrb[49].mxu0 }
0x56f4   :  { %v5444_v58 = vmax.f32 %v5441_v60, 0.0 }
0x56f6   :  { %6356 = vmatmul.mubr.msk.f32.vlgmr.msra.gmra.mrb[52].mxu1 %vm387_vm4, %v5444_v58 }
0x57c9   :  { %v5525_v51 = vpop.f32.mrb[52].mxu1 }
0x57ca   :  { %v5526_v12 = vadd.f32 %v5658_v16, %v5525_v51  ;;  %v6357_v22 = vpop.f32.mrb[53].mxu1 }
0x57cc   :  { %5529 = vst [vmem:[#allocation21] sm:$0x3] %v5526_v12 }
0x57cd   :  { %7251 = shalt.err (!%p7248_p0)
}
0x57ce   :  { %s7252_s18 = scalar_lea.hbm %s8479_s19, 32 }
0x57cf   :  { %p7253_p1 = scmp.ne.s32.totalorder %s8479_s19, %s7252_s18  ;;  %p7256_p2 = scmp.lt.u32.totalorder %s7252_s18, %s8479_s19 }
0x57d1   :  { %p7258_p3 = pnand %p7256_p2, %p7253_p1 }
0x57d3   :  { %7261 = shalt.err (!%p7258_p3)
}
0x57d4   :  { %5539 = dma.vmem_to_hbm [thread:$0]  %s5537_s6, 32, %s8479_s19, [#allocation6]  }
0x57d5   :  { %7274 = dma.done.wait [#allocation6], 32  }
0x57d6   :  { %7275 = vsyncadd [#allocation6], 4294967264 }
0x57d7   :  { %5543 = vsyncpa [#allocation5], 1 }
0x57d8   :  { %5544 = vsyncpa [#allocation8], 1 }
0x57d9   :  { %5545 = vsyncpa [#allocation11], 1 }
0x57da   :  { %5546 = vsyncpa [#allocation14], 1 }
0x57db   :  { %5547 = vsyncpa [#allocation17], 1 }
0x57dc   :  { %5548 = vsyncpa [#allocation20], 1 }
0x57dd   :  { %5549 = vsyncpa [#allocation6], 1 }

</bundles_post_ra>
